<compile_context>
chip_gen: v5e
topology: v5e:2x2
jax: 0.10.0
libtpu: 0.0.40
codegen_flags: <defaults>
</compile_context>

<pallas_src>
import functools

import numpy as np
import jax
import jax.numpy as jnp
from jax import lax
from jax.experimental import pallas as pl
from jax.experimental.pallas import tpu as pltpu


# ----------------------------- Pallas kernel -------------------------------------------------
def _replace_encoder_kernel(x_ref, wms_ref, bms_ref, wa_ref, ba_ref, wp_ref, bp_ref,
                            o_ref, *, seq_len, seg_att, inv_temp):
    f32 = jnp.float32
    R = x_ref.shape[0]
    T = seq_len

    # per-row position inside its sequence; boundary masks hoisted (built once, reused)
    tau = lax.broadcasted_iota(jnp.int32, (R, 1), 0) % T
    mask_ge = {j: tau >= j for j in range(1, seg_att)}

    def shift_rows(v, s):
        """y[b, t] = v[b, t - s] with zeros for t < s (0 < s < T, static)."""
        return jnp.where(mask_ge[s], pltpu.roll(v, shift=s, axis=0), 0.0)

    # ---- multi-scale grouped convs (msConv1..4): one wide-K MXU matmul on im2col'd x ----
    ms = jnp.dot(x_ref[...], wms_ref[...], preferred_element_type=f32) + bms_ref[...]

    # ---- attention branch: depthwise causal conv (seg_att taps) + ReLU ----
    wa = wa_ref[...]                                    # (seg_att, nFp)
    att = ba_ref[...] + ms * wa[seg_att - 1:seg_att, :]  # zero-shift tap
    for k in range(seg_att - 1):
        att = att + shift_rows(ms, (seg_att - 1) - k) * wa[k:k + 1, :]
    att = jnp.maximum(att, 0.0)

    # ---- causal average pool (window seg_att, stride 1): O(log seg_att) shift tree ----
    def window_sum(v, n):
        if n == 1:
            return v
        half = n // 2
        s = window_sum(v, half)
        s = s + shift_rows(s, half)
        if n % 2:
            s = s + shift_rows(v, n - 1)
        return s

    pooled = window_sum(att, seg_att) * (1.0 / seg_att)

    # ---- pointwise conv + channel softmax (padded lanes carry bias -1e30 -> weight ~0) ----
    logits = (jnp.dot(pooled, wp_ref[...], preferred_element_type=f32)
              + bp_ref[...]) * inv_temp
    logits = logits - jnp.max(logits, axis=-1, keepdims=True)
    e = jnp.exp(logits)
    att_w = e * pl.reciprocal(jnp.sum(e, axis=-1, keepdims=True), approx=True)

    # ---- out = att_w * relu(ms)  (padded lanes: relu(0) = 0) ----
    o_ref[...] = att_w * jnp.maximum(ms, 0.0)


# ----------------------------- parameter packing ---------------------------------------------
def _pack_params(params, *, n_timeFilters, n_msFilters, n_channs,
                 msFilter_timeLen, dilation_array, seg_att):
    nT, nMs, C, mLen = n_timeFilters, n_msFilters, n_channs, msFilter_timeLen
    n_dil = len(dilation_array)
    nF = nT * nMs * n_dil
    nFp = ((nF + 127) // 128) * 128          # lane-dense feature dim
    Cin = nT * C

    # Merge the 4 grouped multi-scale convs into one block-diagonal weight per unique
    # time shift (taps with equal shift summed); shifts later become im2col columns.
    shift_to_w = {}
    for i, d in enumerate(dilation_array):
        p = d * (mLen - 1)
        left = p // 2
        w = np.asarray(params["ms_w"][i], np.float32)          # (nT*nMs, 1, C, mLen)
        for k in range(mLen):
            s = left - k * d
            blk = shift_to_w.setdefault(s, np.zeros((Cin, nFp), np.float32))
            for t in range(nT):
                sub = w[t * nMs:(t + 1) * nMs, 0, :, k].T      # (C, nMs)
                c0 = i * nT * nMs + t * nMs
                blk[t * C:(t + 1) * C, c0:c0 + nMs] += sub
    ms_shifts = tuple(sorted(shift_to_w.keys()))
    wms = jnp.asarray(np.concatenate([shift_to_w[s] for s in ms_shifts], axis=0))

    def pad_lanes(v, fill=0.0):
        out = np.full((nFp,), fill, np.float32)
        out[:nF] = v
        return out

    bms = jnp.asarray(pad_lanes(np.concatenate(
        [np.asarray(b, np.float32) for b in params["ms_b"]]))[None, :])

    wa_np = np.zeros((seg_att, nFp), np.float32)
    wa_np[:, :nF] = np.asarray(params["att_w"], np.float32)[:, 0, 0, :].T
    wa = jnp.asarray(wa_np)
    ba = jnp.asarray(pad_lanes(np.asarray(params["att_b"], np.float32))[None, :])

    wp_np = np.zeros((nFp, nFp), np.float32)
    wp_np[:nF, :nF] = np.asarray(params["point_w"], np.float32)[:, :, 0, 0].T
    wp = jnp.asarray(wp_np)
    # padded logits get bias -1e30 so they contribute ~0 to the channel softmax
    bp = jnp.asarray(pad_lanes(np.asarray(params["point_b"], np.float32),
                               fill=-1e30)[None, :])
    return ms_shifts, nF, nFp, (wms, bms, wa, ba, wp, bp)


def _pick_block_batch(batch, seq_len, *, n_in_lanes, n_out_lanes,
                      target_rows=2048, vmem_budget_bytes=40 * 1024 * 1024):
    """Largest per-block batch count whose row block fits the VMEM budget and is
    sublane-aligned; falls back to the full extent (always a legal block)."""
    # rough per-row f32 bytes: double-buffered input + output blocks + ~4 live temps
    per_row = 4 * (2 * n_in_lanes + 2 * n_out_lanes + 4 * n_out_lanes)
    rows_cap = max(seq_len, min(target_rows, vmem_budget_bytes // per_row))
    tb_cap = max(1, min(batch, rows_cap // max(seq_len, 1)))
    for tb in range(tb_cap, 0, -1):
        if batch % tb == 0 and (tb * seq_len) % 8 == 0:
            return tb
    return batch


# ----------------------------- wrapper --------------------------------------------------------
def replace_encoder_forward(x_nchw, params, *, n_msFilters, msFilter_timeLen,
                            dilation_array, seg_att, temp=1.0):
    """x_nchw: (B, n_timeFilters, n_channs, T) float32 (same as the PyTorch module input)."""
    B, nT, C, T = x_nchw.shape
    Cin = nT * C

    ms_shifts, nF, nFp, (wms, bms, wa, ba, wp, bp) = _pack_params(
        params, n_timeFilters=nT, n_msFilters=n_msFilters, n_channs=C,
        msFilter_timeLen=msFilter_timeLen, dilation_array=dilation_array,
        seg_att=seg_att)

    # im2col the multi-scale conv time shifts in XLA: rows = (batch, time),
    # lanes = (shift, timeFilter, chann); boundary zeros baked in (no in-kernel masks).
    x_btc = jnp.transpose(x_nchw, (0, 3, 1, 2)).reshape(B, T, Cin).astype(jnp.float32)
    cols = []
    for s in ms_shifts:
        if s == 0:
            cols.append(x_btc)
        elif s > 0:
            cols.append(jnp.pad(x_btc, ((0, 0), (s, 0), (0, 0)))[:, :T, :])
        else:
            cols.append(jnp.pad(x_btc, ((0, 0), (0, -s), (0, 0)))[:, -s:, :])
    K = len(ms_shifts) * Cin
    x_im2col = jnp.concatenate(cols, axis=-1).reshape(B * T, K)

    TB = _pick_block_batch(B, T, n_in_lanes=K, n_out_lanes=nFp)
    RB = TB * T
    grid = (B // TB,)

    kernel = functools.partial(_replace_encoder_kernel, seq_len=T,
                               seg_att=seg_att, inv_temp=1.0 / float(temp))

    out_rows = pl.pallas_call(
        kernel,
        out_shape=jax.ShapeDtypeStruct((B * T, nFp), jnp.float32),
        grid_spec=pltpu.PrefetchScalarGridSpec(
            num_scalar_prefetch=0,
            grid=grid,
            in_specs=[
                pl.BlockSpec((RB, K), lambda i: (i, 0)),
                pl.BlockSpec(wms.shape, lambda i: (0, 0)),
                pl.BlockSpec(bms.shape, lambda i: (0, 0)),
                pl.BlockSpec(wa.shape, lambda i: (0, 0)),
                pl.BlockSpec(ba.shape, lambda i: (0, 0)),
                pl.BlockSpec(wp.shape, lambda i: (0, 0)),
                pl.BlockSpec(bp.shape, lambda i: (0, 0)),
            ],
            out_specs=pl.BlockSpec((RB, nFp), lambda i: (i, 0))),
        compiler_params=pltpu.CompilerParams(
            dimension_semantics=("parallel",),
            vmem_limit_bytes=48 * 1024 * 1024),
    )(x_im2col, wms, bms, wa, ba, wp, bp)

    # drop the lane padding, rows -> PyTorch layout (B, nF, 1, T)
    return jnp.transpose(out_rows[:, :nF].reshape(B, T, nF), (0, 2, 1))[:, :, None, :]


# ----------------------------- pure-JAX reference (sanity check) ------------------------------
def replace_encoder_reference(x, params, *, msFilter_timeLen, dilation_array, seg_att, temp=1.0):
    hp = lax.Precision.HIGHEST
    nT = x.shape[1]
    outs = []
    for i, d in enumerate(dilation_array):
        p = d * (msFilter_timeLen - 1)
        left, right = p // 2, p - p // 2
        o = lax.conv_general_dilated(
            x, params["ms_w"][i], window_strides=(1, 1),
            padding=((0, 0), (left, right)), rhs_dilation=(1, d),
            dimension_numbers=("NCHW", "OIHW", "NCHW"),
            feature_group_count=nT, precision=hp)
        outs.append(o + params["ms_b"][i][None, :, None, None])
    out = jnp.concatenate(outs, axis=1)                        # (B, nF, 1, T)
    nF = out.shape[1]

    attw = lax.conv_general_dilated(
        out, params["att_w"], (1, 1), ((0, 0), (seg_att - 1, 0)),
        dimension_numbers=("NCHW", "OIHW", "NCHW"),
        feature_group_count=nF, precision=hp)
    attw = jnp.maximum(attw + params["att_b"][None, :, None, None], 0.0)
    attw = jnp.pad(attw, ((0, 0), (0, 0), (0, 0), (seg_att - 1, 0)))
    attw = lax.reduce_window(attw, 0.0, lax.add,
                             (1, 1, 1, seg_att), (1, 1, 1, 1), "VALID") / seg_att
    attw = jnp.einsum("oi,biht->boht", params["point_w"][:, :, 0, 0], attw,
                      precision=hp) + params["point_b"][None, :, None, None]
    attw = jax.nn.softmax(attw / temp, axis=1)
    return attw * jnp.maximum(out, 0.0)


# ----------------------------- synthetic parameters -------------------------------------------
def init_params(key, *, n_timeFilters, n_msFilters, n_channs, msFilter_timeLen, seg_att, n_dil):
    nF = n_timeFilters * n_msFilters * n_dil
    ks = jax.random.split(key, 2 * n_dil + 4)

    def u(k, shape, fan_in):
        b = 1.0 / np.sqrt(fan_in)
        return jax.random.uniform(k, shape, jnp.float32, -b, b)

    fan_ms = n_channs * msFilter_timeLen
    ms_w = [u(ks[2 * i], (n_timeFilters * n_msFilters, 1, n_channs, msFilter_timeLen), fan_ms)
            for i in range(n_dil)]
    ms_b = [u(ks[2 * i + 1], (n_timeFilters * n_msFilters,), fan_ms) for i in range(n_dil)]
    return {
        "ms_w": ms_w, "ms_b": ms_b,
        "att_w": u(ks[-4], (nF, 1, 1, seg_att), seg_att),
        "att_b": u(ks[-3], (nF,), seg_att),
        "point_w": u(ks[-2], (nF, nF, 1, 1), nF),
        "point_b": u(ks[-1], (nF,), nF),
    }


# ----------------------------- driver ----------------------------------------------------------
if __name__ == "__main__":
    key = jax.random.PRNGKey(0)
    k_in, k_par = jax.random.split(key)

    # small config: n_timeFilters=2, n_msFilters=4, n_channs=8, msFilter_timeLen=3,
    # dilation_array=[1,6,12,24], seg_att=8, T=64, batch=4
    nT, nMs, C, mLen = 2, 4, 8, 3
    dil = (1, 6, 12, 24)
    seg = 8
    B, T = 4, 64
    nF = nT * nMs * len(dil)

    x = jax.random.normal(k_in, (B, nT, C, T), jnp.float32)
    params = init_params(k_par, n_timeFilters=nT, n_msFilters=nMs, n_channs=C,
                         msFilter_timeLen=mLen, seg_att=seg, n_dil=len(dil))

    out = replace_encoder_forward(x, params, n_msFilters=nMs, msFilter_timeLen=mLen,
                                  dilation_array=dil, seg_att=seg, temp=1.0)
    out = jax.block_until_ready(out)

    assert out.shape == (B, nF, 1, T), out.shape
    assert bool(jnp.all(jnp.isfinite(out)))

    ref = replace_encoder_reference(x, params, msFilter_timeLen=mLen,
                                    dilation_array=dil, seg_att=seg, temp=1.0)
    max_err = float(jnp.max(jnp.abs(out - ref)))
    assert max_err < 5e-2, max_err

    print("KERNEL_OK")
</pallas_src>

<mosaic_0001>
module attributes {stable_mosaic.version = 11 : i64} {
  func.func @_replace_encoder_kernel(%arg0: i32, %arg1: memref<256x144xf32, #tpu.memory_space<vmem>>, %arg2: memref<144x128xf32, #tpu.memory_space<vmem>>, %arg3: memref<1x128xf32, #tpu.memory_space<vmem>>, %arg4: memref<8x128xf32, #tpu.memory_space<vmem>>, %arg5: memref<1x128xf32, #tpu.memory_space<vmem>>, %arg6: memref<128x128xf32, #tpu.memory_space<vmem>>, %arg7: memref<1x128xf32, #tpu.memory_space<vmem>>, %arg8: memref<256x128xf32, #tpu.memory_space<vmem>>) attributes {dimension_semantics = [#tpu.dimension_semantics<parallel>], iteration_bounds = array<i64: 1>, scalar_prefetch = 0 : i64, scratch_operands = 0 : i64, tpu.core_type = #tpu.core_type<tc>, window_params = [{transform_indices = @transform_0, window_bounds = array<i64: 256, 144>}, {pipeline_mode = #tpu.pipeline_mode<synchronous>, transform_indices = @transform_1, window_bounds = array<i64: 144, 128>}, {pipeline_mode = #tpu.pipeline_mode<synchronous>, transform_indices = @transform_2, window_bounds = array<i64: 1, 128>}, {pipeline_mode = #tpu.pipeline_mode<synchronous>, transform_indices = @transform_3, window_bounds = array<i64: 8, 128>}, {pipeline_mode = #tpu.pipeline_mode<synchronous>, transform_indices = @transform_4, window_bounds = array<i64: 1, 128>}, {pipeline_mode = #tpu.pipeline_mode<synchronous>, transform_indices = @transform_5, window_bounds = array<i64: 128, 128>}, {pipeline_mode = #tpu.pipeline_mode<synchronous>, transform_indices = @transform_6, window_bounds = array<i64: 1, 128>}, {transform_indices = @transform_7, window_bounds = array<i64: 256, 128>}]} {
    %0 = tpu.iota {dimensions = array<i32: 0>} : vector<256x1xi32>
    %c64_i32 = arith.constant 64 : i32
    %c0_i32 = arith.constant 0 : i32
    %1 = arith.cmpi eq, %c64_i32, %c0_i32 : i32
    %c1_i32 = arith.constant 1 : i32
    %2 = arith.select %1, %c1_i32, %c64_i32 : i32
    %3 = vector.broadcast %2 : i32 to vector<256x1xi32>
    %4 = arith.remsi %0, %3 : vector<256x1xi32>
    %c0_i32_0 = arith.constant 0 : i32
    %5 = vector.broadcast %c0_i32_0 : i32 to vector<256x1xi32>
    %6 = arith.cmpi ne, %4, %5 : vector<256x1xi32>
    %c0_i32_1 = arith.constant 0 : i32
    %7 = vector.broadcast %c0_i32_1 : i32 to vector<256x1xi32>
    %8 = arith.cmpi slt, %4, %7 : vector<256x1xi32>
    %c0_i32_2 = arith.constant 0 : i32
    %9 = arith.cmpi slt, %2, %c0_i32_2 : i32
    %10 = vector.broadcast %9 : i1 to vector<256x1xi1>
    %11 = vector.broadcast %10 : vector<256x1xi1> to vector<256x1xi1>
    %12 = arith.xori %8, %11 : vector<256x1xi1>
    %13 = arith.andi %12, %6 : vector<256x1xi1>
    %14 = vector.broadcast %2 : i32 to vector<256x1xi32>
    %15 = arith.addi %4, %14 : vector<256x1xi32>
    %16 = arith.select %13, %15, %4 : vector<256x1xi1>, vector<256x1xi32>
    %c1_i32_3 = arith.constant 1 : i32
    %17 = vector.broadcast %c1_i32_3 : i32 to vector<256x1xi32>
    %18 = arith.cmpi sge, %16, %17 : vector<256x1xi32>
    %c2_i32 = arith.constant 2 : i32
    %19 = vector.broadcast %c2_i32 : i32 to vector<256x1xi32>
    %20 = arith.cmpi sge, %16, %19 : vector<256x1xi32>
    %c3_i32 = arith.constant 3 : i32
    %21 = vector.broadcast %c3_i32 : i32 to vector<256x1xi32>
    %22 = arith.cmpi sge, %16, %21 : vector<256x1xi32>
    %c4_i32 = arith.constant 4 : i32
    %23 = vector.broadcast %c4_i32 : i32 to vector<256x1xi32>
    %24 = arith.cmpi sge, %16, %23 : vector<256x1xi32>
    %c5_i32 = arith.constant 5 : i32
    %25 = vector.broadcast %c5_i32 : i32 to vector<256x1xi32>
    %26 = arith.cmpi sge, %16, %25 : vector<256x1xi32>
    %c6_i32 = arith.constant 6 : i32
    %27 = vector.broadcast %c6_i32 : i32 to vector<256x1xi32>
    %28 = arith.cmpi sge, %16, %27 : vector<256x1xi32>
    %c7_i32 = arith.constant 7 : i32
    %29 = vector.broadcast %c7_i32 : i32 to vector<256x1xi32>
    %30 = arith.cmpi sge, %16, %29 : vector<256x1xi32>
    %c0 = arith.constant 0 : index
    %c0_4 = arith.constant 0 : index
    %31 = vector.load %arg1[%c0, %c0_4] : memref<256x144xf32, #tpu.memory_space<vmem>>, vector<256x144xf32>
    %c0_5 = arith.constant 0 : index
    %c0_6 = arith.constant 0 : index
    %32 = vector.load %arg2[%c0_5, %c0_6] : memref<144x128xf32, #tpu.memory_space<vmem>>, vector<144x128xf32>
    %cst = arith.constant dense<0.000000e+00> : vector<256x128xf32>
    %33 = tpu.matmul %31, %32, %cst {dimension_numbers = #tpu.dot_dimension_numbers<[1], [0], [0], [1], [0, 0, 1, 1], [], []>} : vector<256x144xf32>, vector<144x128xf32>, vector<256x128xf32> -> vector<256x128xf32>
    %c0_7 = arith.constant 0 : index
    %c0_8 = arith.constant 0 : index
    %34 = vector.load %arg3[%c0_7, %c0_8] : memref<1x128xf32, #tpu.memory_space<vmem>>, vector<1x128xf32>
    %35 = vector.broadcast %34 : vector<1x128xf32> to vector<256x128xf32>
    %36 = arith.addf %33, %35 : vector<256x128xf32>
    %c0_9 = arith.constant 0 : index
    %c0_10 = arith.constant 0 : index
    %37 = vector.load %arg4[%c0_9, %c0_10] : memref<8x128xf32, #tpu.memory_space<vmem>>, vector<8x128xf32>
    %c0_11 = arith.constant 0 : index
    %c0_12 = arith.constant 0 : index
    %38 = vector.load %arg5[%c0_11, %c0_12] : memref<1x128xf32, #tpu.memory_space<vmem>>, vector<1x128xf32>
    %39 = vector.extract_strided_slice %37 {offsets = [7, 0], sizes = [1, 128], strides = [1, 1]} : vector<8x128xf32> to vector<1x128xf32>
    %40 = vector.broadcast %39 : vector<1x128xf32> to vector<256x128xf32>
    %41 = arith.mulf %36, %40 : vector<256x128xf32>
    %42 = vector.broadcast %38 : vector<1x128xf32> to vector<256x128xf32>
    %43 = arith.addf %42, %41 : vector<256x128xf32>
    %c7_i32_13 = arith.constant 7 : i32
    %44 = tpu.dynamic_rotate %36 by %c7_i32_13 dim 0 : vector<256x128xf32>, i32 -> vector<256x128xf32>
    %cst_14 = arith.constant 0.000000e+00 : f32
    %45 = vector.shape_cast %30 : vector<256x1xi1> to vector<256x1xi1>
    %46 = vector.broadcast %45 : vector<256x1xi1> to vector<256x128xi1>
    %47 = vector.broadcast %cst_14 : f32 to vector<256x128xf32>
    %48 = arith.select %46, %44, %47 : vector<256x128xi1>, vector<256x128xf32>
    %49 = vector.extract_strided_slice %37 {offsets = [0, 0], sizes = [1, 128], strides = [1, 1]} : vector<8x128xf32> to vector<1x128xf32>
    %50 = vector.broadcast %49 : vector<1x128xf32> to vector<256x128xf32>
    %51 = arith.mulf %48, %50 : vector<256x128xf32>
    %52 = arith.addf %43, %51 : vector<256x128xf32>
    %c6_i32_15 = arith.constant 6 : i32
    %53 = tpu.dynamic_rotate %36 by %c6_i32_15 dim 0 : vector<256x128xf32>, i32 -> vector<256x128xf32>
    %cst_16 = arith.constant 0.000000e+00 : f32
    %54 = vector.shape_cast %28 : vector<256x1xi1> to vector<256x1xi1>
    %55 = vector.broadcast %54 : vector<256x1xi1> to vector<256x128xi1>
    %56 = vector.broadcast %cst_16 : f32 to vector<256x128xf32>
    %57 = arith.select %55, %53, %56 : vector<256x128xi1>, vector<256x128xf32>
    %58 = vector.extract_strided_slice %37 {offsets = [1, 0], sizes = [1, 128], strides = [1, 1]} : vector<8x128xf32> to vector<1x128xf32>
    %59 = vector.broadcast %58 : vector<1x128xf32> to vector<256x128xf32>
    %60 = arith.mulf %57, %59 : vector<256x128xf32>
    %61 = arith.addf %52, %60 : vector<256x128xf32>
    %c5_i32_17 = arith.constant 5 : i32
    %62 = tpu.dynamic_rotate %36 by %c5_i32_17 dim 0 : vector<256x128xf32>, i32 -> vector<256x128xf32>
    %cst_18 = arith.constant 0.000000e+00 : f32
    %63 = vector.shape_cast %26 : vector<256x1xi1> to vector<256x1xi1>
    %64 = vector.broadcast %63 : vector<256x1xi1> to vector<256x128xi1>
    %65 = vector.broadcast %cst_18 : f32 to vector<256x128xf32>
    %66 = arith.select %64, %62, %65 : vector<256x128xi1>, vector<256x128xf32>
    %67 = vector.extract_strided_slice %37 {offsets = [2, 0], sizes = [1, 128], strides = [1, 1]} : vector<8x128xf32> to vector<1x128xf32>
    %68 = vector.broadcast %67 : vector<1x128xf32> to vector<256x128xf32>
    %69 = arith.mulf %66, %68 : vector<256x128xf32>
    %70 = arith.addf %61, %69 : vector<256x128xf32>
    %c4_i32_19 = arith.constant 4 : i32
    %71 = tpu.dynamic_rotate %36 by %c4_i32_19 dim 0 : vector<256x128xf32>, i32 -> vector<256x128xf32>
    %cst_20 = arith.constant 0.000000e+00 : f32
    %72 = vector.shape_cast %24 : vector<256x1xi1> to vector<256x1xi1>
    %73 = vector.broadcast %72 : vector<256x1xi1> to vector<256x128xi1>
    %74 = vector.broadcast %cst_20 : f32 to vector<256x128xf32>
    %75 = arith.select %73, %71, %74 : vector<256x128xi1>, vector<256x128xf32>
    %76 = vector.extract_strided_slice %37 {offsets = [3, 0], sizes = [1, 128], strides = [1, 1]} : vector<8x128xf32> to vector<1x128xf32>
    %77 = vector.broadcast %76 : vector<1x128xf32> to vector<256x128xf32>
    %78 = arith.mulf %75, %77 : vector<256x128xf32>
    %79 = arith.addf %70, %78 : vector<256x128xf32>
    %c3_i32_21 = arith.constant 3 : i32
    %80 = tpu.dynamic_rotate %36 by %c3_i32_21 dim 0 : vector<256x128xf32>, i32 -> vector<256x128xf32>
    %cst_22 = arith.constant 0.000000e+00 : f32
    %81 = vector.shape_cast %22 : vector<256x1xi1> to vector<256x1xi1>
    %82 = vector.broadcast %81 : vector<256x1xi1> to vector<256x128xi1>
    %83 = vector.broadcast %cst_22 : f32 to vector<256x128xf32>
    %84 = arith.select %82, %80, %83 : vector<256x128xi1>, vector<256x128xf32>
    %85 = vector.extract_strided_slice %37 {offsets = [4, 0], sizes = [1, 128], strides = [1, 1]} : vector<8x128xf32> to vector<1x128xf32>
    %86 = vector.broadcast %85 : vector<1x128xf32> to vector<256x128xf32>
    %87 = arith.mulf %84, %86 : vector<256x128xf32>
    %88 = arith.addf %79, %87 : vector<256x128xf32>
    %c2_i32_23 = arith.constant 2 : i32
    %89 = tpu.dynamic_rotate %36 by %c2_i32_23 dim 0 : vector<256x128xf32>, i32 -> vector<256x128xf32>
    %cst_24 = arith.constant 0.000000e+00 : f32
    %90 = vector.shape_cast %20 : vector<256x1xi1> to vector<256x1xi1>
    %91 = vector.broadcast %90 : vector<256x1xi1> to vector<256x128xi1>
    %92 = vector.broadcast %cst_24 : f32 to vector<256x128xf32>
    %93 = arith.select %91, %89, %92 : vector<256x128xi1>, vector<256x128xf32>
    %94 = vector.extract_strided_slice %37 {offsets = [5, 0], sizes = [1, 128], strides = [1, 1]} : vector<8x128xf32> to vector<1x128xf32>
    %95 = vector.broadcast %94 : vector<1x128xf32> to vector<256x128xf32>
    %96 = arith.mulf %93, %95 : vector<256x128xf32>
    %97 = arith.addf %88, %96 : vector<256x128xf32>
    %c1_i32_25 = arith.constant 1 : i32
    %98 = tpu.dynamic_rotate %36 by %c1_i32_25 dim 0 : vector<256x128xf32>, i32 -> vector<256x128xf32>
    %cst_26 = arith.constant 0.000000e+00 : f32
    %99 = vector.shape_cast %18 : vector<256x1xi1> to vector<256x1xi1>
    %100 = vector.broadcast %99 : vector<256x1xi1> to vector<256x128xi1>
    %101 = vector.broadcast %cst_26 : f32 to vector<256x128xf32>
    %102 = arith.select %100, %98, %101 : vector<256x128xi1>, vector<256x128xf32>
    %103 = vector.extract_strided_slice %37 {offsets = [6, 0], sizes = [1, 128], strides = [1, 1]} : vector<8x128xf32> to vector<1x128xf32>
    %104 = vector.broadcast %103 : vector<1x128xf32> to vector<256x128xf32>
    %105 = arith.mulf %102, %104 : vector<256x128xf32>
    %106 = arith.addf %97, %105 : vector<256x128xf32>
    %cst_27 = arith.constant 0.000000e+00 : f32
    %107 = vector.broadcast %cst_27 : f32 to vector<256x128xf32>
    %108 = arith.maximumf %106, %107 : vector<256x128xf32>
    %c1_i32_28 = arith.constant 1 : i32
    %109 = tpu.dynamic_rotate %108 by %c1_i32_28 dim 0 : vector<256x128xf32>, i32 -> vector<256x128xf32>
    %cst_29 = arith.constant 0.000000e+00 : f32
    %110 = vector.shape_cast %18 : vector<256x1xi1> to vector<256x1xi1>
    %111 = vector.broadcast %110 : vector<256x1xi1> to vector<256x128xi1>
    %112 = vector.broadcast %cst_29 : f32 to vector<256x128xf32>
    %113 = arith.select %111, %109, %112 : vector<256x128xi1>, vector<256x128xf32>
    %114 = arith.addf %108, %113 : vector<256x128xf32>
    %c2_i32_30 = arith.constant 2 : i32
    %115 = tpu.dynamic_rotate %114 by %c2_i32_30 dim 0 : vector<256x128xf32>, i32 -> vector<256x128xf32>
    %cst_31 = arith.constant 0.000000e+00 : f32
    %116 = vector.shape_cast %20 : vector<256x1xi1> to vector<256x1xi1>
    %117 = vector.broadcast %116 : vector<256x1xi1> to vector<256x128xi1>
    %118 = vector.broadcast %cst_31 : f32 to vector<256x128xf32>
    %119 = arith.select %117, %115, %118 : vector<256x128xi1>, vector<256x128xf32>
    %120 = arith.addf %114, %119 : vector<256x128xf32>
    %c4_i32_32 = arith.constant 4 : i32
    %121 = tpu.dynamic_rotate %120 by %c4_i32_32 dim 0 : vector<256x128xf32>, i32 -> vector<256x128xf32>
    %cst_33 = arith.constant 0.000000e+00 : f32
    %122 = vector.shape_cast %24 : vector<256x1xi1> to vector<256x1xi1>
    %123 = vector.broadcast %122 : vector<256x1xi1> to vector<256x128xi1>
    %124 = vector.broadcast %cst_33 : f32 to vector<256x128xf32>
    %125 = arith.select %123, %121, %124 : vector<256x128xi1>, vector<256x128xf32>
    %126 = arith.addf %120, %125 : vector<256x128xf32>
    %cst_34 = arith.constant 1.250000e-01 : f32
    %127 = vector.broadcast %cst_34 : f32 to vector<256x128xf32>
    %128 = arith.mulf %126, %127 : vector<256x128xf32>
    %c0_35 = arith.constant 0 : index
    %c0_36 = arith.constant 0 : index
    %129 = vector.load %arg6[%c0_35, %c0_36] : memref<128x128xf32, #tpu.memory_space<vmem>>, vector<128x128xf32>
    %cst_37 = arith.constant dense<0.000000e+00> : vector<256x128xf32>
    %130 = tpu.matmul %128, %129, %cst_37 {dimension_numbers = #tpu.dot_dimension_numbers<[1], [0], [0], [1], [0, 0, 1, 1], [], []>} : vector<256x128xf32>, vector<128x128xf32>, vector<256x128xf32> -> vector<256x128xf32>
    %c0_38 = arith.constant 0 : index
    %c0_39 = arith.constant 0 : index
    %131 = vector.load %arg7[%c0_38, %c0_39] : memref<1x128xf32, #tpu.memory_space<vmem>>, vector<1x128xf32>
    %132 = vector.broadcast %131 : vector<1x128xf32> to vector<256x128xf32>
    %133 = arith.addf %130, %132 : vector<256x128xf32>
    %cst_40 = arith.constant 1.000000e+00 : f32
    %134 = vector.broadcast %cst_40 : f32 to vector<256x128xf32>
    %135 = arith.mulf %133, %134 : vector<256x128xf32>
    %cst_41 = arith.constant dense<0xFF800000> : vector<256xf32>
    %136 = vector.multi_reduction <maximumf>, %135, %cst_41 [1] : vector<256x128xf32> to vector<256xf32>
    %137 = vector.shape_cast %136 : vector<256xf32> to vector<256x1xf32>
    %138 = vector.broadcast %137 : vector<256x1xf32> to vector<256x128xf32>
    %139 = arith.subf %135, %138 : vector<256x128xf32>
    %140 = math.exp %139 : vector<256x128xf32>
    %cst_42 = arith.constant dense<0.000000e+00> : vector<256xf32>
    %141 = vector.multi_reduction <add>, %140, %cst_42 [1] : vector<256x128xf32> to vector<256xf32>
    %142 = vector.shape_cast %141 : vector<256xf32> to vector<256x1xf32>
    %143 = tpu.reciprocal %142 {approx = true} : vector<256x1xf32> -> vector<256x1xf32>
    %144 = vector.broadcast %143 : vector<256x1xf32> to vector<256x128xf32>
    %145 = arith.mulf %140, %144 : vector<256x128xf32>
    %cst_43 = arith.constant 0.000000e+00 : f32
    %146 = vector.broadcast %cst_43 : f32 to vector<256x128xf32>
    %147 = arith.maximumf %36, %146 : vector<256x128xf32>
    %148 = arith.mulf %145, %147 : vector<256x128xf32>
    %c0_44 = arith.constant 0 : index
    %c0_45 = arith.constant 0 : index
    %149 = vector.load %arg8[%c0_44, %c0_45] : memref<256x128xf32, #tpu.memory_space<vmem>>, vector<256x128xf32>
    tpu.vector_store %arg8[%c0_44, %c0_45], %148 {strides = array<i32>} : memref<256x128xf32, #tpu.memory_space<vmem>>, vector<256x128xf32>,
    return
  }
  func.func @transform_0(%arg0: i32) -> (i32, i32) {
    %c0_i32 = arith.constant 0 : i32
    %c0_i32_0 = arith.constant 0 : i32
    return %arg0, %c0_i32 : i32, i32
  }
  func.func @transform_1(%arg0: i32) -> (i32, i32) {
    %c0_i32 = arith.constant 0 : i32
    %c0_i32_0 = arith.constant 0 : i32
    %c0_i32_1 = arith.constant 0 : i32
    return %c0_i32, %c0_i32_0 : i32, i32
  }
  func.func @transform_2(%arg0: i32) -> (i32, i32) {
    %c0_i32 = arith.constant 0 : i32
    %c0_i32_0 = arith.constant 0 : i32
    %c0_i32_1 = arith.constant 0 : i32
    return %c0_i32, %c0_i32_0 : i32, i32
  }
  func.func @transform_3(%arg0: i32) -> (i32, i32) {
    %c0_i32 = arith.constant 0 : i32
    %c0_i32_0 = arith.constant 0 : i32
    %c0_i32_1 = arith.constant 0 : i32
    return %c0_i32, %c0_i32_0 : i32, i32
  }
  func.func @transform_4(%arg0: i32) -> (i32, i32) {
    %c0_i32 = arith.constant 0 : i32
    %c0_i32_0 = arith.constant 0 : i32
    %c0_i32_1 = arith.constant 0 : i32
    return %c0_i32, %c0_i32_0 : i32, i32
  }
  func.func @transform_5(%arg0: i32) -> (i32, i32) {
    %c0_i32 = arith.constant 0 : i32
    %c0_i32_0 = arith.constant 0 : i32
    %c0_i32_1 = arith.constant 0 : i32
    return %c0_i32, %c0_i32_0 : i32, i32
  }
  func.func @transform_6(%arg0: i32) -> (i32, i32) {
    %c0_i32 = arith.constant 0 : i32
    %c0_i32_0 = arith.constant 0 : i32
    %c0_i32_1 = arith.constant 0 : i32
    return %c0_i32, %c0_i32_0 : i32, i32
  }
  func.func @transform_7(%arg0: i32) -> (i32, i32) {
    %c0_i32 = arith.constant 0 : i32
    %c0_i32_0 = arith.constant 0 : i32
    return %arg0, %c0_i32 : i32, i32
  }
}

</mosaic_0001>

<bundles_post_ra>
// kernel: tpu_custom_call.1
= control target key start
LH: loop header
LB: loop body
LE: loop exit
PB: predicated region body
PF: predicated region fallthrough
CT: control target
= control target key end

     0   :  { %vm754_vm0 = vcmask 130048   ;;  %s7205_s0 = inlined_call_operand.vmem [shape: f32[256,144], index: 0, kind: input, shape index: {}]   ;;  %s7206_s1 = inlined_call_operand.vmem [shape: f32[144,128], index: 1, kind: input, shape index: {}]   ;;  %s7207_s2 = inlined_call_operand.vmem [shape: f32[1,128], index: 2, kind: input, shape index: {}]   ;;  %s7208_s3 = inlined_call_operand.vmem [shape: f32[8,128], index: 3, kind: input, shape index: {}]   ;;  %s7209_s4 = inlined_call_operand.vmem [shape: f32[1,128], index: 4, kind: input, shape index: {}]   ;;  %s7210_s5 = inlined_call_operand.vmem [shape: f32[128,128], index: 5, kind: input, shape index: {}]   ;;  %s7211_s6 = inlined_call_operand.vmem [shape: f32[1,128], index: 6, kind: input, shape index: {}]   ;;  %s7212_s7 = inlined_call_operand.hbm [shape: f32[256,128], index: 7, kind: output, shape index: {}]  }
   0x1   :  { %v747_v0 = vld [vmem:[%s7206_s1 + $0x78] sm:$0xff]  ;;  %v3990_v1 = vld [vmem:[%s7206_s1 + $0x88] sm:$0xff]  ;;  %v746_v2 = vld [vmem:[%s7206_s1 + $0x70] sm:$0xff] }
   0x2   :  { %851 = vmatpush.msra.mxu0 %v747_v0  ;;  %3744 = vmatpush.msra.mxu3 %v747_v0  ;;  %v748_v3 = vld [vmem:[%s7206_s1 + $0x80] sm:$0xff]  ;;  %v669_v4 = vld [vmem:[%s7205_s0 + $0x8] sm:$0xff]  ;;  %v743_v7 = vld [vmem:[%s7206_s1 + $0x58] sm:$0xff] }
   0x3   :  { %978 = vmatpush.msra.mxu1 %v3990_v1  ;;  %v745_v5 = vld [vmem:[%s7206_s1 + $0x68] sm:$0xff]  ;;  %v744_v6 = vld [vmem:[%s7206_s1 + $0x60] sm:$0xff]  ;;  %v742_v8 = vld [vmem:[%s7206_s1 + $0x50] sm:$0xff] }
   0x4   :  { %852 = vmatpush.msra.mxu0 %v746_v2  ;;  %3745 = vmatpush.msra.mxu3 %v746_v2  ;;  %v671_v9 = vld [vmem:[%s7205_s0 + $0x18] sm:$0xff]  ;;  %v741_v10 = vld [vmem:[%s7206_s1 + $0x48] sm:$0xff] }
   0x5   :  { %979 = vmatpush.msra.mxu1 %v748_v3 }
   0x6   :  { %3712 = vmatmul.msk.f32.vlgmr.msra.gmra.mxu1 %vm754_vm0, %v669_v4  ;;  %853 = vmatpush.msra.mxu0 %v745_v5 }
   0x7   :  { %3746 = vmatpush.msra.mxu3 %v745_v5 }
   0x8   :  { %854 = vmatpush.msra.mxu0 %v744_v6 }
   0x9   :  { %3747 = vmatpush.msra.mxu3 %v744_v6 }
   0xa   :  { %855 = vmatpush.msra.mxu0 %v743_v7 }
   0xb   :  { %3748 = vmatpush.msra.mxu3 %v743_v7 }
   0xc   :  { %12 = vsyncpa [#allocation3], 0  ;;  %856 = vmatpush.msra.mxu0 %v742_v8  ;;  %v740_v11 = vld [vmem:[%s7206_s1 + $0x40] sm:$0xff]  ;;  %v739_v12 = vld [vmem:[%s7206_s1 + $0x38] sm:$0xff]  ;;  %s3700_s15 = sshll.u32 %s7212_s7, 4  ;;  %s3942_s16 = smov 128   ;;  %s3701_s15 = int_to_ptr.hbm [resolvable:$true] %s3700_s15 }
   0xd   :  { %3749 = vmatpush.msra.mxu3 %v742_v8  ;;  %v738_v13 = vld [vmem:[%s7206_s1 + $0x30] sm:$0xff]  ;;  %v673_v14 = vld [vmem:[%s7205_s0 + $0x28] sm:$0xff]  ;;  %v736_v16 = vld [vmem:[%s7206_s1 + $0x20] sm:$0xff]  ;;  %s3943_s17 = smov 8  }
   0xe   :  { %3713 = vmatmul.msk.f32.gmra.mxu1 %vm754_vm0, %v671_v9  ;;  %857 = vmatpush.msra.mxu0 %v741_v10  ;;  %v737_v15 = vld [vmem:[%s7206_s1 + $0x28] sm:$0xff]  ;;  %v735_v17 = vld [vmem:[%s7206_s1 + $0x18] sm:$0xff]  ;;  %v734_v18 = vld [vmem:[%s7206_s1 + $0x10] sm:$0xff] }
   0xf   :  { %3750 = vmatpush.msra.mxu3 %v741_v10  ;;  %v675_v19 = vld [vmem:[%s7205_s0 + $0x38] sm:$0xff]  ;;  %v733_v20 = vld [vmem:[%s7206_s1 + $0x8] sm:$0xff]  ;;  %v732_v21 = vld [vmem:[%s7206_s1] sm:$0xff] }
  0x10   :  { %858 = vmatpush.msra.mxu0 %v740_v11  ;;  %v668_v22 = vld [vmem:[%s7205_s0] sm:$0xff]  ;;  %v677_v24 = vld [vmem:[%s7205_s0 + $0x48] sm:$0xff]  ;;  %v670_v25 = vld [vmem:[%s7205_s0 + $0x10] sm:$0xff] }
  0x11   :  { %3751 = vmatpush.msra.mxu3 %v740_v11  ;;  %v716_v23 = vld [vmem:[%s7205_s0 + $0x180] sm:$0xff]  ;;  %v718_v26 = vld [vmem:[%s7205_s0 + $0x190] sm:$0xff]  ;;  %v679_v27 = vld [vmem:[%s7205_s0 + $0x58] sm:$0xff] }
  0x12   :  { %859 = vmatpush.msra.mxu0 %v739_v12  ;;  %v672_v28 = vld [vmem:[%s7205_s0 + $0x20] sm:$0xff]  ;;  %v681_v30 = vld [vmem:[%s7205_s0 + $0x68] sm:$0xff]  ;;  %v674_v31 = vld [vmem:[%s7205_s0 + $0x30] sm:$0xff] }
  0x13   :  { %3752 = vmatpush.msra.mxu3 %v739_v12  ;;  %v720_v29 = vld [vmem:[%s7205_s0 + $0x1a0] sm:$0xff]  ;;  %v722_v32 = vld [vmem:[%s7205_s0 + $0x1b0] sm:$0xff]  ;;  %v683_v33 = vld [vmem:[%s7205_s0 + $0x78] sm:$0xff]  ;;  %v27_v12 = vlaneseq }
  0x14   :  { %860 = vmatpush.msra.mxu0 %v738_v13  ;;  %v676_v34 = vld [vmem:[%s7205_s0 + $0x40] sm:$0xff]  ;;  %v685_v36 = vld [vmem:[%s7205_s0 + $0x88] sm:$0xff]  ;;  %v678_v37 = vld [vmem:[%s7205_s0 + $0x50] sm:$0xff] }
  0x15   :  { %3753 = vmatpush.msra.mxu3 %v738_v13  ;;  %v724_v35 = vld [vmem:[%s7205_s0 + $0x1c0] sm:$0xff]  ;;  %v726_v38 = vld [vmem:[%s7205_s0 + $0x1d0] sm:$0xff]  ;;  %v687_v39 = vld [vmem:[%s7205_s0 + $0x98] sm:$0xff] }
  0x16   :  { %3714 = vmatmul.msk.f32.gmra.mxu1 %vm754_vm0, %v673_v14  ;;  %861 = vmatpush.msra.mxu0 %v737_v15  ;;  %v680_v40 = vld [vmem:[%s7205_s0 + $0x60] sm:$0xff]  ;;  %v689_v42 = vld [vmem:[%s7205_s0 + $0xa8] sm:$0xff]  ;;  %v682_v43 = vld [vmem:[%s7205_s0 + $0x70] sm:$0xff] }
  0x17   :  { %3754 = vmatpush.msra.mxu3 %v737_v15  ;;  %v728_v41 = vld [vmem:[%s7205_s0 + $0x1e0] sm:$0xff]  ;;  %v730_v44 = vld [vmem:[%s7205_s0 + $0x1f0] sm:$0xff]  ;;  %v691_v45 = vld [vmem:[%s7205_s0 + $0xb8] sm:$0xff] }
  0x18   :  { %862 = vmatpush.msra.mxu0 %v736_v16  ;;  %v684_v46 = vld [vmem:[%s7205_s0 + $0x80] sm:$0xff]  ;;  %v723_v47 = vld [vmem:[%s7205_s0 + $0x1b8] sm:$0xff]  ;;  %v693_v48 = vld [vmem:[%s7205_s0 + $0xc8] sm:$0xff] }
  0x19   :  { %3755 = vmatpush.msra.mxu3 %v736_v16  ;;  %v686_v49 = vld [vmem:[%s7205_s0 + $0x90] sm:$0xff]  ;;  %v725_v50 = vld [vmem:[%s7205_s0 + $0x1c8] sm:$0xff]  ;;  %v695_v51 = vld [vmem:[%s7205_s0 + $0xd8] sm:$0xff] }
  0x1a   :  { %863 = vmatpush.msra.mxu0 %v735_v17  ;;  %v688_v52 = vld [vmem:[%s7205_s0 + $0xa0] sm:$0xff]  ;;  %v727_v53 = vld [vmem:[%s7205_s0 + $0x1d8] sm:$0xff]  ;;  %v697_v54 = vld [vmem:[%s7205_s0 + $0xe8] sm:$0xff] }
  0x1b   :  { %3756 = vmatpush.msra.mxu3 %v735_v17  ;;  %v690_v55 = vld [vmem:[%s7205_s0 + $0xb0] sm:$0xff]  ;;  %v729_v56 = vld [vmem:[%s7205_s0 + $0x1e8] sm:$0xff]  ;;  %v699_v57 = vld [vmem:[%s7205_s0 + $0xf8] sm:$0xff] }
  0x1c   :  { %864 = vmatpush.msra.mxu0 %v734_v18  ;;  %v692_v58 = vld [vmem:[%s7205_s0 + $0xc0] sm:$0xff]  ;;  %v731_v59 = vld [vmem:[%s7205_s0 + $0x1f8] sm:$0xff]  ;;  %v701_v61 = vld [vmem:[%s7205_s0 + $0x108] sm:$0xff] }
  0x1d   :  { %3757 = vmatpush.msra.mxu3 %v734_v18  ;;  %v694_v62 = vld [vmem:[%s7205_s0 + $0xd0] sm:$0xff]  ;;  %v703_v0 = vld [vmem:[%s7205_s0 + $0x118] sm:$0xff]  ;;  %v4218_v7 = vld [vmem:[%s7207_s2] ss:$0 sm:$0xff] }
  0x1e   :  { %3715 = vmatmul.msk.f32.gmra.mxu1 %vm754_vm0, %v675_v19  ;;  %865 = vmatpush.msra.mxu0 %v733_v20  ;;  %v698_v4 = vld [vmem:[%s7205_s0 + $0xf0] sm:$0xff]  ;;  %v707_v6 = vld [vmem:[%s7205_s0 + $0x138] sm:$0xff]  ;;  %v700_v9 = vld [vmem:[%s7205_s0 + $0x100] sm:$0xff]  ;;  %v4241_v19 = vshrl.u32 %v27_v12, 7 }
  0x1f   :  { %3758 = vmatpush.msra.mxu3 %v733_v20  ;;  %v709_v14 = vld [vmem:[%s7205_s0 + $0x148] sm:$0xff]  ;;  %v702_v17 = vld [vmem:[%s7205_s0 + $0x110] sm:$0xff]  ;;  %v1077_v18 = vld [vmem:[%s7208_s3] sm:$0xff] }
  0x20   :  { %866 = vmatpush.msra.mxu0 %v732_v21  ;;  %vm1179_vm1 = vcmp.lt.s32.totalorder %v4241_v19, 7  ;;  %vm1405_vm2 = vcmp.lt.s32.totalorder %v4241_v19, 6  ;;  %vm1631_vm3 = vcmp.lt.s32.totalorder %v4241_v19, 5  ;;  %vm1857_vm4 = vcmp.lt.s32.totalorder %v4241_v19, 4  ;;  %v706_v12 = vld [vmem:[%s7205_s0 + $0x130] sm:$0xff] }
  0x21   :  { %3759 = vmatpush.msra.mxu3 %v732_v21  ;;  %867 = vmatmul.f32.vlgmr.msra.gmra.mxu0 %v668_v22  ;;  %v4246_v22 = vperm.slane %v1077_v18, 7  ;;  %vm2083_vm5 = vcmp.lt.s32.totalorder %v4241_v19, 3  ;;  %vm2309_vm6 = vcmp.lt.s32.totalorder %v4241_v19, 2  ;;  %vm2535_vm7 = vcmp.lt.s32.totalorder %v4241_v19, 1 }
  0x22   :  { %939 = vmatmul.f32.vlgmr.msra.gmra.mxu3 %v716_v23 }
  0x23   :  { %3760 = vmatpush.msrb.mxu3 %v3990_v1  ;;  %v696_v1 = vld [vmem:[%s7205_s0 + $0xe0] sm:$0xff] }
  0x25   :  { %3761 = vmatpush.msrb.mxu3 %v748_v3  ;;  %v705_v3 = vld [vmem:[%s7205_s0 + $0x128] sm:$0xff] }
  0x26   :  { %3716 = vmatmul.msk.f32.gmra.mxu1 %vm754_vm0, %v677_v24  ;;  %v4250_v24 = vperm.slane %v1077_v18, 0 }
  0x29   :  { %870 = vmatmul.f32.gmra.mxu0 %v670_v25 }
  0x2a   :  { %942 = vmatmul.f32.gmra.mxu3 %v718_v26  ;;  %v711_v26 = vld [vmem:[%s7205_s0 + $0x158] sm:$0xff] }
  0x2e   :  { %3717 = vmatmul.msk.f32.gmra.mxu1 %vm754_vm0, %v679_v27  ;;  %v4261_v27 = vld [vmem:[%s7209_s4] ss:$0 sm:$0xff] }
  0x31   :  { %873 = vmatmul.f32.gmra.mxu0 %v672_v28 }
  0x32   :  { %945 = vmatmul.f32.gmra.mxu3 %v720_v29 }
  0x36   :  { %3718 = vmatmul.msk.f32.gmra.mxu1 %vm754_vm0, %v681_v30 }
  0x39   :  { %876 = vmatmul.f32.gmra.mxu0 %v674_v31 }
  0x3a   :  { %948 = vmatmul.f32.gmra.mxu3 %v722_v32  ;;  %v4268_v32 = vperm.slane %v1077_v18, 1 }
  0x3e   :  { %3719 = vmatmul.msk.f32.gmra.mxu1 %vm754_vm0, %v683_v33 }
  0x41   :  { %879 = vmatmul.f32.gmra.mxu0 %v676_v34 }
  0x42   :  { %951 = vmatmul.f32.gmra.mxu3 %v724_v35 }
  0x46   :  { %3720 = vmatmul.msk.f32.gmra.mxu1 %vm754_vm0, %v685_v36 }
  0x49   :  { %882 = vmatmul.f32.gmra.mxu0 %v678_v37 }
  0x4a   :  { %954 = vmatmul.f32.gmra.mxu3 %v726_v38 }
  0x4e   :  { %3721 = vmatmul.msk.f32.gmra.mxu1 %vm754_vm0, %v687_v39 }
  0x51   :  { %885 = vmatmul.f32.gmra.mxu0 %v680_v40  ;;  %v704_v40 = vld [vmem:[%s7205_s0 + $0x120] sm:$0xff] }
  0x52   :  { %957 = vmatmul.f32.gmra.mxu3 %v728_v41  ;;  %v4288_v41 = vperm.slane %v1077_v18, 2 }
  0x56   :  { %3722 = vmatmul.msk.f32.gmra.mxu1 %vm754_vm0, %v689_v42 }
  0x59   :  { %888 = vmatmul.f32.gmra.mxu0 %v682_v43 }
  0x5a   :  { %960 = vmatmul.f32.gmra.mxu3 %v730_v44 }
  0x5e   :  { %3723 = vmatmul.msk.f32.gmra.mxu1 %vm754_vm0, %v691_v45  ;;  %v4294_v45 = vperm.slane %v1077_v18, 3 }
  0x61   :  { %891 = vmatmul.f32.gmra.mxu0 %v684_v46 }
  0x62   :  { %3739 = vmatmul.msk.f32.vlgmr.msrb.gmra.mxu3 %vm754_vm0, %v723_v47 }
  0x66   :  { %3724 = vmatmul.msk.f32.gmra.mxu1 %vm754_vm0, %v693_v48  ;;  %v4302_v48 = vperm.slane %v1077_v18, 4 }
  0x69   :  { %894 = vmatmul.f32.gmra.mxu0 %v686_v49 }
  0x6a   :  { %3740 = vmatmul.msk.f32.gmra.mxu3 %vm754_vm0, %v725_v50 }
  0x6e   :  { %3725 = vmatmul.msk.f32.gmra.mxu1 %vm754_vm0, %v695_v51 }
  0x71   :  { %897 = vmatmul.f32.gmra.mxu0 %v688_v52  ;;  %v4308_v52 = vperm.slane %v1077_v18, 5 }
  0x72   :  { %3741 = vmatmul.msk.f32.gmra.mxu3 %vm754_vm0, %v727_v53 }
  0x76   :  { %3726 = vmatmul.msk.f32.gmra.mxu1 %vm754_vm0, %v697_v54 }
  0x79   :  { %900 = vmatmul.f32.gmra.mxu0 %v690_v55 }
  0x7a   :  { %3742 = vmatmul.msk.f32.gmra.mxu3 %vm754_vm0, %v729_v56 }
  0x7e   :  { %3727 = vmatmul.msk.f32.gmra.mxu1 %vm754_vm0, %v699_v57 }
  0x81   :  { %903 = vmatmul.f32.gmra.mxu0 %v692_v58  ;;  %v713_v58 = vld [vmem:[%s7205_s0 + $0x168] sm:$0xff] }
  0x82   :  { %3743 = vmatmul.msk.f32.gmra.mxu3 %vm754_vm0, %v731_v59 }
  0x83   :  { %v981_v60 = vpop.f32.mrf.mxu1 }
  0x86   :  { %3728 = vmatmul.msk.f32.gmra.mxu1 %vm754_vm0, %v701_v61 }
  0x89   :  { %906 = vmatmul.f32.gmra.mxu0 %v694_v62 }
  0x8b   :  { %v984_v63 = vpop.f32.mrf.mxu1 }
  0x8e   :  { %3729 = vmatmul.msk.f32.gmra.mxu1 %vm754_vm0, %v703_v0  ;;  %v4328_v0 = vperm.slane %v1077_v18, 6 }
  0x91   :  { %909 = vmatmul.f32.gmra.mxu0 %v696_v1 }
  0x93   :  { %v987_v2 = vpop.f32.mrf.mxu1 }
  0x96   :  { %3730 = vmatmul.msk.f32.gmra.mxu1 %vm754_vm0, %v705_v3 }
  0x99   :  { %912 = vmatmul.f32.gmra.mxu0 %v698_v4 }
  0x9b   :  { %v4210_v5 = vpop.f32.mrf.mxu1 }
  0x9e   :  { %3731 = vmatmul.msk.f32.gmra.mxu1 %vm754_vm0, %v707_v6  ;;  %v868_v8 = vpop.f32.mrf.mxu0 }
  0x9f   :  { %v869_v10 = vadd.f32 %v4218_v7, %v868_v8 }
  0xa1   :  { %v4225_v11 = vadd.f32 %v981_v60, %v869_v10  ;;  %915 = vmatmul.f32.gmra.mxu0 %v700_v9 }
  0xa3   :  { %7366 = vst [vmem:[#allocation5_spill] sm:$0xff] %v4225_v11  ;;  %v4227_v13 = vpop.f32.mrf.mxu1  ;;  %v7220_v23 = vrot.slane %v4225_v11, 1  ;;  %v7219_v28 = vrot.slane %v4225_v11, 2  ;;  %v7217_v35 = vrot.slane %v4225_v11, 3  ;;  %v7216_v47 = vrot.slane %v4225_v11, 4 }
  0xa5   :  { %v4232_v15 = vpop.f32.mrf.mxu3 }
  0xa6   :  { %3732 = vmatmul.msk.f32.gmra.mxu1 %vm754_vm0, %v709_v14  ;;  %v871_v16 = vpop.f32.mrf.mxu0 }
  0xa7   :  { %v872_v20 = vadd.f32 %v4218_v7, %v871_v16 }
  0xa9   :  { %v4244_v21 = vadd.f32 %v984_v63, %v872_v20  ;;  %918 = vmatmul.f32.gmra.mxu0 %v702_v17  ;;  %v7215_v63 = vrot.slane %v4225_v11, 5 }
  0xab   :  { %7367 = vst [vmem:[#allocation6_spill] sm:$0xff] %v4244_v21  ;;  %v4253_v25 = vpop.f32.mrf.mxu1  ;;  %v1081_v29 = vmul.f32 %v4246_v22, %v4244_v21  ;;  %v1148_v30 = vrot.slane %v4244_v21, 1  ;;  %v1374_v31 = vrot.slane %v4244_v21, 2  ;;  %v1600_v33 = vrot.slane %v4244_v21, 3 }
  0xac   :  { %v1826_v42 = vrot.slane %v4244_v21, 4  ;;  %v2052_v56 = vrot.slane %v4244_v21, 5  ;;  %v2504_v17 = vrot.slane %v4244_v21, 7 }
  0xad   :  { %v4272_v34 = vpop.f32.mrf.mxu3  ;;  %v1116_v36 = vadd.f32 %v4261_v27, %v1081_v29  ;;  %v1210_v37 = vsel %vm1179_vm1, %v7220_v23, %v1148_v30  ;;  %v1436_v38 = vsel %vm1405_vm2, %v7219_v28, %v1374_v31  ;;  %v1662_v46 = vsel %vm1631_vm3, %v7217_v35, %v1600_v33 }
  0xae   :  { %3733 = vmatmul.msk.f32.gmra.mxu1 %vm754_vm0, %v711_v26  ;;  %v874_v39 = vpop.f32.mrf.mxu0  ;;  %v1310_v43 = vmul.f32 %v4250_v24, %v1210_v37  ;;  %v1536_v50 = vmul.f32 %v4268_v32, %v1436_v38  ;;  %v1888_v53 = vsel %vm1857_vm4, %v7216_v47, %v1826_v42  ;;  %v1762_v55 = vmul.f32 %v4288_v41, %v1662_v46 }
  0xaf   :  { %v875_v44 = vadd.f32 %v4218_v7, %v874_v39  ;;  %v1988_v14 = vmul.f32 %v4294_v45, %v1888_v53  ;;  %v2114_v16 = vsel %vm2083_vm5, %v7215_v63, %v2052_v56  ;;  %v7214_v26 = vrot.slane %v4225_v11, 6  ;;  %v715_v53 = vld [vmem:[%s7205_s0 + $0x178] sm:$0xff] }
  0xb0   :  { %v1342_v49 = vadd.f32 %v1310_v43, %v1116_v36 }
  0xb1   :  { %v4305_v51 = vadd.f32 %v987_v2, %v875_v44  ;;  %921 = vmatmul.f32.gmra.mxu0 %v704_v40  ;;  %v2278_v2 = vrot.slane %v4244_v21, 6  ;;  %v2214_v40 = vmul.f32 %v4302_v48, %v2114_v16 }
  0xb2   :  { %v1568_v54 = vadd.f32 %v1536_v50, %v1342_v49 }
  0xb3   :  { %7368 = vst [vmem:[#allocation7_spill] sm:$0xff] %v4305_v51  ;;  %v4317_v57 = vpop.f32.mrf.mxu1  ;;  %v1082_v59 = vmul.f32 %v4246_v22, %v4305_v51  ;;  %v1149_v60 = vrot.slane %v4305_v51, 1  ;;  %v1375_v61 = vrot.slane %v4305_v51, 2  ;;  %v1601_v62 = vrot.slane %v4305_v51, 3 }
  0xb4   :  { %v1794_v1 = vadd.f32 %v1762_v55, %v1568_v54  ;;  %v1827_v9 = vrot.slane %v4305_v51, 4  ;;  %v2340_v43 = vsel %vm2309_vm6, %v7214_v26, %v2278_v2  ;;  %v2279_v49 = vrot.slane %v4305_v51, 6 }
  0xb5   :  { %v4331_v3 = vpop.f32.mrf.mxu3  ;;  %v1117_v4 = vadd.f32 %v4261_v27, %v1082_v59  ;;  %v1209_v6 = vsel %vm1179_vm1, %v1148_v30, %v1149_v60  ;;  %v1435_v8 = vsel %vm1405_vm2, %v1374_v31, %v1375_v61  ;;  %v1661_v29 = vsel %vm1631_vm3, %v1600_v33, %v1601_v62 }
  0xb6   :  { %3734 = vmatmul.msk.f32.gmra.mxu1 %vm754_vm0, %v713_v58  ;;  %v877_v10 = vpop.f32.mrf.mxu0  ;;  %v1311_v18 = vmul.f32 %v4250_v24, %v1209_v6  ;;  %v2053_v30 = vrot.slane %v4305_v51, 5  ;;  %v7213_v31 = vrot.slane %v4225_v11, 7  ;;  %v2020_v36 = vadd.f32 %v1988_v14, %v1794_v1 }
  0xb7   :  { %v878_v20 = vadd.f32 %v4218_v7, %v877_v10  ;;  %v1537_v38 = vmul.f32 %v4268_v32, %v1435_v8  ;;  %v1887_v33 = vsel %vm1857_vm4, %v1826_v42, %v1827_v9 }
  0xb8   :  { %v1343_v37 = vadd.f32 %v1311_v18, %v1117_v4  ;;  %v2566_v44 = vsel %vm2535_vm7, %v7213_v31, %v2504_v17  ;;  %v2113_v54 = vsel %vm2083_vm5, %v2052_v56, %v2053_v30  ;;  %v2246_v59 = vadd.f32 %v2214_v40, %v2020_v36  ;;  %v708_v18 = vld [vmem:[%s7205_s0 + $0x140] sm:$0xff] }
  0xb9   :  { %v4358_v39 = vadd.f32 %v4210_v5, %v878_v20  ;;  %924 = vmatmul.f32.gmra.mxu0 %v706_v12  ;;  %v1763_v5 = vmul.f32 %v4288_v41, %v1661_v29  ;;  %v1989_v4 = vmul.f32 %v4294_v45, %v1887_v33  ;;  %v2440_v20 = vmul.f32 %v4308_v52, %v2340_v43 }
  0xba   :  { %v1569_v46 = vadd.f32 %v1537_v38, %v1343_v37  ;;  %v2505_v36 = vrot.slane %v4305_v51, 7  ;;  %v2215_v38 = vmul.f32 %v4302_v48, %v2113_v54  ;;  %v2339_v43 = vsel %vm2309_vm6, %v2278_v2, %v2279_v49 }
  0xbb   :  { %7369 = vst [vmem:[#allocation8_spill] sm:$0xff] %v4358_v39  ;;  %v4373_v50 = vpop.f32.mrf.mxu1  ;;  %v1083_v42 = vmul.f32 %v4246_v22, %v4358_v39  ;;  %v1150_v55 = vrot.slane %v4358_v39, 1  ;;  %v1376_v58 = vrot.slane %v4358_v39, 2  ;;  %v1602_v6 = vrot.slane %v4358_v39, 3 }
  0xbc   :  { %v1795_v1 = vadd.f32 %v1763_v5, %v1569_v46  ;;  %v1828_v14 = vrot.slane %v4358_v39, 4  ;;  %v2472_v33 = vadd.f32 %v2440_v20, %v2246_v59  ;;  %v2054_v54 = vrot.slane %v4358_v39, 5 }
  0xbd   :  { %v4386_v8 = vpop.f32.mrf.mxu3  ;;  %v1118_v10 = vadd.f32 %v4261_v27, %v1083_v42  ;;  %v1208_v56 = vsel %vm1179_vm1, %v1149_v60, %v1150_v55  ;;  %v1434_v12 = vsel %vm1405_vm2, %v1375_v61, %v1376_v58  ;;  %v2666_v61 = vmul.f32 %v4328_v0, %v2566_v44 }
  0xbe   :  { %3735 = vmatmul.msk.f32.gmra.mxu1 %vm754_vm0, %v715_v53  ;;  %v880_v16 = vpop.f32.mrf.mxu0  ;;  %v2021_v29 = vadd.f32 %v1989_v4, %v1795_v1  ;;  %v1312_v37 = vmul.f32 %v4250_v24, %v1208_v56  ;;  %v1660_v40 = vsel %vm1631_vm3, %v1601_v62, %v1602_v6  ;;  %v1538_v5 = vmul.f32 %v4268_v32, %v1434_v12 }
  0xbf   :  { %v881_v60 = vadd.f32 %v4218_v7, %v880_v16  ;;  %v1886_v44 = vsel %vm1857_vm4, %v1827_v9, %v1828_v14  ;;  %v2280_v62 = vrot.slane %v4358_v39, 6  ;;  %v2565_v2 = vsel %vm2535_vm7, %v2504_v17, %v2505_v36 }
  0xc0   :  { %v1344_v46 = vadd.f32 %v1312_v37, %v1118_v10  ;;  %v2247_v42 = vadd.f32 %v2215_v38, %v2021_v29  ;;  %v1764_v1 = vmul.f32 %v4288_v41, %v1660_v40  ;;  %v2112_v9 = vsel %vm2083_vm5, %v2053_v30, %v2054_v54  ;;  %v710_v40 = vld [vmem:[%s7205_s0 + $0x150] sm:$0xff] }
  0xc1   :  { %v4412_v53 = vadd.f32 %v4227_v13, %v881_v60  ;;  %927 = vmatmul.f32.gmra.mxu0 %v708_v18  ;;  %v717_v13 = vld [vmem:[%s7205_s0 + $0x188] sm:$0xff]  ;;  %v2338_v10 = vsel %vm2309_vm6, %v2279_v49, %v2280_v62  ;;  %v2441_v12 = vmul.f32 %v4308_v52, %v2339_v43  ;;  %v1990_v18 = vmul.f32 %v4294_v45, %v1886_v44 }
  0xc2   :  { %v1570_v59 = vadd.f32 %v1538_v5, %v1344_v46  ;;  %v2506_v20 = vrot.slane %v4358_v39, 7  ;;  %v2667_v30 = vmul.f32 %v4328_v0, %v2565_v2  ;;  %v2216_v5 = vmul.f32 %v4302_v48, %v2112_v9 }
  0xc3   :  { %7370 = vst [vmem:[#allocation9_spill] sm:$0xff] %v4412_v53  ;;  %v4423_v4 = vpop.f32.mrf.mxu1  ;;  %v1084_v17 = vmul.f32 %v4246_v22, %v4412_v53  ;;  %v1151_v56 = vrot.slane %v4412_v53, 1  ;;  %v1377_v60 = vrot.slane %v4412_v53, 2  ;;  %v2473_v43 = vadd.f32 %v2441_v12, %v2247_v42 }
  0xc4   :  { %v1796_v16 = vadd.f32 %v1764_v1, %v1570_v59  ;;  %v2442_v44 = vmul.f32 %v4308_v52, %v2338_v10  ;;  %v1603_v1 = vrot.slane %v4412_v53, 3  ;;  %v1829_v12 = vrot.slane %v4412_v53, 4 }
  0xc5   :  { %v4440_v29 = vpop.f32.mrf.mxu3  ;;  %v1119_v37 = vadd.f32 %v4261_v27, %v1084_v17  ;;  %v1207_v49 = vsel %vm1179_vm1, %v1150_v55, %v1151_v56  ;;  %v1433_v55 = vsel %vm1405_vm2, %v1376_v58, %v1377_v60  ;;  %v2564_v17 = vsel %vm2535_vm7, %v2505_v36, %v2506_v20 }
  0xc6   :  { %3736 = vmatmul.msk.f32.gmra.mxu1 %vm754_vm0, %v717_v13  ;;  %v883_v38 = vpop.f32.mrf.mxu0  ;;  %v2022_v46 = vadd.f32 %v1990_v18, %v1796_v16  ;;  %v1313_v59 = vmul.f32 %v4250_v24, %v1207_v49  ;;  %v1539_v42 = vmul.f32 %v4268_v32, %v1433_v55  ;;  %v1659_v58 = vsel %vm1631_vm3, %v1602_v6, %v1603_v1 }
  0xc7   :  { %v884_v2 = vadd.f32 %v4218_v7, %v883_v38  ;;  %v2055_v16 = vrot.slane %v4412_v53, 5  ;;  %v4470_v18 = vadd.f32 %v2666_v61, %v2472_v33  ;;  %v4472_v49 = vadd.f32 %v2667_v30, %v2473_v43 }
  0xc8   :  { %v2248_v13 = vadd.f32 %v2216_v5, %v2022_v46  ;;  %v1345_v10 = vadd.f32 %v1313_v59, %v1119_v37  ;;  %v719_v37 = vld [vmem:[%s7205_s0 + $0x198] sm:$0xff]  ;;  %v1765_v6 = vmul.f32 %v4288_v41, %v1659_v58  ;;  %v2668_v61 = vmul.f32 %v4328_v0, %v2564_v17 }
  0xc9   :  { %v4463_v9 = vadd.f32 %v4253_v25, %v884_v2  ;;  %930 = vmatmul.f32.gmra.mxu0 %v710_v40  ;;  %v1885_v25 = vsel %vm1857_vm4, %v1828_v14, %v1829_v12  ;;  %v2111_v33 = vsel %vm2083_vm5, %v2054_v54, %v2055_v16  ;;  %v2281_v30 = vrot.slane %v4412_v53, 6  ;;  %v712_v54 = vld [vmem:[%s7205_s0 + $0x160] sm:$0xff] }
  0xca   :  { %v2474_v36 = vadd.f32 %v2442_v44, %v2248_v13  ;;  %v1571_v40 = vadd.f32 %v1539_v42, %v1345_v10  ;;  %v2507_v43 = vrot.slane %v4412_v53, 7  ;;  %v1991_v5 = vmul.f32 %v4294_v45, %v1885_v25 }
  0xcb   :  { %7371 = vst [vmem:[#allocation10_spill] sm:$0xff] %v4463_v9  ;;  %v4478_v38 = vpop.f32.mrf.mxu1  ;;  %v1085_v44 = vmul.f32 %v4246_v22, %v4463_v9  ;;  %v1152_v2 = vrot.slane %v4463_v9, 1  ;;  %v7218_v55 = vmax.f32 %v4470_v18, 0.0  ;;  %v2731_v13 = vmax.f32 %v4472_v49, 0.0 }
  0xcc   :  { %v1797_v14 = vadd.f32 %v1765_v6, %v1571_v40  ;;  %v4501_v17 = vadd.f32 %v2668_v61, %v2474_v36  ;;  %v2337_v42 = vsel %vm2309_vm6, %v2280_v62, %v2281_v30  ;;  %v2217_v25 = vmul.f32 %v4302_v48, %v2111_v33 }
  0xcd   :  { %v4489_v46 = vpop.f32.mrf.mxu3  ;;  %v2443_v40 = vmul.f32 %v4308_v52, %v2337_v42  ;;  %v1120_v36 = vadd.f32 %v4261_v27, %v1085_v44  ;;  %v1206_v6 = vsel %vm1179_vm1, %v1151_v56, %v1152_v2  ;;  %v1378_v62 = vrot.slane %v4463_v9, 2 }
  0xce   :  { %3737 = vmatmul.msk.f32.gmra.mxu1 %vm754_vm0, %v719_v37  ;;  %v886_v59 = vpop.f32.mrf.mxu0  ;;  %v2023_v58 = vadd.f32 %v1991_v5, %v1797_v14  ;;  %v2563_v37 = vsel %vm2535_vm7, %v2506_v20, %v2507_v43  ;;  %v1314_v14 = vmul.f32 %v4250_v24, %v1206_v6  ;;  %v1604_v20 = vrot.slane %v4463_v9, 3 }
  0xcf   :  { %v887_v10 = vadd.f32 %v4218_v7, %v886_v59  ;;  %v2732_v5 = vmax.f32 %v4501_v17, 0.0  ;;  %v1432_v44 = vsel %vm1405_vm2, %v1377_v60, %v1378_v62  ;;  %v1830_v59 = vrot.slane %v4463_v9, 4 }
  0xd0   :  { %v2249_v33 = vadd.f32 %v2217_v25, %v2023_v58  ;;  %v7224_v56 = vrot.slane %v4463_v9, 5  ;;  %v1346_v58 = vadd.f32 %v1314_v14, %v1120_v36  ;;  %v1540_v25 = vmul.f32 %v4268_v32, %v1432_v44 }
  0xd1   :  { %v4521_v61 = vadd.f32 %v4317_v57, %v887_v10  ;;  %933 = vmatmul.f32.gmra.mxu0 %v712_v54  ;;  %v721_v57 = vld [vmem:[%s7205_s0 + $0x1a8] sm:$0xff]  ;;  %v2669_v10 = vmul.f32 %v4328_v0, %v2563_v37  ;;  %v1658_v6 = vsel %vm1631_vm3, %v1603_v1, %v1604_v20  ;;  %v1884_v60 = vsel %vm1857_vm4, %v1829_v12, %v1830_v59  ;;  %v714_v1 = vld [vmem:[%s7205_s0 + $0x170] sm:$0xff] }
  0xd2   :  { %v2475_v54 = vadd.f32 %v2443_v40, %v2249_v33  ;;  %v7223_v31 = vrot.slane %v4463_v9, 6  ;;  %v1572_v47 = vadd.f32 %v1540_v25, %v1346_v58  ;;  %v1766_v35 = vmul.f32 %v4288_v41, %v1658_v6 }
  0xd3   :  { %7372 = vst [vmem:[#allocation11_spill] sm:$0xff] %v4521_v61  ;;  %v4530_v42 = vpop.f32.mrf.mxu1  ;;  %v2110_v37 = vsel %vm2083_vm5, %v2055_v16, %v7224_v56  ;;  %v4555_v12 = vrot.slane %v7218_v55, 7  ;;  %v2763_v36 = vrot.slane %v2731_v13, 7  ;;  %v2764_v33 = vrot.slane %v2732_v5, 7 }
  0xd4   :  { %v2701_v63 = vadd.f32 %v2669_v10, %v2475_v54  ;;  %v1798_v44 = vadd.f32 %v1766_v35, %v1572_v47  ;;  %v2218_v54 = vmul.f32 %v4302_v48, %v2110_v37  ;;  %v2336_v10 = vsel %vm2309_vm6, %v2281_v30, %v7223_v31 }
  0xd5   :  { %v4542_v26 = vpop.f32.mrf.mxu3  ;;  %v7221_v58 = vrot.slane %v4463_v9, 7  ;;  %v1086_v25 = vmul.f32 %v4246_v22, %v4521_v61  ;;  %v1153_v47 = vrot.slane %v4521_v61, 1  ;;  %v7222_v37 = vrot.slane %v4521_v61, 2 }
  0xd6   :  { %3738 = vmatmul.msk.f32.gmra.mxu1 %vm754_vm0, %v721_v57  ;;  %v889_v40 = vpop.f32.mrf.mxu0  ;;  %v2733_v16 = vmax.f32 %v2701_v63, 0.0  ;;  %v1992_v57 = vmul.f32 %v4294_v45, %v1884_v60  ;;  %v1605_v55 = vrot.slane %v4521_v61, 3  ;;  %v1831_v28 = vrot.slane %v4521_v61, 4 }
  0xd7   :  { %v890_v14 = vadd.f32 %v4218_v7, %v889_v40  ;;  %v2562_v30 = vsel %vm2535_vm7, %v2507_v43, %v7221_v58  ;;  %v1121_v60 = vadd.f32 %v4261_v27, %v1086_v25  ;;  %v1431_v25 = vsel %vm1405_vm2, %v1378_v62, %v7222_v37 }
  0xd8   :  { %v2765_v63 = vrot.slane %v2733_v16, 7  ;;  %v2024_v35 = vadd.f32 %v1992_v57, %v1798_v44  ;;  %v1205_v44 = vsel %vm1179_vm1, %v1152_v2, %v1153_v47  ;;  %v2670_v2 = vmul.f32 %v4328_v0, %v2562_v30 }
  0xd9   :  { %v4572_v6 = vadd.f32 %v4373_v50, %v890_v14  ;;  %936 = vmatmul.f32.gmra.mxu0 %v714_v1  ;;  %v2822_v50 = vsel %vm2535_vm7, %v4555_v12, %v2763_v36  ;;  %v2444_v14 = vmul.f32 %v4308_v52, %v2336_v10  ;;  %v1315_v57 = vmul.f32 %v4250_v24, %v1205_v44 }
  0xda   :  { %v2250_v1 = vadd.f32 %v2218_v54, %v2024_v35  ;;  %v2820_v43 = vsel %vm2535_vm7, %v2764_v33, %v2765_v63  ;;  %v2821_v10 = vsel %vm2535_vm7, %v2763_v36, %v2764_v33  ;;  %v1541_v44 = vmul.f32 %v4268_v32, %v1431_v25 }
  0xdb   :  { %7373 = vst [vmem:[#allocation12_spill] sm:$0xff] %v4572_v6  ;;  %v4583_v40 = vpop.f32.mrf.mxu1  ;;  %v1347_v58 = vadd.f32 %v1315_v57, %v1121_v60  ;;  %v1657_v62 = vsel %vm1631_vm3, %v1604_v20, %v1605_v55  ;;  %v2057_v37 = vrot.slane %v4521_v61, 5  ;;  %v2861_v56 = vadd.f32 %v2820_v43, %v2733_v16 }
  0xdc   :  { %v2476_v35 = vadd.f32 %v2444_v14, %v2250_v1  ;;  %v1883_v33 = vsel %vm1857_vm4, %v1830_v59, %v1831_v28  ;;  %v2860_v30 = vadd.f32 %v2821_v10, %v2732_v5  ;;  %v1767_v1 = vmul.f32 %v4288_v41, %v1657_v62 }
  0xdd   :  { %v4601_v54 = vpop.f32.mrf.mxu3  ;;  %v1573_v60 = vadd.f32 %v1541_v44, %v1347_v58  ;;  %v4626_v20 = vadd.f32 %v2822_v50, %v2731_v13  ;;  %v1993_v43 = vmul.f32 %v4294_v45, %v1883_v33  ;;  %v7375_v59 = vrot.slane %v4463_v9, 5 }
  0xde   :  { %v892_v23 = vpop.f32.mrf.mxu0  ;;  %v2702_v36 = vadd.f32 %v2670_v2, %v2476_v35  ;;  %v2283_v5 = vrot.slane %v4521_v61, 6  ;;  %v7226_v49 = vrot.slane %v4572_v6, 1  ;;  %v950_v13 = vadd.f32 %v4218_v7, %v4386_v8 }
  0xdf   :  { %v893_v31 = vadd.f32 %v4218_v7, %v892_v23  ;;  %v1799_v16 = vadd.f32 %v1767_v1, %v1573_v60  ;;  %v2109_v17 = vsel %vm2083_vm5, %v7375_v59, %v2057_v37  ;;  %v2892_v50 = vrot.slane %v2860_v30, 6 }
  0xe0   :  { %v2734_v23 = vmax.f32 %v2702_v36, 0.0  ;;  %v1087_v25 = vmul.f32 %v4246_v22, %v4572_v6  ;;  %v7225_v35 = vrot.slane %v4626_v20, 6  ;;  %v2219_v44 = vmul.f32 %v4302_v48, %v2109_v17 }
  0xe1   :  { %v4622_v14 = vadd.f32 %v4423_v4, %v893_v31  ;;  %v2893_v31 = vrot.slane %v2861_v56, 6  ;;  %v2025_v57 = vadd.f32 %v1993_v43, %v1799_v16  ;;  %v7227_v62 = vrot.slane %v4521_v61, 7 }
  0xe2   :  { %v4638_v4 = vrot.slane %v2734_v23, 7  ;;  %v7377_v60 = vrot.slane %v4463_v9, 6  ;;  %v7228_v16 = vrot.slane %v4572_v6, 2  ;;  %v1080_v17 = vmul.f32 %v4246_v22, %v4225_v11 }
  0xe3   :  { %7374 = vst [vmem:[#allocation13_spill] sm:$0xff] %v4622_v14  ;;  %v4636_v58 = vpop.f32.mrf.mxu1  ;;  %v2948_v43 = vsel %vm2309_vm6, %v2892_v50, %v2893_v31  ;;  %v2251_v59 = vadd.f32 %v2219_v44, %v2025_v57 }
  0xe4   :  { %v2819_v2 = vsel %vm2535_vm7, %v2765_v63, %v4638_v4  ;;  %v2335_v1 = vsel %vm2309_vm6, %v7377_v60, %v2283_v5  ;;  %v7378_v60 = vrot.slane %v4463_v9, 7 }
  0xe5   :  { %v1062_v10 = vpop.f32.mrf.mxu3  ;;  %v4653_v8 = vadd.f32 %v2819_v2, %v2734_v23  ;;  %v1204_v23 = vsel %vm1179_vm1, %v1153_v47, %v7226_v49  ;;  %v2445_v44 = vmul.f32 %v4308_v52, %v2335_v1  ;;  %v4682_v47 = vadd.f32 %v2948_v43, %v2861_v56 }
  0xe6   :  { %v4651_v36 = vadd.f32 %v1062_v10, %v950_v13  ;;  %v895_v33 = vpop.f32.mrf.mxu0  ;;  %v2949_v13 = vsel %vm2309_vm6, %v7225_v35, %v2892_v50  ;;  %v1122_v10 = vadd.f32 %v4261_v27, %v1087_v25  ;;  %v2561_v50 = vsel %vm2535_vm7, %v7378_v60, %v7227_v62 }
  0xe7   :  { %v896_v63 = vadd.f32 %v4218_v7, %v895_v33  ;;  %v7229_v57 = vrot.slane %v4653_v8, 6  ;;  %v1316_v33 = vmul.f32 %v4250_v24, %v1204_v23  ;;  %v7233_v1 = vrot.slane %v4572_v6, 3 }
  0xe8   :  { %7376 = vst [vmem:[#allocation14_spill] sm:$0xff] %v4651_v36  ;;  %v2477_v56 = vadd.f32 %v2445_v44, %v2251_v59  ;;  %v4699_v43 = vadd.f32 %v2949_v13, %v2860_v30  ;;  %v4702_v49 = vadd.f32 %v4261_v27, %v1080_v17  ;;  %v2671_v62 = vmul.f32 %v4328_v0, %v2561_v50 }
  0xe9   :  { %v4677_v2 = vadd.f32 %v4478_v38, %v896_v63  ;;  %v7379_v38 = vrot.slane %v4521_v61, 2  ;;  %v1348_v23 = vadd.f32 %v1316_v33, %v1122_v10  ;;  %v2947_v60 = vsel %vm2309_vm6, %v2893_v31, %v7229_v57 }
  0xea   :  { %7380 = vst [vmem:[#allocation15_spill] sm:$0xff] %v4699_v43  ;;  %v7234_v30 = vrot.slane %v4682_v47, 4  ;;  %v1656_v17 = vsel %vm1631_vm3, %v1605_v55, %v7233_v1  ;;  %v7231_v13 = vrot.slane %v4572_v6, 4  ;;  %v4721_v10 = vadd.f32 %v2671_v62, %v2477_v56  ;;  %v3192_v56 = vld [vmem:[%s7210_s5 + $0x78] sm:$0xff] }
  0xeb   :  { %v1430_v25 = vsel %vm1405_vm2, %v7379_v38, %v7228_v16  ;;  %v4697_v63 = vpop.f32.mrf.mxu1  ;;  %v953_v16 = vadd.f32 %v4218_v7, %v4440_v29  ;;  %v7232_v33 = vrot.slane %v4572_v6, 5  ;;  %v7230_v50 = vrot.slane %v4699_v43, 4  ;;  %3197 = vmatpush.msra.mxu2 %v3192_v56  ;;  %3762 = vmatpush.msra.mxu3 %v3192_v56 }
  0xec   :  { %v1542_v38 = vmul.f32 %v4268_v32, %v1430_v25  ;;  %v4728_v25 = vadd.f32 %v2947_v60, %v4653_v8  ;;  %v7235_v57 = vrot.slane %v4572_v6, 6  ;;  %v956_v55 = vadd.f32 %v4218_v7, %v4489_v46 }
  0xed   :  { %v1065_v35 = vpop.f32.mrf.mxu3  ;;  %v1882_v46 = vsel %vm1857_vm4, %v1831_v28, %v7231_v13  ;;  %v7236_v60 = vmax.f32 %v4721_v10, 0.0  ;;  %v7237_v28 = vrot.slane %v4572_v6, 7 }
  0xee   :  { %v898_v59 = vpop.f32.mrf.mxu0  ;;  %v1574_v44 = vadd.f32 %v1542_v38, %v1348_v23  ;;  %v4724_v29 = vadd.f32 %v1065_v35, %v953_v16  ;;  %v1768_v35 = vmul.f32 %v4288_v41, %v1656_v17  ;;  %v4743_v16 = vadd.f32 %v4218_v7, %v4601_v54  ;;  %v3191_v54 = vld [vmem:[%s7210_s5 + $0x70] sm:$0xff] }
  0xef   :  { %v899_v31 = vadd.f32 %v4218_v7, %v898_v59  ;;  %v4735_v59 = vadd.f32 %v4218_v7, %v4542_v26  ;;  %v4749_v23 = vand.u32 63, %v4241_v19  ;;  %v4757_v26 = vsel %vm1857_vm4, %v7230_v50, %v7234_v30  ;;  %3198 = vmatpush.msra.mxu2 %v3191_v54  ;;  %3763 = vmatpush.msra.mxu3 %v3191_v54  ;;  %v3190_v50 = vld [vmem:[%s7210_s5 + $0x68] sm:$0xff] }
  0xf0   :  { %7381 = vst [vmem:[#allocation16_spill] sm:$0xff] %v4724_v29  ;;  %v1800_v38 = vadd.f32 %v1768_v35, %v1574_v44  ;;  %v2108_v17 = vsel %vm2083_vm5, %v2057_v37, %v7232_v33  ;;  %v2334_v44 = vsel %vm2309_vm6, %v2283_v5, %v7235_v57  ;;  %v1994_v1 = vmul.f32 %v4294_v45, %v1882_v46  ;;  %v3188_v5 = vld [vmem:[%s7210_s5 + $0x58] sm:$0xff] }
  0xf1   :  { %v4738_v62 = vadd.f32 %v4530_v42, %v899_v31  ;;  %v7239_v31 = vrot.slane %v4724_v29, 1  ;;  %v2220_v35 = vmul.f32 %v4302_v48, %v2108_v17  ;;  %3199 = vmatpush.msra.mxu2 %v3190_v50  ;;  %v4802_v54 = vrot.slane %v7236_v60, 7  ;;  %3764 = vmatpush.msra.mxu3 %v3190_v50 }
  0xf2   :  { %v7384_v46 = vrot.slane %v4521_v61, 7  ;;  %v7387_v50 = vrot.slane %v4724_v29, 3  ;;  %v7389_v9 = vrot.slane %v4724_v29, 4  ;;  %v2446_v39 = vmul.f32 %v4308_v52, %v2334_v44 }
  0xf3   :  { %7382 = vst [vmem:[#allocation17_spill] sm:$0xff] %v4738_v62  ;;  %v4765_v42 = vpop.f32.mrf.mxu1  ;;  %v7391_v51 = vrot.slane %v4724_v29, 5  ;;  %vm636_vm8 = vcmp.ge.s32.totalorder %v4749_v23, 7  ;;  %vm604_vm9 = vcmp.ge.s32.totalorder %v4749_v23, 6  ;;  %vm572_vm10 = vcmp.ge.s32.totalorder %v4749_v23, 5 }
  0xf4   :  { %vm540_vm11 = vcmp.ge.s32.totalorder %v4749_v23, 4  ;;  %vm508_vm12 = vcmp.ge.s32.totalorder %v4749_v23, 3  ;;  %vm476_vm13 = vcmp.ge.s32.totalorder %v4749_v23, 2  ;;  %vm444_vm14 = vcmp.ge.s32.totalorder %v4749_v23, 1 }
  0xf5   :  { %v1068_v56 = vpop.f32.mrf.mxu3  ;;  %v1833_v23 = vrot.slane %v4622_v14, 4 }
  0xf6   :  { %v4791_v30 = vadd.f32 %v1068_v56, %v956_v55  ;;  %v901_v13 = vpop.f32.mrf.mxu0  ;;  %v2026_v55 = vadd.f32 %v1994_v1, %v1800_v38  ;;  %v2560_v56 = vsel %vm2535_vm7, %v7384_v46, %v7237_v28 }
  0xf7   :  { %v902_v37 = vadd.f32 %v4218_v7, %v901_v13  ;;  %v3189_v13 = vld [vmem:[%s7210_s5 + $0x60] sm:$0xff] }
  0xf8   :  { %7383 = vst [vmem:[#allocation18_spill] sm:$0xff] %v4791_v30  ;;  %v1109_v57 = vmul.f32 %v4246_v22, %v4791_v30  ;;  %v1176_v17 = vrot.slane %v4791_v30, 1  ;;  %v1402_v60 = vrot.slane %v4791_v30, 2  ;;  %v1628_v1 = vrot.slane %v4791_v30, 3  ;;  %3200 = vmatpush.msra.mxu2 %v3189_v13  ;;  %3765 = vmatpush.msra.mxu3 %v3189_v13 }
  0xf9   :  { %v4819_v38 = vadd.f32 %v4583_v40, %v902_v37  ;;  %v7386_v37 = vrot.slane %v4724_v29, 2  ;;  %v2252_v53 = vadd.f32 %v2220_v35, %v2026_v55  ;;  %v7392_v36 = vrot.slane %v4791_v30, 6 }
  0xfa   :  { %v1144_v33 = vadd.f32 %v4261_v27, %v1109_v57  ;;  %v1182_v40 = vsel %vm1179_vm1, %v7239_v31, %v1176_v17  ;;  %v1634_v13 = vsel %vm1631_vm3, %v7387_v50, %v1628_v1  ;;  %3201 = vmatpush.msra.mxu2 %v3188_v5  ;;  %v3187_v57 = vld [vmem:[%s7210_s5 + $0x50] sm:$0xff]  ;;  %v7388_v31 = vrot.slane %v4791_v30, 4  ;;  %3766 = vmatpush.msra.mxu3 %v3188_v5 }
  0xfb   :  { %7385 = vst [vmem:[#allocation19_spill] sm:$0xff] %v4819_v38  ;;  %v1408_v46 = vsel %vm1405_vm2, %v7386_v37, %v1402_v60  ;;  %v4840_v28 = vpop.f32.mrf.mxu1  ;;  %v1338_v61 = vmul.f32 %v4250_v24, %v1182_v40  ;;  %v7390_v50 = vrot.slane %v4791_v30, 5  ;;  %v7393_v40 = vrot.slane %v4724_v29, 6 }
  0xfc   :  { %v1860_v37 = vsel %vm1857_vm4, %v7389_v9, %v7388_v31  ;;  %v7252_v43 = vrot.slane %v4791_v30, 7  ;;  %v4870_v9 = vsel %vm2535_vm7, %v4638_v4, %v4802_v54  ;;  %3202 = vmatpush.msra.mxu2 %v3187_v57  ;;  %v1790_v35 = vmul.f32 %v4288_v41, %v1634_v13  ;;  %3767 = vmatpush.msra.mxu3 %v3187_v57 }
  0xfd   :  { %v2086_v21 = vsel %vm2083_vm5, %v7391_v51, %v7390_v50  ;;  %v2312_v38 = vsel %vm2309_vm6, %v7393_v40, %v7392_v36  ;;  %v1071_v31 = vpop.f32.mrf.mxu3  ;;  %v1370_v44 = vadd.f32 %v1338_v61, %v1144_v33  ;;  %v1564_v51 = vmul.f32 %v4268_v32, %v1408_v46  ;;  %v3186_v40 = vld [vmem:[%s7210_s5 + $0x48] sm:$0xff] }
  0xfe   :  { %v2672_v55 = vmul.f32 %v4328_v0, %v2560_v56  ;;  %v4876_v36 = vadd.f32 %v1071_v31, %v4735_v59  ;;  %v904_v50 = vpop.f32.mrf.mxu0  ;;  %v2016_v4 = vmul.f32 %v4294_v45, %v1860_v37  ;;  %v2242_v5 = vmul.f32 %v4302_v48, %v2086_v21  ;;  %3203 = vmatpush.msra.mxu2 %v3186_v40  ;;  %v3185_v21 = vld [vmem:[%s7210_s5 + $0x40] sm:$0xff] }
  0xff   :  { %v4884_v61 = vmul.f32 %v4308_v52, %v2312_v38  ;;  %v905_v33 = vadd.f32 %v4218_v7, %v904_v50  ;;  %v1596_v56 = vadd.f32 %v1564_v51, %v1370_v44  ;;  %v7395_v59 = vrot.slane %v4724_v29, 7  ;;  %3768 = vmatpush.msra.mxu3 %v3186_v40  ;;  %v3184_v50 = vld [vmem:[%s7210_s5 + $0x38] sm:$0xff] }
 0x100   :  { %7394 = vst [vmem:[#allocation20_spill] sm:$0xff] %v4876_v36  ;;  %v2478_v13 = vadd.f32 %v2446_v39, %v2252_v53  ;;  %v1110_v38 = vmul.f32 %v4246_v22, %v4876_v36  ;;  %v7251_v57 = vrot.slane %v4876_v36, 1  ;;  %v7249_v37 = vrot.slane %v4876_v36, 2  ;;  %3204 = vmatpush.msra.mxu2 %v3185_v21 }
 0x101   :  { %v2538_v46 = vsel %vm2535_vm7, %v7395_v59, %v7252_v43  ;;  %v7250_v31 = vrot.slane %v4876_v36, 3  ;;  %v4903_v44 = vadd.f32 %v4636_v58, %v905_v33  ;;  %v1822_v39 = vadd.f32 %v1790_v35, %v1596_v56  ;;  %3769 = vmatpush.msra.mxu3 %v3185_v21  ;;  %v3183_v56 = vld [vmem:[%s7210_s5 + $0x30] sm:$0xff] }
 0x102   :  { %v7253_v53 = vrot.slane %v4876_v36, 4  ;;  %v7256_v51 = vrot.slane %v4876_v36, 5  ;;  %v1145_v59 = vadd.f32 %v4261_v27, %v1110_v38  ;;  %v1181_v58 = vsel %vm1179_vm1, %v1176_v17, %v7251_v57  ;;  %3205 = vmatpush.msra.mxu2 %v3184_v50 }
 0x103   :  { %7396 = vst [vmem:[#allocation21_spill] sm:$0xff] %v4903_v44  ;;  %v1407_v35 = vsel %vm1405_vm2, %v1402_v60, %v7249_v37  ;;  %v1633_v40 = vsel %vm1631_vm3, %v1628_v1, %v7250_v31  ;;  %v4925_v33 = vpop.f32.mrf.mxu1  ;;  %v1339_v17 = vmul.f32 %v4250_v24, %v1181_v58  ;;  %v7397_v60 = vrot.slane %v4791_v30, 4  ;;  %3770 = vmatpush.msra.mxu3 %v3184_v50 }
 0x104   :  { %v1565_v38 = vmul.f32 %v4268_v32, %v1407_v35  ;;  %v4939_v1 = vmul.f32 %v4328_v0, %v2538_v46  ;;  %v1791_v21 = vmul.f32 %v4288_v41, %v1633_v40  ;;  %v2048_v31 = vadd.f32 %v2016_v4, %v1822_v39  ;;  %3206 = vmatpush.msra.mxu2 %v3183_v56 }
 0x105   :  { %v1859_v37 = vsel %vm1857_vm4, %v7397_v60, %v7253_v53  ;;  %v7398_v58 = vrot.slane %v4791_v30, 5  ;;  %v7255_v57 = vrot.slane %v4876_v36, 6  ;;  %v1074_v43 = vpop.f32.mrf.mxu3  ;;  %v1371_v60 = vadd.f32 %v1339_v17, %v1145_v59  ;;  %3771 = vmatpush.msra.mxu3 %v3183_v56 }
 0x106   :  { %v4951_v46 = vmul.f32 %v4294_v45, %v1859_v37  ;;  %v7254_v4 = vrot.slane %v4876_v36, 7  ;;  %v4958_v39 = vadd.f32 %v1074_v43, %v4743_v16  ;;  %v907_v40 = vpop.f32.mrf.mxu0  ;;  %v4963_v50 = vadd.f32 %v2242_v5, %v2048_v31 }
 0x107   :  { %v2085_v35 = vsel %vm2083_vm5, %v7398_v58, %v7256_v51  ;;  %v3182_v58 = vld [vmem:[%s7210_s5 + $0x28] sm:$0xff]  ;;  %v7400_v37 = vrot.slane %v4791_v30, 6  ;;  %v4971_v17 = vadd.f32 %v2672_v55, %v2478_v13  ;;  %v908_v43 = vadd.f32 %v4218_v7, %v907_v40  ;;  %v3181_v55 = vld [vmem:[%s7210_s5 + $0x20] sm:$0xff] }
 0x108   :  { %v4954_v53 = vmul.f32 %v4302_v48, %v2085_v35  ;;  %7399 = vst [vmem:[#allocation22_spill] sm:$0xff] %v4958_v39  ;;  %3207 = vmatpush.msra.mxu2 %v3182_v58  ;;  %v1597_v16 = vadd.f32 %v1565_v38, %v1371_v60  ;;  %v7401_v5 = vrot.slane %v4791_v30, 7  ;;  %v1111_v7 = vmul.f32 %v4246_v22, %v4958_v39 }
 0x109   :  { %v2311_v59 = vsel %vm2309_vm6, %v7400_v37, %v7255_v57  ;;  %v1178_v13 = vrot.slane %v4958_v39, 1  ;;  %v1404_v56 = vrot.slane %v4958_v39, 2  ;;  %v1630_v38 = vrot.slane %v4958_v39, 3  ;;  %3772 = vmatpush.msra.mxu3 %v3182_v58 }
 0x10a   :  { %v4976_v35 = vmul.f32 %v4308_v52, %v2311_v59  ;;  %v4984_v31 = vsel %vm2535_vm7, %v7401_v5, %v7254_v4  ;;  %v4995_v60 = vadd.f32 %v4697_v63, %v908_v43  ;;  %3208 = vmatpush.msra.mxu2 %v3181_v55  ;;  %v1823_v40 = vadd.f32 %v1791_v21, %v1597_v16  ;;  %v3180_v5 = vld [vmem:[%s7210_s5 + $0x18] sm:$0xff] }
 0x10b   :  { %v1856_v37 = vrot.slane %v4958_v39, 4  ;;  %v2082_v59 = vrot.slane %v4958_v39, 5  ;;  %v1146_v4 = vadd.f32 %v4261_v27, %v1111_v7  ;;  %v7403_v57 = vrot.slane %v4876_v36, 1  ;;  %3773 = vmatpush.msra.mxu3 %v3181_v55  ;;  %v5016_v51 = vpop.f32.mrf.mxu1  ;;  %v3179_v27 = vld [vmem:[%s7210_s5 + $0x10] sm:$0xff] }
 0x10c   :  { %7402 = vst [vmem:[#allocation23_spill] sm:$0xff] %v4995_v60  ;;  %v7404_v58 = vrot.slane %v4225_v11, 1  ;;  %v7405_v43 = vrot.slane %v4876_v36, 2  ;;  %3209 = vmatpush.msra.mxu2 %v3180_v5  ;;  %v7407_v29 = vrot.slane %v4876_v36, 3 }
 0x10d   :  { %v1180_v63 = vsel %vm1179_vm1, %v7403_v57, %v1178_v13  ;;  %3774 = vmatpush.msra.mxu3 %v3180_v5  ;;  %v5061_v5 = vld [vmem:[%s7207_s2] ss:$0 sm:$0xff] }
 0x10e   :  { %v1211_v21 = vsel %vm1179_vm1, %v1178_v13, %v7404_v58  ;;  %v1406_v16 = vsel %vm1405_vm2, %v7405_v43, %v1404_v56  ;;  %v1340_v7 = vmul.f32 %v4250_v24, %v1180_v63  ;;  %v7406_v13 = vrot.slane %v4225_v11, 2  ;;  %3210 = vmatpush.msra.mxu2 %v3179_v27 }
 0x10f   :  { %v1276_v57 = vsel %vm636_vm8, %v1211_v21, 0.0  ;;  %v1566_v43 = vmul.f32 %v4268_v32, %v1406_v16  ;;  %v1632_v21 = vsel %vm1631_vm3, %v7407_v29, %v1630_v38  ;;  %v7408_v63 = vrot.slane %v4225_v11, 3  ;;  %v3178_v29 = vld [vmem:[%s7210_s5 + $0x8] sm:$0xff]  ;;  %3775 = vmatpush.msra.mxu3 %v3179_v27 }
 0x110   :  { %v1437_v58 = vsel %vm1405_vm2, %v1404_v56, %v7406_v13  ;;  %v1309_v55 = vmul.f32 %v4250_v24, %v1276_v57  ;;  %v1372_v56 = vadd.f32 %v1340_v7, %v1146_v4  ;;  %v1792_v13 = vmul.f32 %v4288_v41, %v1632_v21  ;;  %3211 = vmatpush.msra.mxu2 %v3178_v29 }
 0x111   :  { %v1502_v30 = vsel %vm604_vm9, %v1437_v58, 0.0  ;;  %v1663_v60 = vsel %vm1631_vm3, %v1630_v38, %v7408_v63  ;;  %v910_v58 = vpop.f32.mrf.mxu0  ;;  %v7409_v38 = vrot.slane %v4876_v36, 4  ;;  %v3177_v63 = vld [vmem:[%s7210_s5] sm:$0xff]  ;;  %3776 = vmatpush.msra.mxu3 %v3178_v29  ;;  %v2308_v29 = vrot.slane %v4958_v39, 6 }
 0x112   :  { %v1535_v16 = vmul.f32 %v4268_v32, %v1502_v30  ;;  %v1728_v57 = vsel %vm572_vm10, %v1663_v60, 0.0  ;;  %v1341_v44 = vadd.f32 %v1309_v55, %v4702_v49  ;;  %v7410_v30 = vrot.slane %v4225_v11, 4  ;;  %3212 = vmatpush.msra.mxu2 %v3177_v63 }
 0x113   :  { %v1761_v62 = vmul.f32 %v4288_v41, %v1728_v57  ;;  %v1858_v4 = vsel %vm1857_vm4, %v7409_v38, %v1856_v37  ;;  %v911_v49 = vadd.f32 %v5061_v5, %v910_v58  ;;  %v1598_v7 = vadd.f32 %v1566_v43, %v1372_v56  ;;  %3777 = vmatpush.msra.mxu3 %v3177_v63 }
 0x114   :  { %v1889_v60 = vsel %vm1857_vm4, %v1856_v37, %v7410_v30  ;;  %v2018_v21 = vmul.f32 %v4294_v45, %v1858_v4  ;;  %v1567_v37 = vadd.f32 %v1535_v16, %v1341_v44  ;;  %v2049_v57 = vadd.f32 %v4951_v46, %v1823_v40 }
 0x115   :  { %v1954_v55 = vsel %vm540_vm11, %v1889_v60, 0.0  ;;  %v7411_v38 = vrot.slane %v4876_v36, 5  ;;  %v5077_v43 = vadd.f32 %v4765_v42, %v911_v49  ;;  %v1824_v56 = vadd.f32 %v1792_v13, %v1598_v7  ;;  %v5088_v42 = vpop.f32.mrf.mxu1 }
 0x116   :  { %v1987_v27 = vmul.f32 %v4294_v45, %v1954_v55  ;;  %v7412_v4 = vrot.slane %v4225_v11, 5  ;;  %v1793_v30 = vadd.f32 %v1761_v62, %v1567_v37  ;;  %v2275_v40 = vadd.f32 %v4954_v53, %v2049_v57 }
 0x117   :  { %v2084_v58 = vsel %vm2083_vm5, %v7411_v38, %v2082_v59  ;;  %v2050_v60 = vadd.f32 %v2018_v21, %v1824_v56  ;;  %v2500_v49 = vadd.f32 %v4884_v61, %v4963_v50  ;;  %v7413_v62 = vrot.slane %v4876_v36, 6 }
 0x118   :  { %v2115_v44 = vsel %vm2083_vm5, %v2082_v59, %v7412_v4  ;;  %v2244_v16 = vmul.f32 %v4302_v48, %v2084_v58  ;;  %v2534_v59 = vrot.slane %v4958_v39, 7  ;;  %v2019_v7 = vadd.f32 %v1987_v27, %v1793_v30 }
 0x119   :  { %v2180_v46 = vsel %vm508_vm12, %v2115_v44, 0.0  ;;  %v2310_v55 = vsel %vm2309_vm6, %v7413_v62, %v2308_v29  ;;  %v7414_v53 = vrot.slane %v4225_v11, 6  ;;  %v2501_v21 = vadd.f32 %v4976_v35, %v2275_v40  ;;  %v913_v38 = vpop.f32.mrf.mxu0 }
 0x11a   :  { %v2213_v13 = vmul.f32 %v4302_v48, %v2180_v46  ;;  %v2276_v37 = vadd.f32 %v2244_v16, %v2050_v60  ;;  %v2470_v61 = vmul.f32 %v4308_v52, %v2310_v55  ;;  %v7415_v50 = vrot.slane %v4876_v36, 7 }
 0x11b   :  { %v2341_v63 = vsel %vm2309_vm6, %v2308_v29, %v7414_v53  ;;  %v7416_v4 = vrot.slane %v4225_v11, 7  ;;  %v2695_v44 = vmul.f32 %v4328_v0, %v4984_v31  ;;  %v914_v16 = vadd.f32 %v5061_v5, %v913_v38 }
 0x11c   :  { %v2406_v57 = vsel %vm476_vm13, %v2341_v63, 0.0  ;;  %v2536_v27 = vsel %vm2535_vm7, %v7415_v50, %v2534_v59  ;;  %v2245_v58 = vadd.f32 %v2213_v13, %v2019_v7  ;;  %v2502_v30 = vadd.f32 %v2470_v61, %v2276_v37 }
 0x11d   :  { %v2439_v56 = vmul.f32 %v4308_v52, %v2406_v57  ;;  %v2567_v35 = vsel %vm2535_vm7, %v2534_v59, %v7416_v4  ;;  %v2696_v40 = vmul.f32 %v4328_v0, %v2536_v27  ;;  %v5123_v13 = vadd.f32 %v4939_v1, %v2500_v49 }
 0x11e   :  { %v2632_v46 = vsel %vm444_vm14, %v2567_v35, 0.0  ;;  %v2727_v7 = vadd.f32 %v2695_v44, %v2501_v21  ;;  %v5126_v59 = vadd.f32 %v4840_v28, %v914_v16  ;;  %v2736_v31 = vmax.f32 %v4971_v17, 0.0  ;;  %v5144_v17 = vpop.f32.mrf.mxu1 }
 0x11f   :  { %v2471_v29 = vadd.f32 %v2439_v56, %v2245_v58  ;;  %v2665_v60 = vmul.f32 %v4328_v0, %v2632_v46  ;;  %v2728_v62 = vadd.f32 %v2696_v40, %v2502_v30  ;;  %v36_v55 = vadd.s32 64, %v4241_v19 }
 0x120   :  { %7417 = vst [vmem:[#allocation24_spill] sm:$0xff] %v5126_v59  ;;  %v7264_v63 = vmax.f32 %v5123_v13, 0.0  ;;  %v2759_v37 = vmax.f32 %v2727_v7, 0.0  ;;  %v7418_v57 = vmax.f32 %v4721_v10, 0.0  ;;  %v5138_v1 = vadd.f32 %v5061_v5, %v4232_v15 }
 0x121   :  { %v2697_v53 = vadd.f32 %v2665_v60, %v2471_v29  ;;  %v5142_v28 = vadd.f32 %v5061_v5, %v4272_v34  ;;  %v2760_v49 = vmax.f32 %v2728_v62, 0.0  ;;  %v5146_v21 = vrot.slane %v2736_v31, 7  ;;  %v916_v4 = vpop.f32.mrf.mxu0 }
 0x122   :  { %v5134_v61 = vadd.f32 %v4870_v9, %v7418_v57  ;;  %v5150_v50 = vadd.f32 %v5061_v5, %v4331_v3  ;;  %v5154_v9 = vrot.slane %v7264_v63, 7  ;;  %v2791_v15 = vrot.slane %v2759_v37, 7 }
 0x123   :  { %v2729_v10 = vmax.f32 %v2697_v53, 0.0  ;;  %v2792_v27 = vrot.slane %v2760_v49, 7  ;;  %v5158_v34 = vadd.f32 %v4757_v26, %v4682_v47  ;;  %v7419_v38 = vrot.slane %v4728_v25, 4 }
 0x124   :  { %v7420_v58 = vrot.slane %v4682_v47, 4  ;;  %v5168_v3 = vand.u32 63, %v36_v55  ;;  %v2794_v44 = vsel %vm2535_vm7, %v5154_v9, %v2791_v15  ;;  %v2895_v16 = vrot.slane %v5134_v61, 6 }
 0x125   :  { %v2761_v35 = vrot.slane %v2729_v10, 7  ;;  %v2817_v26 = vsel %vm2535_vm7, %v4802_v54, %v5146_v21  ;;  %v917_v47 = vadd.f32 %v5061_v5, %v916_v4  ;;  %v2793_v30 = vsel %vm2535_vm7, %v2791_v15, %v2792_v27 }
 0x126   :  { %v5166_v56 = vsel %vm1857_vm4, %v7420_v58, %v7419_v38  ;;  %v5181_v46 = vadd.f32 %v2794_v44, %v2759_v37  ;;  %v1155_v40 = vrot.slane %v4622_v14, 1  ;;  %v2888_v60 = vadd.f32 %v2793_v30, %v2760_v49 }
 0x127   :  { %v2824_v29 = vsel %vm2535_vm7, %v2792_v27, %v2761_v35  ;;  %v2823_v7 = vsel %vm2535_vm7, %v2761_v35, %v4555_v12  ;;  %v1088_v54 = vmul.f32 %v4246_v22, %v4622_v14  ;;  %v5192_v62 = vadd.f32 %v4925_v33, %v917_v47  ;;  %v5201_v12 = vpop.f32.mrf.mxu1 }
 0x128   :  { %v2825_v55 = vsel %vm444_vm14, %v2824_v29, 0.0  ;;  %v7422_v53 = vmax.f32 %v4470_v18, 0.0  ;;  %vm644_vm15 = vcmp.ge.s32.totalorder %v5168_v3, 7  ;;  %v7263_v49 = vrot.slane %v5181_v46, 6 }
 0x129   :  { %7421 = vst [vmem:[#allocation25_spill] sm:$0xff] %v5192_v62  ;;  %v2857_v57 = vadd.f32 %v2825_v55, %v2729_v10  ;;  %v2920_v15 = vrot.slane %v2888_v60, 6  ;;  %vm612_vm0 = vcmp.ge.s32.totalorder %v5168_v3, 6  ;;  %v5203_v38 = vadd.f32 %v2817_v26, %v2736_v31  ;;  %v5219_v31 = vld [vmem:[%s7209_s4] ss:$0 sm:$0xff]  ;;  %v919_v55 = vpop.f32.mrf.mxu0 }
 0x12a   :  { %v2858_v37 = vadd.f32 %v2823_v7, %v7422_v53  ;;  %v7423_v33 = vrot.slane %v4572_v6, 1  ;;  %v7270_v58 = vrot.slane %v4622_v14, 2  ;;  %v1123_v35 = vadd.f32 %v5219_v31, %v1088_v54 }
 0x12b   :  { %v2889_v10 = vrot.slane %v2857_v57, 6  ;;  %v2921_v4 = vsel %vm2309_vm6, %v7263_v49, %v2920_v15  ;;  %v7424_v47 = vrot.slane %v4626_v20, 6  ;;  %v7268_v7 = vrot.slane %v4622_v14, 3 }
 0x12c   :  { %v2890_v27 = vrot.slane %v2858_v37, 6  ;;  %v1203_v18 = vsel %vm1179_vm1, %v7423_v33, %v1155_v40  ;;  %v5222_v26 = vadd.f32 %v2921_v4, %v2888_v60  ;;  %v7425_v60 = vrot.slane %v4572_v6, 2 }
 0x12d   :  { %v1284_v44 = vsel %vm644_vm15, %v1203_v18, 0.0  ;;  %v2952_v53 = vsel %vm2309_vm6, %v2920_v15, %v2889_v10  ;;  %v920_v4 = vadd.f32 %v5061_v5, %v919_v55  ;;  %v7426_v15 = vrot.slane %v4653_v8, 6 }
 0x12e   :  { %v2950_v30 = vsel %vm2309_vm6, %v2890_v27, %v7424_v47  ;;  %v1317_v29 = vmul.f32 %v4250_v24, %v1284_v44  ;;  %v2951_v33 = vsel %vm2309_vm6, %v2889_v10, %v2890_v27  ;;  %v1429_v18 = vsel %vm1405_vm2, %v7425_v60, %v7270_v58 }
 0x12f   :  { %v5235_v54 = vadd.f32 %v2950_v30, %v4626_v20  ;;  %v2953_v44 = vsel %vm476_vm13, %v2952_v53, 0.0  ;;  %v2986_v47 = vadd.f32 %v2951_v33, %v2858_v37  ;;  %v2946_v20 = vsel %vm2309_vm6, %v7426_v15, %v2895_v16 }
 0x130   :  { %v2985_v27 = vadd.f32 %v2953_v44, %v2857_v57  ;;  %vm580_vm8 = vcmp.ge.s32.totalorder %v5168_v3, 5  ;;  %v1349_v30 = vadd.f32 %v1317_v29, %v1123_v35  ;;  %v5255_v60 = vadd.f32 %v5016_v51, %v920_v4  ;;  %v5268_v51 = vpop.f32.mrf.mxu1 }
 0x131   :  { %v7267_v10 = vrot.slane %v5235_v54, 4  ;;  %v3018_v55 = vrot.slane %v2986_v47, 4  ;;  %v7266_v53 = vrot.slane %v5203_v38, 6  ;;  %v1510_v37 = vsel %vm612_vm0, %v1429_v18, 0.0 }
 0x132   :  { %7427 = vst [vmem:[#allocation26_spill] sm:$0xff] %v5255_v60  ;;  %v3017_v33 = vrot.slane %v2985_v27, 4  ;;  %v7265_v8 = vrot.slane %v5222_v26, 4  ;;  %v1543_v15 = vmul.f32 %v4268_v32, %v1510_v37  ;;  %v7428_v57 = vrot.slane %v4572_v6, 3 }
 0x133   :  { %v5271_v29 = vadd.f32 %v2946_v20, %v5134_v61  ;;  %vm452_vm9 = vcmp.ge.s32.totalorder %v5168_v3, 1  ;;  %vm484_vm10 = vcmp.ge.s32.totalorder %v5168_v3, 2  ;;  %v3078_v37 = vsel %vm1857_vm4, %v3018_v55, %v7267_v10 }
 0x134   :  { %v1655_v35 = vsel %vm1631_vm3, %v7428_v57, %v7268_v7  ;;  %v3080_v4 = vsel %vm1857_vm4, %v7265_v8, %v3017_v33  ;;  %v3079_v44 = vsel %vm1857_vm4, %v3017_v33, %v3018_v55  ;;  %v1575_v20 = vadd.f32 %v1543_v15, %v1349_v30 }
 0x135   :  { %v1736_v18 = vsel %vm580_vm8, %v1655_v35, 0.0  ;;  %v3081_v57 = vsel %vm540_vm11, %v3080_v4, 0.0  ;;  %v3114_v49 = vadd.f32 %v3079_v44, %v2986_v47  ;;  %vm516_vm12 = vcmp.ge.s32.totalorder %v5168_v3, 3  ;;  %v922_v35 = vpop.f32.mrf.mxu0 }
 0x136   :  { %vm548_vm13 = vcmp.ge.s32.totalorder %v5168_v3, 4  ;;  %v3113_v63 = vadd.f32 %v3081_v57, %v2985_v27  ;;  %v5295_v33 = vsel %vm2309_vm6, %v2895_v16, %v7266_v53  ;;  %v1769_v30 = vmul.f32 %v4288_v41, %v1736_v18 }
 0x137   :  { %v923_v47 = vadd.f32 %v5061_v5, %v922_v35  ;;  %v5301_v55 = vadd.f32 %v3078_v37, %v5235_v54  ;;  %v7269_v15 = vrot.slane %v4677_v2, 4  ;;  %v2059_v27 = vrot.slane %v4622_v14, 5 }
 0x138   :  { %v3145_v4 = vmul.f32 0.125, %v3113_v63  ;;  %v1801_v44 = vadd.f32 %v1769_v30, %v1575_v20  ;;  %v7429_v61 = vrot.slane %v4572_v6, 4  ;;  %v2285_v18 = vrot.slane %v4622_v14, 6  ;;  %v5342_v7 = vpop.f32.mrf.mxu1 }
 0x139   :  { %v5311_v57 = vadd.f32 %v5088_v42, %v923_v47  ;;  %v3146_v35 = vmul.f32 0.125, %v3114_v49  ;;  %v7431_v8 = vrot.slane %v4572_v6, 5  ;;  %v2511_v49 = vrot.slane %v4622_v14, 7 }
 0x13a   :  { %v1881_v16 = vsel %vm1857_vm4, %v7429_v61, %v1833_v23  ;;  %3213 = vmatmul.f32.vlgmr.msra.gmra.mxu2 %v3145_v4  ;;  %v7432_v61 = vrot.slane %v4572_v6, 6  ;;  %v1880_v47 = vsel %vm1857_vm4, %v1833_v23, %v7269_v15  ;;  %v1089_v4 = vmul.f32 %v4246_v22, %v4677_v2 }
 0x13b   :  { %7430 = vst [vmem:[#allocation27_spill] sm:$0xff] %v5311_v57  ;;  %v1962_v37 = vsel %vm548_vm13, %v1881_v16, 0.0  ;;  %v2107_v63 = vsel %vm2083_vm5, %v7431_v8, %v2059_v27  ;;  %v1156_v16 = vrot.slane %v4677_v2, 1  ;;  %v1382_v10 = vrot.slane %v4677_v2, 2 }
 0x13c   :  { %v1995_v20 = vmul.f32 %v4294_v45, %v1962_v37  ;;  %v2188_v30 = vsel %vm516_vm12, %v2107_v63, 0.0  ;;  %v2333_v42 = vsel %vm2309_vm6, %v7432_v61, %v2285_v18  ;;  %v7433_v61 = vrot.slane %v4572_v6, 7 }
 0x13d   :  { %v2414_v8 = vsel %vm484_vm10, %v2333_v42, 0.0  ;;  %v2221_v63 = vmul.f32 %v4302_v48, %v2188_v30  ;;  %v1124_v42 = vadd.f32 %v5219_v31, %v1089_v4  ;;  %v925_v30 = vpop.f32.mrf.mxu0  ;;  %v7434_v39 = vrot.slane %v4622_v14, 2 }
 0x13e   :  { %v2027_v37 = vadd.f32 %v1995_v20, %v1801_v44  ;;  %v2559_v53 = vsel %vm2535_vm7, %v7433_v61, %v2511_v49  ;;  %v1202_v44 = vsel %vm1179_vm1, %v1155_v40, %v1156_v16  ;;  %v1608_v20 = vrot.slane %v4677_v2, 3 }
 0x13f   :  { %v2640_v23 = vsel %vm452_vm9, %v2559_v53, 0.0  ;;  %v2447_v61 = vmul.f32 %v4308_v52, %v2414_v8  ;;  %v1318_v58 = vmul.f32 %v4250_v24, %v1202_v44  ;;  %v1428_v53 = vsel %vm1405_vm2, %v7434_v39, %v1382_v10 }
 0x140   :  { %v2253_v15 = vadd.f32 %v2221_v63, %v2027_v37  ;;  %v926_v4 = vadd.f32 %v5061_v5, %v925_v30  ;;  %v2673_v36 = vmul.f32 %v4328_v0, %v2640_v23  ;;  %v7435_v6 = vrot.slane %v4622_v14, 3  ;;  %v7436_v30 = vld [vmem:[#allocation17_spill] sm:$0xff] }
 0x141   :  { %v2060_v37 = vrot.slane %v4677_v2, 5  ;;  %v1350_v8 = vadd.f32 %v1318_v58, %v1124_v42  ;;  %v1544_v44 = vmul.f32 %v4268_v32, %v1428_v53  ;;  %v7280_v11 = vrot.slane %v4677_v2, 6 }
 0x142   :  { %v1654_v40 = vsel %vm1631_vm3, %v7435_v6, %v1608_v20  ;;  %v2479_v63 = vadd.f32 %v2447_v61, %v2253_v15  ;;  %v5368_v57 = vadd.f32 %v5144_v17, %v926_v4  ;;  %v7278_v23 = vrot.slane %v4677_v2, 7  ;;  %3216 = vmatmul.f32.gmra.mxu2 %v3146_v35 }
 0x143   :  { %v2106_v39 = vsel %vm2083_vm5, %v2059_v27, %v2060_v37  ;;  %v1090_v14 = vmul.f32 %v4246_v22, %v7436_v30  ;;  %v1996_v6 = vmul.f32 %v4294_v45, %v1880_v47  ;;  %v1576_v58 = vadd.f32 %v1544_v44, %v1350_v8 }
 0x144   :  { %v2705_v15 = vadd.f32 %v2673_v36, %v2479_v63  ;;  %v1770_v42 = vmul.f32 %v4288_v41, %v1654_v40  ;;  %v2222_v61 = vmul.f32 %v4302_v48, %v2106_v39  ;;  %v2332_v17 = vsel %vm2309_vm6, %v2285_v18, %v7280_v11 }
 0x145   :  { %v2558_v27 = vsel %vm2535_vm7, %v2511_v49, %v7278_v23  ;;  %v7277_v35 = vrot.slane %v7436_v30, 1  ;;  %v1125_v36 = vadd.f32 %v5219_v31, %v1090_v14  ;;  %v7279_v4 = vrot.slane %v7436_v30, 2  ;;  %v928_v49 = vpop.f32.mrf.mxu0 }
 0x146   :  { %v2737_v53 = vmax.f32 %v2705_v15, 0.0  ;;  %v1802_v47 = vadd.f32 %v1770_v42, %v1576_v58  ;;  %v1609_v18 = vrot.slane %v7436_v30, 3  ;;  %v7282_v63 = vrot.slane %v7436_v30, 4  ;;  %v5401_v58 = vpop.f32.mrf.mxu1 }
 0x147   :  { %v1201_v40 = vsel %vm1179_vm1, %v1156_v16, %v7277_v35  ;;  %v7281_v8 = vrot.slane %v7436_v30, 5  ;;  %v1427_v14 = vsel %vm1405_vm2, %v1382_v10, %v7279_v4  ;;  %v3147_v16 = vmul.f32 0.125, %v5301_v55  ;;  %v7437_v55 = vld [vmem:[#allocation15_spill] sm:$0xff] }
 0x148   :  { %v2769_v44 = vrot.slane %v2737_v53, 7  ;;  %v2028_v39 = vadd.f32 %v1996_v6, %v1802_v47  ;;  %v1319_v15 = vmul.f32 %v4250_v24, %v1201_v40  ;;  %v5406_v42 = vadd.f32 %v5295_v33, %v5203_v38 }
 0x149   :  { %v2448_v35 = vmul.f32 %v4308_v52, %v2332_v17  ;;  %v1545_v23 = vmul.f32 %v4268_v32, %v1427_v14  ;;  %v1653_v10 = vsel %vm1631_vm3, %v1608_v20, %v1609_v18  ;;  %v7438_v4 = vrot.slane %v7437_v55, 4 }
 0x14a   :  { %v2816_v6 = vsel %vm2535_vm7, %v5146_v21, %v2769_v44  ;;  %v2254_v47 = vadd.f32 %v2222_v61, %v2028_v39  ;;  %v1351_v40 = vadd.f32 %v1319_v15, %v1125_v36  ;;  %v7439_v33 = vrot.slane %v5235_v54, 4  ;;  %3219 = vmatmul.f32.gmra.mxu2 %v3147_v16 }
 0x14b   :  { %v2833_v14 = vsel %vm452_vm9, %v2816_v6, 0.0  ;;  %v2674_v11 = vmul.f32 %v4328_v0, %v2558_v27  ;;  %v7440_v21 = vrot.slane %v4677_v2, 4  ;;  %v2105_v54 = vsel %vm2083_vm5, %v2060_v37, %v7281_v8  ;;  %v7442_v8 = vld [vmem:[#allocation19_spill] sm:$0xff] }
 0x14c   :  { %v3077_v17 = vsel %vm1857_vm4, %v7439_v33, %v7438_v4  ;;  %v2865_v20 = vadd.f32 %v2833_v14, %v2737_v53  ;;  %v2480_v36 = vadd.f32 %v2448_v35, %v2254_v47  ;;  %v1577_v39 = vadd.f32 %v1545_v23, %v1351_v40 }
 0x14d   :  { %v1879_v61 = vsel %vm1857_vm4, %v7440_v21, %v7282_v63  ;;  %v3118_v4 = vadd.f32 %v5166_v56, %v4728_v25  ;;  %v3023_v27 = vrot.slane %v5271_v29, 4  ;;  %v7286_v15 = vrot.slane %v5406_v42, 4  ;;  %v931_v56 = vpop.f32.mrf.mxu0 }
 0x14e   :  { %v1771_v6 = vmul.f32 %v4288_v41, %v1653_v10  ;;  %v3116_v33 = vadd.f32 %v3077_v17, %v7437_v55  ;;  %v2897_v16 = vrot.slane %v2865_v20, 6  ;;  %v2706_v53 = vadd.f32 %v2674_v11, %v2480_v36 }
 0x14f   :  { %v1997_v23 = vmul.f32 %v4294_v45, %v1879_v61  ;;  %v2223_v47 = vmul.f32 %v4302_v48, %v2105_v54  ;;  %v7284_v37 = vrot.slane %v7436_v30, 6  ;;  %v7283_v40 = vrot.slane %v7436_v30, 7 }
 0x150   :  { %v1803_v35 = vadd.f32 %v1771_v6, %v1577_v39  ;;  %v7441_v14 = vrot.slane %v5203_v38, 6  ;;  %v2738_v10 = vmax.f32 %v2706_v53, 0.0  ;;  %v1091_v55 = vmul.f32 %v4246_v22, %v7442_v8 }
 0x151   :  { %v7285_v11 = vrot.slane %v7442_v8, 1  ;;  %v7443_v36 = vrot.slane %v4677_v2, 6  ;;  %v1384_v39 = vrot.slane %v7442_v8, 2  ;;  %v3148_v54 = vmul.f32 0.125, %v3116_v33 }
 0x152   :  { %v2944_v21 = vsel %vm2309_vm6, %v7441_v14, %v2897_v16  ;;  %v2029_v61 = vadd.f32 %v1997_v23, %v1803_v35  ;;  %v7444_v6 = vrot.slane %v4728_v25, 4  ;;  %v3073_v23 = vsel %vm1857_vm4, %v3023_v27, %v7286_v15 }
 0x153   :  { %v2961_v17 = vsel %vm484_vm10, %v2944_v21, 0.0  ;;  %v2331_v38 = vsel %vm2309_vm6, %v7443_v36, %v7284_v37  ;;  %v2770_v35 = vrot.slane %v2738_v10, 7  ;;  %v929_v14 = vadd.f32 %v5061_v5, %v928_v49  ;;  %v5471_v21 = vpop.f32.mrf.mxu1  ;;  %3222 = vmatmul.f32.gmra.mxu2 %v3148_v54 }
 0x154   :  { %v3074_v53 = vsel %vm1857_vm4, %v7444_v6, %v3023_v27  ;;  %v5473_v63 = vadd.f32 %v2961_v17, %v2865_v20  ;;  %v2255_v36 = vadd.f32 %v2223_v47, %v2029_v61  ;;  %v7445_v25 = vrot.slane %v4677_v2, 7 }
 0x155   :  { %v2815_v6 = vsel %vm2535_vm7, %v2769_v44, %v2770_v35  ;;  %v2449_v27 = vmul.f32 %v4308_v52, %v2331_v38  ;;  %v1126_v49 = vadd.f32 %v5219_v31, %v1091_v55  ;;  %v7446_v20 = vrot.slane %v7436_v30, 1 }
 0x156   :  { %v2557_v33 = vsel %vm2535_vm7, %v7445_v25, %v7283_v40  ;;  %v3149_v17 = vmul.f32 0.125, %v5158_v34  ;;  %v3119_v61 = vadd.f32 %v3074_v53, %v5271_v29  ;;  %v2866_v25 = vadd.f32 %v2815_v6, %v2738_v10  ;;  %v934_v53 = vpop.f32.mrf.mxu0 }
 0x157   :  { %v1200_v47 = vsel %vm1179_vm1, %v7446_v20, %v7285_v11  ;;  %v7447_v44 = vrot.slane %v7436_v30, 2  ;;  %v3120_v55 = vadd.f32 %v3073_v23, %v5406_v42  ;;  %v2481_v54 = vadd.f32 %v2449_v27, %v2255_v36 }
 0x158   :  { %v2675_v40 = vmul.f32 %v4328_v0, %v2557_v33  ;;  %v1320_v37 = vmul.f32 %v4250_v24, %v1200_v47  ;;  %v5503_v20 = vadd.f32 %v5201_v12, %v929_v14  ;;  %v3150_v34 = vmul.f32 0.125, %v3118_v4 }
 0x159   :  { %v1426_v38 = vsel %vm1405_vm2, %v7447_v44, %v1384_v39  ;;  %v3025_v29 = vrot.slane %v5473_v63, 4  ;;  %v2898_v10 = vrot.slane %v2866_v25, 6  ;;  %v7291_v44 = vrot.slane %v7442_v8, 3 }
 0x15a   :  { %v2707_v6 = vadd.f32 %v2675_v40, %v2481_v54  ;;  %v1352_v11 = vadd.f32 %v1320_v37, %v1126_v49  ;;  %v1546_v15 = vmul.f32 %v4268_v32, %v1426_v38  ;;  %v5508_v23 = vmul.f32 0.125, %v3119_v61 }
 0x15b   :  { %v2943_v36 = vsel %vm2309_vm6, %v2897_v16, %v2898_v10  ;;  %v7289_v33 = vrot.slane %v7442_v8, 4  ;;  %v7287_v12 = vrot.slane %v7442_v8, 5  ;;  %v5514_v4 = vmul.f32 0.125, %v3120_v55  ;;  %3225 = vmatmul.f32.gmra.mxu2 %v3149_v17 }
 0x15c   :  { %v5516_v14 = vadd.f32 %v2943_v36, %v2866_v25  ;;  %v2739_v27 = vmax.f32 %v2707_v6, 0.0  ;;  %v1578_v40 = vadd.f32 %v1546_v15, %v1352_v11  ;;  %v1652_v16 = vsel %vm1631_vm3, %v1609_v18, %v7291_v44  ;;  %v1056_v18 = vpop.f32.mrf.mxu1 }
 0x15d   :  { %v7448_v47 = vrot.slane %v7436_v30, 4  ;;  %v932_v15 = vadd.f32 %v5061_v5, %v931_v56  ;;  %v7449_v11 = vrot.slane %v5406_v42, 4  ;;  %v1772_v55 = vmul.f32 %v4288_v41, %v1652_v16 }
 0x15e   :  { %v5537_v38 = vrot.slane %v2739_v27, 7  ;;  %v3026_v54 = vrot.slane %v5516_v14, 4  ;;  %v7450_v6 = vrot.slane %v7436_v30, 5  ;;  %v7288_v17 = vrot.slane %v7442_v8, 6 }
 0x15f   :  { %v1878_v61 = vsel %vm1857_vm4, %v7448_v47, %v7289_v33  ;;  %v3072_v25 = vsel %vm1857_vm4, %v7449_v11, %v3025_v29  ;;  %v7290_v42 = vrot.slane %v7442_v8, 7  ;;  %v1804_v47 = vadd.f32 %v1772_v55, %v1578_v40 }
 0x160   :  { %v2104_v56 = vsel %vm2083_vm5, %v7450_v6, %v7287_v12  ;;  %v2814_v16 = vsel %vm2535_vm7, %v2770_v35, %v5537_v38  ;;  %v1998_v11 = vmul.f32 %v4294_v45, %v1878_v61  ;;  %v7451_v37 = vrot.slane %v7436_v30, 6  ;;  %v7453_v35 = vld [vmem:[#allocation21_spill] sm:$0xff]  ;;  %v937_v61 = vpop.f32.mrf.mxu0 }
 0x161   :  { %v5554_v49 = vadd.f32 %v2814_v16, %v2739_v27  ;;  %v7452_v12 = vrot.slane %v7436_v30, 7  ;;  %v1092_v40 = vmul.f32 %v4246_v22, %v7453_v35  ;;  %v5571_v27 = vadd.f32 %v5268_v51, %v932_v15 }
 0x162   :  { %v2330_v6 = vsel %vm2309_vm6, %v7451_v37, %v7288_v17  ;;  %v3089_v55 = vsel %vm548_vm13, %v3072_v25, 0.0  ;;  %v2030_v16 = vadd.f32 %v1998_v11, %v1804_v47  ;;  %v2224_v37 = vmul.f32 %v4302_v48, %v2104_v56 }
 0x163   :  { %v2556_v36 = vsel %vm2535_vm7, %v7452_v12, %v7290_v42  ;;  %7454 = vst [vmem:[#allocation17_spill] sm:$0xff] %v5571_v27  ;;  %v935_v17 = vadd.f32 %v5061_v5, %v934_v53  ;;  %v3071_v33 = vsel %vm1857_vm4, %v3025_v29, %v3026_v54  ;;  %v7297_v12 = vrot.slane %v5554_v49, 6  ;;  %3228 = vmatmul.f32.gmra.mxu2 %v3150_v34 }
 0x164   :  { %v7295_v42 = vrot.slane %v7453_v35, 1  ;;  %v2256_v44 = vadd.f32 %v2224_v37, %v2030_v16  ;;  %v2450_v51 = vmul.f32 %v4308_v52, %v2330_v6  ;;  %v2676_v15 = vmul.f32 %v4328_v0, %v2556_v36 }
 0x165   :  { %v7294_v3 = vrot.slane %v7453_v35, 2  ;;  %v938_v25 = vadd.f32 %v5061_v5, %v937_v61  ;;  %v2942_v53 = vsel %vm2309_vm6, %v2898_v10, %v7297_v12  ;;  %v1127_v29 = vadd.f32 %v5219_v31, %v1092_v40 }
 0x166   :  { %v7455_v56 = vrot.slane %v7442_v8, 1  ;;  %v5597_v36 = vadd.f32 %v2942_v53, %v5554_v49  ;;  %v2482_v11 = vadd.f32 %v2450_v51, %v2256_v44  ;;  %v7293_v6 = vrot.slane %v7453_v35, 3 }
 0x167   :  { %v7301_v10 = vrot.slane %v5503_v20, 4  ;;  %v7300_v40 = vrot.slane %v5503_v20, 5  ;;  %v1101_v61 = vmul.f32 %v4246_v22, %v5571_v27  ;;  %v3121_v16 = vadd.f32 %v3089_v55, %v5473_v63  ;;  %v1059_v63 = vpop.f32.mrf.mxu1 }
 0x168   :  { %v1199_v47 = vsel %vm1179_vm1, %v7455_v56, %v7295_v42  ;;  %v3122_v37 = vadd.f32 %v3071_v33, %v5516_v14  ;;  %v7296_v34 = vrot.slane %v5597_v36, 4  ;;  %v5608_v53 = vadd.f32 %v2676_v15, %v2482_v11 }
 0x169   :  { %v1321_v5 = vmul.f32 %v4250_v24, %v1199_v47  ;;  %v1425_v44 = vsel %vm1405_vm2, %v1384_v39, %v7294_v3  ;;  %v5618_v51 = vadd.f32 %v5471_v21, %v5138_v1  ;;  %v1168_v56 = vrot.slane %v5571_v27, 1 }
 0x16a   :  { %v7292_v33 = vrot.slane %v7453_v35, 4  ;;  %v5623_v14 = vadd.f32 %v5342_v7, %v935_v17  ;;  %v5626_v15 = vadd.f32 %v5401_v58, %v938_v25  ;;  %v3070_v39 = vsel %vm1857_vm4, %v3026_v54, %v7296_v34 }
 0x16b   :  { %v1353_v55 = vadd.f32 %v1321_v5, %v1127_v29  ;;  %v7458_v1 = vrot.slane %v7442_v8, 3  ;;  %v1136_v29 = vadd.f32 %v5219_v31, %v1101_v61  ;;  %v1394_v7 = vrot.slane %v5571_v27, 2  ;;  %3231 = vmatmul.f32.gmra.mxu2 %v5508_v23 }
 0x16c   :  { %7456 = vst [vmem:[#allocation15_spill] sm:$0xff] %v5623_v14  ;;  %v5641_v17 = vadd.f32 %v1056_v18, %v5142_v28  ;;  %v1547_v58 = vmul.f32 %v4268_v32, %v1425_v44  ;;  %v5645_v25 = vadd.f32 %v1059_v63, %v5150_v50  ;;  %v5647_v54 = vmul.f32 0.125, %v3121_v16 }
 0x16d   :  { %7457 = vst [vmem:[#allocation19_spill] sm:$0xff] %v5626_v15  ;;  %v1651_v21 = vsel %vm1631_vm3, %v7458_v1, %v7293_v6  ;;  %v5649_v47 = vmul.f32 0.125, %v3122_v37  ;;  %v2740_v11 = vmax.f32 %v5608_v53, 0.0  ;;  %v3123_v5 = vadd.f32 %v3070_v39, %v5597_v36 }
 0x16e   :  { %v1579_v1 = vadd.f32 %v1547_v58, %v1353_v55  ;;  %v1773_v61 = vmul.f32 %v4288_v41, %v1651_v21  ;;  %v7459_v28 = vrot.slane %v7442_v8, 4  ;;  %v52_v50 = vadd.s32 192, %v4241_v19 }
 0x16f   :  { %v1102_v16 = vmul.f32 %v4246_v22, %v5623_v14  ;;  %v1103_v37 = vmul.f32 %v4246_v22, %v5626_v15  ;;  %v1104_v44 = vmul.f32 %v4246_v22, %v5618_v51  ;;  %v1169_v63 = vrot.slane %v5623_v14, 1 }
 0x170   :  { %v1877_v18 = vsel %vm1857_vm4, %v7459_v28, %v7292_v33  ;;  %v1170_v55 = vrot.slane %v5626_v15, 1  ;;  %v7298_v39 = vrot.slane %v5618_v51, 1  ;;  %v7460_v21 = vrot.slane %v5503_v20, 1 }
 0x171   :  { %v5675_v58 = vand.u32 63, %v52_v50  ;;  %v1137_v28 = vadd.f32 %v5219_v31, %v1102_v16  ;;  %v5680_v33 = vrot.slane %v2740_v11, 7  ;;  %v5683_v6 = vmul.f32 %v4294_v45, %v1877_v18 }
 0x172   :  { %v1190_v23 = vsel %vm1179_vm1, %v7460_v21, %v1168_v56  ;;  %v1187_v3 = vsel %vm1179_vm1, %v1170_v55, %v7298_v39  ;;  %v1188_v42 = vsel %vm1179_vm1, %v1169_v63, %v1170_v55  ;;  %v1189_v50 = vsel %vm1179_vm1, %v1168_v56, %v1169_v63 }
 0x173   :  { %v1330_v16 = vmul.f32 %v4250_v24, %v1190_v23  ;;  %v5694_v21 = vmul.f32 0.125, %v3123_v5  ;;  %v1138_v34 = vadd.f32 %v5219_v31, %v1103_v37  ;;  %v1139_v18 = vadd.f32 %v5219_v31, %v1104_v44  ;;  %3234 = vmatmul.f32.gmra.mxu2 %v5514_v4 }
 0x174   :  { %v5698_v12 = vadd.f32 %v1773_v61, %v1579_v1  ;;  %vm596_vm11 = vcmp.ge.s32.totalorder %v5675_v58, 5  ;;  %vm628_vm14 = vcmp.ge.s32.totalorder %v5675_v58, 6  ;;  %vm660_vm15 = vcmp.ge.s32.totalorder %v5675_v58, 7 }
 0x175   :  { %v1331_v55 = vmul.f32 %v4250_v24, %v1189_v50  ;;  %v1300_v39 = vsel %vm660_vm15, %v1187_v3, 0.0  ;;  %v1332_v56 = vmul.f32 %v4250_v24, %v1188_v42  ;;  %v1362_v63 = vadd.f32 %v1330_v16, %v1136_v29 }
 0x176   :  { %v1395_v5 = vrot.slane %v5623_v14, 2  ;;  %v1333_v37 = vmul.f32 %v4250_v24, %v1300_v39  ;;  %v1396_v1 = vrot.slane %v5626_v15, 2  ;;  %v7299_v61 = vrot.slane %v5618_v51, 2 }
 0x177   :  { %v1363_v23 = vadd.f32 %v1331_v55, %v1137_v28  ;;  %vm564_vm0 = vcmp.ge.s32.totalorder %v5675_v58, 4  ;;  %v1364_v44 = vadd.f32 %v1332_v56, %v1138_v34  ;;  %v7461_v42 = vrot.slane %v5503_v20, 2 }
 0x178   :  { %v1415_v3 = vsel %vm1405_vm2, %v1394_v7, %v1395_v5  ;;  %v1620_v39 = vrot.slane %v5571_v27, 3  ;;  %v1365_v28 = vadd.f32 %v1333_v37, %v1139_v18  ;;  %v1413_v50 = vsel %vm1405_vm2, %v1396_v1, %v7299_v61 }
 0x179   :  { %v1416_v29 = vsel %vm1405_vm2, %v7461_v42, %v1394_v7  ;;  %v1414_v4 = vsel %vm1405_vm2, %v1395_v5, %v1396_v1  ;;  %v1526_v16 = vsel %vm628_vm14, %v1413_v50, 0.0  ;;  %v1557_v55 = vmul.f32 %v4268_v32, %v1415_v3 }
 0x17a   :  { %v1556_v34 = vmul.f32 %v4268_v32, %v1416_v29  ;;  %v1558_v7 = vmul.f32 %v4268_v32, %v1414_v4  ;;  %v1621_v56 = vrot.slane %v5623_v14, 3  ;;  %v1559_v18 = vmul.f32 %v4268_v32, %v1526_v16 }
 0x17b   :  { %v1622_v42 = vrot.slane %v5626_v15, 3  ;;  %v1623_v61 = vrot.slane %v5618_v51, 3  ;;  %vm532_vm8 = vcmp.ge.s32.totalorder %v5675_v58, 3  ;;  %v1589_v5 = vadd.f32 %v1557_v55, %v1363_v23  ;;  %3237 = vmatmul.f32.gmra.mxu2 %v5647_v54 }
 0x17c   :  { %v1588_v37 = vadd.f32 %v1556_v34, %v1362_v63  ;;  %v1590_v1 = vadd.f32 %v1558_v7, %v1364_v44  ;;  %v1641_v29 = vsel %vm1631_vm3, %v1620_v39, %v1621_v56  ;;  %v7462_v3 = vrot.slane %v5503_v20, 3 }
 0x17d   :  { %v1591_v4 = vadd.f32 %v1559_v18, %v1365_v28  ;;  %v1639_v63 = vsel %vm1631_vm3, %v1622_v42, %v1623_v61  ;;  %v1640_v34 = vsel %vm1631_vm3, %v1621_v56, %v1622_v42  ;;  %v1783_v16 = vmul.f32 %v4288_v41, %v1641_v29 }
 0x17e   :  { %v1642_v50 = vsel %vm1631_vm3, %v7462_v3, %v1620_v39  ;;  %v1752_v44 = vsel %vm596_vm11, %v1639_v63, 0.0  ;;  %v1784_v55 = vmul.f32 %v4288_v41, %v1640_v34  ;;  %v1846_v39 = vrot.slane %v5571_v27, 4 }
 0x17f   :  { %v1782_v23 = vmul.f32 %v4288_v41, %v1642_v50  ;;  %v1785_v28 = vmul.f32 %v4288_v41, %v1752_v44  ;;  %v1847_v18 = vrot.slane %v5623_v14, 4  ;;  %v1848_v3 = vrot.slane %v5626_v15, 4 }
 0x180   :  { %v1815_v56 = vadd.f32 %v1783_v16, %v1589_v5  ;;  %v1816_v42 = vadd.f32 %v1784_v55, %v1590_v1  ;;  %v1849_v50 = vrot.slane %v5618_v51, 4  ;;  %v1868_v29 = vsel %vm1857_vm4, %v7301_v10, %v1846_v39 }
 0x181   :  { %v1814_v7 = vadd.f32 %v1782_v23, %v1588_v37  ;;  %vm500_vm9 = vcmp.ge.s32.totalorder %v5675_v58, 2  ;;  %v1817_v63 = vadd.f32 %v1785_v28, %v1591_v4  ;;  %v1866_v37 = vsel %vm1857_vm4, %v1847_v18, %v1848_v3 }
 0x182   :  { %v1867_v34 = vsel %vm1857_vm4, %v1846_v39, %v1847_v18  ;;  %v2008_v54 = vmul.f32 %v4294_v45, %v1868_v29  ;;  %v1865_v5 = vsel %vm1857_vm4, %v1848_v3, %v1849_v50  ;;  %v2010_v23 = vmul.f32 %v4294_v45, %v1866_v37 }
 0x183   :  { %v2009_v1 = vmul.f32 %v4294_v45, %v1867_v34  ;;  %v2072_v44 = vrot.slane %v5571_v27, 5  ;;  %v1978_v4 = vsel %vm564_vm0, %v1865_v5, 0.0  ;;  %v2073_v55 = vrot.slane %v5623_v14, 5  ;;  %3240 = vmatmul.f32.gmra.mxu2 %v5649_v47 }
 0x184   :  { %v2040_v16 = vadd.f32 %v2008_v54, %v1814_v7  ;;  %v2074_v39 = vrot.slane %v5626_v15, 5  ;;  %v2011_v28 = vmul.f32 %v4294_v45, %v1978_v4  ;;  %v2042_v29 = vadd.f32 %v2010_v23, %v1816_v42 }
 0x185   :  { %v2041_v18 = vadd.f32 %v2009_v1, %v1815_v56  ;;  %v2075_v3 = vrot.slane %v5618_v51, 5  ;;  %vm468_vm10 = vcmp.ge.s32.totalorder %v5675_v58, 1  ;;  %v2093_v34 = vsel %vm2083_vm5, %v2072_v44, %v2073_v55 }
 0x186   :  { %v2092_v37 = vsel %vm2083_vm5, %v2073_v55, %v2074_v39  ;;  %v2094_v7 = vsel %vm2083_vm5, %v7300_v40, %v2072_v44  ;;  %v7302_v54 = vrot.slane %v5503_v20, 6  ;;  %v2043_v5 = vadd.f32 %v2011_v28, %v1817_v63 }
 0x187   :  { %v2091_v56 = vsel %vm2083_vm5, %v2074_v39, %v2075_v3  ;;  %v2234_v42 = vmul.f32 %v4302_v48, %v2094_v7  ;;  %v2235_v1 = vmul.f32 %v4302_v48, %v2093_v34  ;;  %v2236_v4 = vmul.f32 %v4302_v48, %v2092_v37 }
 0x188   :  { %v2204_v23 = vsel %vm532_vm8, %v2091_v56, 0.0  ;;  %v2298_v55 = vrot.slane %v5571_v27, 6  ;;  %v2299_v44 = vrot.slane %v5623_v14, 6  ;;  %v2300_v39 = vrot.slane %v5626_v15, 6 }
 0x189   :  { %v2237_v63 = vmul.f32 %v4302_v48, %v2204_v23  ;;  %v2266_v28 = vadd.f32 %v2234_v42, %v2040_v16  ;;  %v2267_v40 = vadd.f32 %v2235_v1, %v2041_v18  ;;  %v2268_v7 = vadd.f32 %v2236_v4, %v2042_v29 }
 0x18a   :  { %v2301_v34 = vrot.slane %v5618_v51, 6  ;;  %v2319_v56 = vsel %vm2309_vm6, %v2298_v55, %v2299_v44  ;;  %v2320_v37 = vsel %vm2309_vm6, %v7302_v54, %v2298_v55  ;;  %v2318_v47 = vsel %vm2309_vm6, %v2299_v44, %v2300_v39 }
 0x18b   :  { %v2269_v10 = vadd.f32 %v2237_v63, %v2043_v5  ;;  %v2460_v16 = vmul.f32 %v4308_v52, %v2320_v37  ;;  %v2461_v18 = vmul.f32 %v4308_v52, %v2319_v56  ;;  %v2462_v42 = vmul.f32 %v4308_v52, %v2318_v47  ;;  %3243 = vmatmul.f32.gmra.mxu2 %v5694_v21 }
 0x18c   :  { %v2317_v29 = vsel %vm2309_vm6, %v2300_v39, %v2301_v34  ;;  %v7303_v1 = vrot.slane %v5503_v20, 7  ;;  %v2524_v23 = vrot.slane %v5571_v27, 7  ;;  %v2525_v44 = vrot.slane %v5623_v14, 7 }
 0x18d   :  { %v2430_v5 = vsel %vm500_vm9, %v2317_v29, 0.0  ;;  %v2492_v4 = vadd.f32 %v2460_v16, %v2266_v28  ;;  %v2493_v55 = vadd.f32 %v2461_v18, %v2267_v40  ;;  %v2494_v56 = vadd.f32 %v2462_v42, %v2268_v7 }
 0x18e   :  { %v2463_v63 = vmul.f32 %v4308_v52, %v2430_v5  ;;  %v2526_v37 = vrot.slane %v5626_v15, 7  ;;  %v2527_v39 = vrot.slane %v5618_v51, 7  ;;  %v2545_v47 = vsel %vm2535_vm7, %v2524_v23, %v2525_v44 }
 0x18f   :  { %v2546_v54 = vsel %vm2535_vm7, %v7303_v1, %v2524_v23  ;;  %v2813_v40 = vsel %vm2535_vm7, %v5537_v38, %v5680_v33  ;;  %v1105_v28 = vmul.f32 %v4246_v22, %v5641_v17  ;;  %v2687_v38 = vmul.f32 %v4328_v0, %v2545_v47 }
 0x190   :  { %v2495_v7 = vadd.f32 %v2463_v63, %v2269_v10  ;;  %v2543_v16 = vsel %vm2535_vm7, %v2526_v37, %v2527_v39  ;;  %v2544_v18 = vsel %vm2535_vm7, %v2525_v44, %v2526_v37  ;;  %v2686_v29 = vmul.f32 %v4328_v0, %v2546_v54 }
 0x191   :  { %v2656_v42 = vsel %vm468_vm10, %v2543_v16, 0.0  ;;  %v2688_v23 = vmul.f32 %v4328_v0, %v2544_v18  ;;  %v5854_v10 = vadd.f32 %v2813_v40, %v2740_v11  ;;  %v1140_v44 = vadd.f32 %v5219_v31, %v1105_v28 }
 0x192   :  { %v2689_v5 = vmul.f32 %v4328_v0, %v2656_v42  ;;  %v5857_v63 = vadd.f32 %v2686_v29, %v2492_v4  ;;  %v1172_v54 = vrot.slane %v5641_v17, 1  ;;  %v2719_v21 = vadd.f32 %v2687_v38, %v2493_v55 }
 0x193   :  { %v2720_v37 = vadd.f32 %v2688_v23, %v2494_v56  ;;  %v7305_v16 = vrot.slane %v5854_v10, 6  ;;  %v7306_v47 = vrot.slane %v5641_v17, 2  ;;  %v7463_v53 = vrot.slane %v5618_v51, 1 }
 0x194   :  { %v2721_v1 = vadd.f32 %v2689_v5, %v2495_v7  ;;  %v7304_v18 = vmax.f32 %v5857_v63, 0.0  ;;  %v7307_v4 = vrot.slane %v5641_v17, 3  ;;  %v2751_v40 = vmax.f32 %v2719_v21, 0.0 }
 0x195   :  { %v1186_v11 = vsel %vm1179_vm1, %v7463_v53, %v1172_v54  ;;  %v2752_v28 = vmax.f32 %v2720_v37, 0.0  ;;  %v7464_v55 = vrot.slane %v5554_v49, 6  ;;  %v7465_v23 = vrot.slane %v5618_v51, 2 }
 0x196   :  { %v1334_v7 = vmul.f32 %v4250_v24, %v1186_v11  ;;  %v2753_v29 = vmax.f32 %v2721_v1, 0.0  ;;  %v5880_v42 = vrot.slane %v7304_v18, 7  ;;  %v2783_v5 = vrot.slane %v2751_v40, 7 }
 0x197   :  { %v2941_v56 = vsel %vm2309_vm6, %v7464_v55, %v7305_v16  ;;  %v1412_v49 = vsel %vm1405_vm2, %v7465_v23, %v7306_v47  ;;  %v2784_v21 = vrot.slane %v2752_v28, 7  ;;  %v1638_v55 = vsel %vm1631_vm3, %v1623_v61, %v7307_v4 }
 0x198   :  { %v5883_v38 = vadd.f32 %v2941_v56, %v5854_v10  ;;  %v1366_v37 = vadd.f32 %v1334_v7, %v1140_v44  ;;  %v1560_v53 = vmul.f32 %v4268_v32, %v1412_v49  ;;  %v5892_v1 = vrot.slane %v2753_v29, 7 }
 0x199   :  { %v7317_v56 = vrot.slane %v5641_v17, 4  ;;  %v2801_v23 = vsel %vm2535_vm7, %v2783_v5, %v2784_v21  ;;  %v2802_v44 = vsel %vm2535_vm7, %v5880_v42, %v2783_v5  ;;  %v1786_v49 = vmul.f32 %v4288_v41, %v1638_v55 }
 0x19a   :  { %v7309_v11 = vrot.slane %v5883_v38, 4  ;;  %v1592_v7 = vadd.f32 %v1560_v53, %v1366_v37  ;;  %v2800_v18 = vsel %vm2535_vm7, %v2784_v21, %v5892_v1  ;;  %v5911_v16 = vadd.f32 %v2802_v44, %v2751_v40 }
 0x19b   :  { %v2880_v47 = vadd.f32 %v2801_v23, %v2752_v28  ;;  %v7466_v61 = vrot.slane %v5597_v36, 4  ;;  %v2849_v5 = vsel %vm468_vm10, %v2800_v18, 0.0  ;;  %v1864_v40 = vsel %vm1857_vm4, %v1849_v50, %v7317_v56 }
 0x19c   :  { %v1818_v53 = vadd.f32 %v1786_v49, %v1592_v7  ;;  %v5928_v28 = vadd.f32 %v2849_v5, %v2753_v29  ;;  %v7308_v36 = vrot.slane %v5911_v16, 6  ;;  %v2012_v55 = vmul.f32 %v4294_v45, %v1864_v40 }
 0x19d   :  { %v3069_v4 = vsel %vm1857_vm4, %v7466_v61, %v7309_v11  ;;  %v2912_v21 = vrot.slane %v2880_v47, 6  ;;  %v2076_v18 = vrot.slane %v5641_v17, 5  ;;  %v7311_v44 = vrot.slane %v5641_v17, 7 }
 0x19e   :  { %v3124_v37 = vadd.f32 %v3069_v4, %v5883_v38  ;;  %v2302_v4 = vrot.slane %v5641_v17, 6  ;;  %v7310_v7 = vrot.slane %v5928_v28, 6  ;;  %v2044_v29 = vadd.f32 %v2012_v55, %v1818_v53 }
 0x19f   :  { %v2929_v50 = vsel %vm2309_vm6, %v7308_v36, %v2912_v21  ;;  %v2031_v49 = vadd.f32 %v5683_v6, %v5698_v12  ;;  %v2090_v5 = vsel %vm2083_vm5, %v2075_v3, %v2076_v18  ;;  %v2542_v12 = vsel %vm2535_vm7, %v2527_v39, %v7311_v44 }
 0x1a0   :  { %v3156_v23 = vmul.f32 0.125, %v3124_v37  ;;  %v5942_v61 = vadd.f32 %v2929_v50, %v2880_v47  ;;  %v2316_v37 = vsel %vm2309_vm6, %v2301_v34, %v2302_v4  ;;  %v2928_v6 = vsel %vm2309_vm6, %v2912_v21, %v7310_v7 }
 0x1a1   :  { %v2238_v47 = vmul.f32 %v4302_v48, %v2090_v5  ;;  %v2464_v3 = vmul.f32 %v4308_v52, %v2316_v37  ;;  %v2690_v53 = vmul.f32 %v4328_v0, %v2542_v12  ;;  %v2977_v34 = vsel %vm500_vm9, %v2928_v6, 0.0 }
 0x1a2   :  { %3246 = vmatmul.f32.gmra.mxu2 %v3156_v23  ;;  %v7319_v40 = vrot.slane %v5942_v61, 4  ;;  %v7312_v55 = vrot.slane %v7453_v35, 5  ;;  %v7316_v39 = vrot.slane %v7453_v35, 6  ;;  %v5971_v23 = vadd.f32 %v2977_v34, %v5928_v28 }
 0x1a3   :  { %v2270_v50 = vadd.f32 %v2238_v47, %v2044_v29  ;;  %v7314_v21 = vrot.slane %v7453_v35, 7  ;;  %v1106_v5 = vmul.f32 %v4246_v22, %v5645_v25  ;;  %v7467_v37 = vrot.slane %v7442_v8, 5 }
 0x1a4   :  { %v7468_v6 = vrot.slane %v7442_v8, 6  ;;  %v7313_v29 = vrot.slane %v5645_v25, 1  ;;  %v7315_v47 = vrot.slane %v5645_v25, 2  ;;  %v3041_v36 = vrot.slane %v5971_v23, 4 }
 0x1a5   :  { %v2103_v12 = vsel %vm2083_vm5, %v7467_v37, %v7312_v55  ;;  %v2496_v11 = vadd.f32 %v2464_v3, %v2270_v50  ;;  %v7469_v37 = vrot.slane %v7442_v8, 7  ;;  %v7470_v50 = vrot.slane %v5641_v17, 2 }
 0x1a6   :  { %v2329_v34 = vsel %vm2309_vm6, %v7468_v6, %v7316_v39  ;;  %v2225_v7 = vmul.f32 %v4302_v48, %v2103_v12  ;;  %v1141_v6 = vadd.f32 %v5219_v31, %v1106_v5  ;;  %v1185_v3 = vsel %vm1179_vm1, %v1172_v54, %v7313_v29 }
 0x1a7   :  { %v2451_v44 = vmul.f32 %v4308_v52, %v2329_v34  ;;  %v2555_v55 = vsel %vm2535_vm7, %v7469_v37, %v7314_v21  ;;  %v1411_v12 = vsel %vm1405_vm2, %v7470_v50, %v7315_v47  ;;  %v3056_v31 = vsel %vm1857_vm4, %v7319_v40, %v3041_v36 }
 0x1a8   :  { %v2722_v5 = vadd.f32 %v2690_v53, %v2496_v11  ;;  %v2257_v34 = vadd.f32 %v2225_v7, %v2031_v49  ;;  %v2677_v37 = vmul.f32 %v4328_v0, %v2555_v55  ;;  %v3105_v54 = vsel %vm564_vm0, %v3056_v31, 0.0 }
 0x1a9   :  { %v1335_v29 = vmul.f32 %v4250_v24, %v1185_v3  ;;  %v1561_v21 = vmul.f32 %v4268_v32, %v1411_v12  ;;  %v1625_v50 = vrot.slane %v5645_v25, 3  ;;  %v3137_v47 = vadd.f32 %v3105_v54, %v5971_v23 }
 0x1aa   :  { %v2754_v39 = vmax.f32 %v2722_v5, 0.0  ;;  %v2483_v56 = vadd.f32 %v2451_v44, %v2257_v34  ;;  %v1851_v15 = vrot.slane %v5645_v25, 4  ;;  %v7471_v11 = vrot.slane %v5641_v17, 3 }
 0x1ab   :  { %v1367_v40 = vadd.f32 %v1335_v29, %v1141_v6  ;;  %v7322_v7 = vrot.slane %v5645_v25, 5  ;;  %v7321_v49 = vrot.slane %v5645_v25, 6  ;;  %v3169_v53 = vmul.f32 0.125, %v3137_v47 }
 0x1ac   :  { %v1637_v58 = vsel %vm1631_vm3, %v7471_v11, %v1625_v50  ;;  %v6034_v55 = vrot.slane %v2754_v39, 7  ;;  %v2709_v3 = vadd.f32 %v2677_v37, %v2483_v56  ;;  %v7472_v29 = vrot.slane %v5641_v17, 4 }
 0x1ad   :  { %v1787_v44 = vmul.f32 %v4288_v41, %v1637_v58  ;;  %v1593_v12 = vadd.f32 %v1561_v21, %v1367_v40  ;;  %v2089_v31 = vsel %vm2083_vm5, %v2076_v18, %v7322_v7  ;;  %v2315_v56 = vsel %vm2309_vm6, %v2302_v4, %v7321_v49  ;;  %3285 = vmatmul.f32.vlgmr.msra.gmra.mxu3 %v3169_v53  ;;  %v7473_v4 = vld [vmem:[#allocation23_spill] sm:$0xff] }
 0x1ae   :  { %v1863_v6 = vsel %vm1857_vm4, %v7472_v29, %v1851_v15  ;;  %v2799_v40 = vsel %vm2535_vm7, %v5892_v1, %v6034_v55  ;;  %v2741_v21 = vmax.f32 %v2709_v3, 0.0  ;;  %v2239_v5 = vmul.f32 %v4302_v48, %v2089_v31 }
 0x1af   :  { %v2013_v47 = vmul.f32 %v4294_v45, %v1863_v6  ;;  %v6057_v34 = vadd.f32 %v2799_v40, %v2754_v39  ;;  %v1819_v37 = vadd.f32 %v1787_v44, %v1593_v12  ;;  %v2465_v18 = vmul.f32 %v4308_v52, %v2315_v56  ;;  %v6083_v56 = vld [vmem:[%s7209_s4] ss:$0 sm:$0xff] }
 0x1b0   :  { %v7320_v54 = vrot.slane %v5645_v25, 7  ;;  %v6061_v11 = vrot.slane %v2741_v21, 7  ;;  %v1093_v58 = vmul.f32 %v4246_v22, %v7473_v4  ;;  %v7323_v53 = vrot.slane %v7473_v4, 1 }
 0x1b1   :  { %v7324_v1 = vrot.slane %v7473_v4, 2  ;;  %v2914_v3 = vrot.slane %v6057_v34, 6  ;;  %v2045_v29 = vadd.f32 %v2013_v47, %v1819_v37  ;;  %v7474_v39 = vrot.slane %v5641_v17, 7 }
 0x1b2   :  { %v7331_v12 = vrot.slane %v7473_v4, 3  ;;  %v2812_v6 = vsel %vm2535_vm7, %v5680_v33, %v6061_v11  ;;  %v1128_v40 = vadd.f32 %v6083_v56, %v1093_v58  ;;  %v7475_v47 = vrot.slane %v7453_v35, 1 }
 0x1b3   :  { %v2541_v44 = vsel %vm2535_vm7, %v7474_v39, %v7320_v54  ;;  %v7476_v33 = vrot.slane %v5928_v28, 6  ;;  %v2271_v54 = vadd.f32 %v2239_v5, %v2045_v29  ;;  %v7477_v7 = vrot.slane %v7453_v35, 2 }
 0x1b4   :  { %v2691_v31 = vmul.f32 %v4328_v0, %v2541_v44  ;;  %v1198_v37 = vsel %vm1179_vm1, %v7475_v47, %v7323_v53  ;;  %v6098_v44 = vadd.f32 %v2812_v6, %v2741_v21  ;;  %v7478_v28 = vrot.slane %v7453_v35, 3 }
 0x1b5   :  { %v2927_v39 = vsel %vm2309_vm6, %v7476_v33, %v2914_v3  ;;  %v1322_v49 = vmul.f32 %v4250_v24, %v1198_v37  ;;  %v1424_v47 = vsel %vm1405_vm2, %v7477_v7, %v7324_v1  ;;  %v7325_v5 = vrot.slane %v7473_v4, 4 }
 0x1b6   :  { %v6102_v58 = vadd.f32 %v2927_v39, %v6057_v34  ;;  %v1650_v21 = vsel %vm1631_vm3, %v7478_v28, %v7331_v12  ;;  %v7327_v29 = vrot.slane %v6098_v44, 6  ;;  %v2497_v6 = vadd.f32 %v2465_v18, %v2271_v54 }
 0x1b7   :  { %v1354_v37 = vadd.f32 %v1322_v49, %v1128_v40  ;;  %v1548_v33 = vmul.f32 %v4268_v32, %v1424_v47  ;;  %v1774_v53 = vmul.f32 %v4288_v41, %v1650_v21  ;;  %v7479_v7 = vrot.slane %v7453_v35, 4 }
 0x1b8   :  { %v3042_v39 = vrot.slane %v6102_v58, 4  ;;  %v7326_v28 = vrot.slane %v7473_v4, 5  ;;  %v7480_v18 = vrot.slane %v5854_v10, 6  ;;  %v2723_v54 = vadd.f32 %v2691_v31, %v2497_v6 }
 0x1b9   :  { %v1876_v1 = vsel %vm1857_vm4, %v7479_v7, %v7325_v5  ;;  %v1580_v40 = vadd.f32 %v1548_v33, %v1354_v37  ;;  %v7481_v10 = vrot.slane %v7453_v35, 5  ;;  %v7328_v6 = vrot.slane %v7473_v4, 6 }
 0x1ba   :  { %v2940_v49 = vsel %vm2309_vm6, %v7480_v18, %v7327_v29  ;;  %v2000_v47 = vmul.f32 %v4294_v45, %v1876_v1  ;;  %v3055_v21 = vsel %vm1857_vm4, %v3041_v36, %v3042_v39  ;;  %v2755_v37 = vmax.f32 %v2723_v54, 0.0 }
 0x1bb   :  { %v6142_v7 = vadd.f32 %v2940_v49, %v6098_v44  ;;  %v2102_v31 = vsel %vm2083_vm5, %v7481_v10, %v7326_v28  ;;  %v3138_v1 = vadd.f32 %v3055_v21, %v6102_v58  ;;  %v1806_v33 = vadd.f32 %v1774_v53, %v1580_v40  ;;  %v7483_v10 = vld [vmem:[#allocation14_spill] sm:$0xff] }
 0x1bc   :  { %v2226_v23 = vmul.f32 %v4302_v48, %v2102_v31  ;;  %v7482_v18 = vrot.slane %v7453_v35, 6  ;;  %v7330_v5 = vrot.slane %v7473_v4, 7  ;;  %v1107_v28 = vmul.f32 %v4246_v22, %v7483_v10 }
 0x1bd   :  { %v7329_v36 = vrot.slane %v6142_v7, 4  ;;  %v3170_v29 = vmul.f32 0.125, %v3138_v1  ;;  %v6163_v21 = vrot.slane %v2755_v37, 7  ;;  %v2032_v53 = vadd.f32 %v2000_v47, %v1806_v33 }
 0x1be   :  { %v2328_v49 = vsel %vm2309_vm6, %v7482_v18, %v7328_v6  ;;  %v7484_v40 = vrot.slane %v5883_v38, 4  ;;  %v7485_v18 = vrot.slane %v7453_v35, 7  ;;  %v1142_v1 = vadd.f32 %v6083_v56, %v1107_v28 }
 0x1bf   :  { %v2452_v54 = vmul.f32 %v4308_v52, %v2328_v49  ;;  %v1174_v47 = vrot.slane %v7483_v10, 1  ;;  %3288 = vmatmul.f32.gmra.mxu3 %v3170_v29  ;;  %v2798_v38 = vsel %vm2535_vm7, %v6034_v55, %v6163_v21  ;;  %v2258_v49 = vadd.f32 %v2226_v23, %v2032_v53 }
 0x1c0   :  { %v3068_v31 = vsel %vm1857_vm4, %v7484_v40, %v7329_v36  ;;  %v2554_v6 = vsel %vm2535_vm7, %v7485_v18, %v7330_v5  ;;  %v6186_v36 = vadd.f32 %v2798_v38, %v2755_v37  ;;  %v7486_v18 = vrot.slane %v5645_v25, 1 }
 0x1c1   :  { %v3125_v33 = vadd.f32 %v3068_v31, %v6142_v7  ;;  %v2678_v40 = vmul.f32 %v4328_v0, %v2554_v6  ;;  %v1400_v29 = vrot.slane %v7483_v10, 2  ;;  %v7339_v31 = vrot.slane %v7483_v10, 3 }
 0x1c2   :  { %v1184_v28 = vsel %vm1179_vm1, %v7486_v18, %v1174_v47  ;;  %v2484_v12 = vadd.f32 %v2452_v54, %v2258_v49  ;;  %v7336_v23 = vrot.slane %v7483_v10, 4  ;;  %v7332_v6 = vrot.slane %v6186_v36, 6 }
 0x1c3   :  { %v3157_v5 = vmul.f32 0.125, %v3125_v33  ;;  %v1336_v55 = vmul.f32 %v4250_v24, %v1184_v28  ;;  %v7487_v37 = vrot.slane %v5645_v25, 2  ;;  %v1636_v54 = vsel %vm1631_vm3, %v1625_v50, %v7339_v31 }
 0x1c4   :  { %v7334_v33 = vrot.slane %v7483_v10, 5  ;;  %v2710_v38 = vadd.f32 %v2678_v40, %v2484_v12  ;;  %v1788_v28 = vmul.f32 %v4288_v41, %v1636_v54  ;;  %v1862_v50 = vsel %vm1857_vm4, %v1851_v15, %v7336_v23 }
 0x1c5   :  { %v1410_v53 = vsel %vm1405_vm2, %v7487_v37, %v1400_v29  ;;  %3249 = vmatmul.f32.gmra.mxu2 %v3157_v5  ;;  %v1368_v49 = vadd.f32 %v1336_v55, %v1142_v1  ;;  %v2926_v37 = vsel %vm2309_vm6, %v2914_v3, %v7332_v6  ;;  %v7488_v12 = vrot.slane %v5645_v25, 5 }
 0x1c6   :  { %v1562_v18 = vmul.f32 %v4268_v32, %v1410_v53  ;;  %v7333_v1 = vrot.slane %v7483_v10, 6  ;;  %v6234_v34 = vadd.f32 %v2926_v37, %v6186_v36  ;;  %v2742_v3 = vmax.f32 %v2710_v38, 0.0 }
 0x1c7   :  { %v2088_v5 = vsel %vm2083_vm5, %v7488_v12, %v7334_v33  ;;  %v2014_v55 = vmul.f32 %v4294_v45, %v1862_v50  ;;  %v7489_v15 = vrot.slane %v5645_v25, 6  ;;  %v7335_v12 = vrot.slane %v7483_v10, 7 }
 0x1c8   :  { %v1594_v40 = vadd.f32 %v1562_v18, %v1368_v49  ;;  %v2240_v53 = vmul.f32 %v4302_v48, %v2088_v5  ;;  %v1094_v6 = vmul.f32 %v4246_v22, %v5077_v43  ;;  %v7337_v37 = vrot.slane %v6234_v34, 4 }
 0x1c9   :  { %v2314_v54 = vsel %vm2309_vm6, %v7489_v15, %v7333_v1  ;;  %v6248_v38 = vrot.slane %v2742_v3, 7  ;;  %v7490_v50 = vrot.slane %v5645_v25, 7  ;;  %v7338_v1 = vrot.slane %v5077_v43, 1 }
 0x1ca   :  { %v1820_v49 = vadd.f32 %v1788_v28, %v1594_v40  ;;  %v2466_v18 = vmul.f32 %v4308_v52, %v2314_v54  ;;  %v1129_v15 = vadd.f32 %v6083_v56, %v1094_v6  ;;  %v7347_v33 = vrot.slane %v5077_v43, 2 }
 0x1cb   :  { %v2540_v5 = vsel %vm2535_vm7, %v7490_v50, %v7335_v12  ;;  %v3054_v28 = vsel %vm1857_vm4, %v3042_v39, %v7337_v37  ;;  %v2811_v40 = vsel %vm2535_vm7, %v6061_v11, %v6248_v38  ;;  %v7491_v23 = vrot.slane %v7473_v4, 1 }
 0x1cc   :  { %v2046_v54 = vadd.f32 %v2014_v55, %v1820_v49  ;;  %v2692_v50 = vmul.f32 %v4328_v0, %v2540_v5  ;;  %v3139_v6 = vadd.f32 %v3054_v28, %v6234_v34  ;;  %v6272_v12 = vadd.f32 %v2811_v40, %v2742_v3 }
 0x1cd   :  { %v1197_v58 = vsel %vm1179_vm1, %v7491_v23, %v7338_v1  ;;  %v7492_v39 = vrot.slane %v7473_v4, 2  ;;  %v7342_v5 = vrot.slane %v5077_v43, 3  ;;  %v7341_v37 = vrot.slane %v5077_v43, 4 }
 0x1ce   :  { %v2272_v55 = vadd.f32 %v2240_v53, %v2046_v54  ;;  %v1323_v49 = vmul.f32 %v4250_v24, %v1197_v58  ;;  %v3171_v28 = vmul.f32 0.125, %v3139_v6  ;;  %v7340_v40 = vrot.slane %v6272_v12, 6 }
 0x1cf   :  { %v1423_v11 = vsel %vm1405_vm2, %v7492_v39, %v7347_v33  ;;  %v7345_v23 = vrot.slane %v5077_v43, 5  ;;  %v7493_v39 = vrot.slane %v7473_v4, 3  ;;  %v7343_v54 = vrot.slane %v5077_v43, 6 }
 0x1d0   :  { %v1549_v3 = vmul.f32 %v4268_v32, %v1423_v11  ;;  %v2498_v1 = vadd.f32 %v2466_v18, %v2272_v55  ;;  %v1355_v31 = vadd.f32 %v1323_v49, %v1129_v15  ;;  %3291 = vmatmul.f32.gmra.mxu3 %v3171_v28  ;;  %v7494_v6 = vrot.slane %v6098_v44, 6 }
 0x1d1   :  { %v1649_v53 = vsel %vm1631_vm3, %v7493_v39, %v7342_v5  ;;  %v7495_v15 = vrot.slane %v7473_v4, 4  ;;  %v7496_v55 = vrot.slane %v7473_v4, 5  ;;  %v7498_v5 = vld [vmem:[#allocation16_spill] sm:$0xff] }
 0x1d2   :  { %v2939_v58 = vsel %vm2309_vm6, %v7494_v6, %v7340_v40  ;;  %v1775_v18 = vmul.f32 %v4288_v41, %v1649_v53  ;;  %v2724_v28 = vadd.f32 %v2692_v50, %v2498_v1  ;;  %v1581_v39 = vadd.f32 %v1549_v3, %v1355_v31 }
 0x1d3   :  { %v1875_v11 = vsel %vm1857_vm4, %v7495_v15, %v7341_v37  ;;  %v2101_v49 = vsel %vm2083_vm5, %v7496_v55, %v7345_v23  ;;  %v6319_v44 = vadd.f32 %v2939_v58, %v6272_v12  ;;  %v7497_v15 = vrot.slane %v7473_v4, 6 }
 0x1d4   :  { %v2001_v53 = vmul.f32 %v4294_v45, %v1875_v11  ;;  %v2227_v6 = vmul.f32 %v4302_v48, %v2101_v49  ;;  %v7344_v37 = vrot.slane %v5077_v43, 7  ;;  %v1108_v55 = vmul.f32 %v4246_v22, %v7498_v5 }
 0x1d5   :  { %v2327_v40 = vsel %vm2309_vm6, %v7497_v15, %v7343_v54  ;;  %v7346_v58 = vrot.slane %v6319_v44, 4  ;;  %v2756_v1 = vmax.f32 %v2724_v28, 0.0  ;;  %v1807_v31 = vadd.f32 %v1775_v18, %v1581_v39 }
 0x1d6   :  { %v2453_v50 = vmul.f32 %v4308_v52, %v2327_v40  ;;  %v7499_v3 = vrot.slane %v7473_v4, 7  ;;  %v1143_v49 = vadd.f32 %v6083_v56, %v1108_v55  ;;  %v7500_v15 = vrot.slane %v7498_v5, 1 }
 0x1d7   :  { %v7501_v18 = vrot.slane %v7498_v5, 2  ;;  %v7502_v28 = vrot.slane %v6142_v7, 4  ;;  %v6359_v55 = vrot.slane %v2756_v1, 7  ;;  %v7507_v14 = vrot.slane %v7498_v5, 5 }
 0x1d8   :  { %v2553_v11 = vsel %vm2535_vm7, %v7499_v3, %v7344_v37  ;;  %v1183_v54 = vsel %vm1179_vm1, %v1174_v47, %v7500_v15  ;;  %v2033_v3 = vadd.f32 %v2001_v53, %v1807_v31 }
 0x1d9   :  { %v1409_v40 = vsel %vm1405_vm2, %v1400_v29, %v7501_v18  ;;  %v3067_v39 = vsel %vm1857_vm4, %v7502_v28, %v7346_v58  ;;  %v2679_v37 = vmul.f32 %v4328_v0, %v2553_v11  ;;  %v1337_v15 = vmul.f32 %v4250_v24, %v1183_v54 }
 0x1da   :  { %v3126_v47 = vadd.f32 %v3067_v39, %v6319_v44  ;;  %v1563_v23 = vmul.f32 %v4268_v32, %v1409_v40  ;;  %v7503_v29 = vrot.slane %v7498_v5, 3  ;;  %v7504_v18 = vrot.slane %v7483_v10, 3 }
 0x1db   :  { %v2797_v53 = vsel %vm2535_vm7, %v6163_v21, %v6359_v55  ;;  %v2259_v31 = vadd.f32 %v2227_v6, %v2033_v3  ;;  %v7505_v28 = vrot.slane %v7498_v5, 4  ;;  %v7506_v54 = vrot.slane %v7483_v10, 4 }
 0x1dc   :  { %v1635_v7 = vsel %vm1631_vm3, %v7504_v18, %v7503_v29  ;;  %v3158_v39 = vmul.f32 0.125, %v3126_v47  ;;  %v6382_v58 = vadd.f32 %v2797_v53, %v2756_v1  ;;  %v1369_v33 = vadd.f32 %v1337_v15, %v1143_v49 }
 0x1dd   :  { %v1789_v11 = vmul.f32 %v4288_v41, %v1635_v7  ;;  %v1861_v40 = vsel %vm1857_vm4, %v7506_v54, %v7505_v28  ;;  %v2485_v18 = vadd.f32 %v2453_v50, %v2259_v31  ;;  %v7508_v21 = vrot.slane %v7483_v10, 5 }
 0x1de   :  { %v2015_v29 = vmul.f32 %v4294_v45, %v1861_v40  ;;  %v7509_v3 = vrot.slane %v7498_v5, 6  ;;  %v7510_v7 = vrot.slane %v7483_v10, 6  ;;  %v7511_v1 = vrot.slane %v7498_v5, 7  ;;  %3252 = vmatmul.f32.gmra.mxu2 %v3158_v39 }
 0x1df   :  { %v2087_v6 = vsel %vm2083_vm5, %v7508_v21, %v7507_v14  ;;  %v7512_v49 = vrot.slane %v7483_v10, 7  ;;  %v7349_v15 = vrot.slane %v6382_v58, 6  ;;  %v1595_v53 = vadd.f32 %v1563_v23, %v1369_v33 }
 0x1e0   :  { %v2313_v47 = vsel %vm2309_vm6, %v7510_v7, %v7509_v3  ;;  %v2241_v14 = vmul.f32 %v4302_v48, %v2087_v6  ;;  %v2711_v28 = vadd.f32 %v2679_v37, %v2485_v18  ;;  %v1095_v40 = vmul.f32 %v4246_v22, %v5126_v59 }
 0x1e1   :  { %v2539_v50 = vsel %vm2535_vm7, %v7512_v49, %v7511_v1  ;;  %v2467_v31 = vmul.f32 %v4308_v52, %v2313_v47  ;;  %v1162_v21 = vrot.slane %v5126_v59, 1  ;;  %v7513_v3 = vrot.slane %v6186_v36, 6 }
 0x1e2   :  { %v2693_v54 = vmul.f32 %v4328_v0, %v2539_v50  ;;  %v1821_v33 = vadd.f32 %v1789_v11, %v1595_v53  ;;  %v1388_v23 = vrot.slane %v5126_v59, 2  ;;  %v7350_v6 = vrot.slane %v5126_v59, 3 }
 0x1e3   :  { %v2925_v39 = vsel %vm2309_vm6, %v7513_v3, %v7349_v15  ;;  %v2743_v18 = vmax.f32 %v2711_v28, 0.0  ;;  %v1130_v7 = vadd.f32 %v6083_v56, %v1095_v40  ;;  %v7514_v47 = vrot.slane %v5077_v43, 1 }
 0x1e4   :  { %v6419_v37 = vadd.f32 %v2925_v39, %v6382_v58  ;;  %v2047_v36 = vadd.f32 %v2015_v29, %v1821_v33  ;;  %v7515_v11 = vrot.slane %v5077_v43, 2  ;;  %v7516_v53 = vrot.slane %v5077_v43, 3 }
 0x1e5   :  { %v1196_v1 = vsel %vm1179_vm1, %v7514_v47, %v1162_v21  ;;  %v6438_v3 = vrot.slane %v2743_v18, 7  ;;  %v7517_v15 = vrot.slane %v6234_v34, 4  ;;  %v7518_v34 = vrot.slane %v5077_v43, 4 }
 0x1e6   :  { %v1324_v49 = vmul.f32 %v4250_v24, %v1196_v1  ;;  %v1422_v50 = vsel %vm1405_vm2, %v7515_v11, %v1388_v23  ;;  %v1648_v28 = vsel %vm1631_vm3, %v7516_v53, %v7350_v6  ;;  %v7351_v40 = vrot.slane %v6419_v37, 4 }
 0x1e7   :  { %v1550_v29 = vmul.f32 %v4268_v32, %v1422_v50  ;;  %v1776_v39 = vmul.f32 %v4288_v41, %v1648_v28  ;;  %v2273_v33 = vadd.f32 %v2241_v14, %v2047_v36  ;;  %v1840_v1 = vrot.slane %v5126_v59, 4 }
 0x1e8   :  { %v1356_v47 = vadd.f32 %v1324_v49, %v1130_v7  ;;  %v7354_v11 = vrot.slane %v5126_v59, 5  ;;  %v3053_v53 = vsel %vm1857_vm4, %v7517_v15, %v7351_v40  ;;  %v2810_v50 = vsel %vm2535_vm7, %v6248_v38, %v6438_v3 }
 0x1e9   :  { %v7352_v28 = vrot.slane %v5126_v59, 6  ;;  %v3140_v7 = vadd.f32 %v3053_v53, %v6419_v37  ;;  %v6457_v36 = vadd.f32 %v2810_v50, %v2743_v18  ;;  %v2499_v49 = vadd.f32 %v2467_v31, %v2273_v33 }
 0x1ea   :  { %v1582_v6 = vadd.f32 %v1550_v29, %v1356_v47  ;;  %v1874_v15 = vsel %vm1857_vm4, %v7518_v34, %v1840_v1  ;;  %v7519_v38 = vrot.slane %v5077_v43, 5  ;;  %v7520_v47 = vrot.slane %v5077_v43, 6 }
 0x1eb   :  { %v3172_v14 = vmul.f32 0.125, %v3140_v7  ;;  %v7353_v18 = vrot.slane %v6457_v36, 6  ;;  %v2725_v53 = vadd.f32 %v2693_v54, %v2499_v49  ;;  %v2002_v29 = vmul.f32 %v4294_v45, %v1874_v15 }
 0x1ec   :  { %v2100_v40 = vsel %vm2083_vm5, %v7519_v38, %v7354_v11  ;;  %v1808_v31 = vadd.f32 %v1776_v39, %v1582_v6  ;;  %v2326_v50 = vsel %vm2309_vm6, %v7520_v47, %v7352_v28  ;;  %v7521_v34 = vrot.slane %v5126_v59, 7 }
 0x1ed   :  { %v2228_v33 = vmul.f32 %v4302_v48, %v2100_v40  ;;  %v7522_v38 = vrot.slane %v5077_v43, 7  ;;  %3294 = vmatmul.f32.gmra.mxu3 %v3172_v14  ;;  %v7523_v54 = vrot.slane %v6272_v12, 6  ;;  %v2757_v40 = vmax.f32 %v2725_v53, 0.0 }
 0x1ee   :  { %v44_v39 = vadd.s32 128, %v4241_v19  ;;  %v1096_v49 = vmul.f32 %v4246_v22, %v5192_v62  ;;  %v2034_v47 = vadd.f32 %v2002_v29, %v1808_v31  ;;  %v1389_v14 = vrot.slane %v5192_v62, 2 }
 0x1ef   :  { %v2552_v7 = vsel %vm2535_vm7, %v7522_v38, %v7521_v34  ;;  %v2938_v6 = vsel %vm2309_vm6, %v7523_v54, %v7353_v18  ;;  %v1163_v34 = vrot.slane %v5192_v62, 1  ;;  %v2789_v38 = vrot.slane %v2757_v40, 7 }
 0x1f0   :  { %v6496_v15 = vadd.f32 %v2938_v6, %v6457_v36  ;;  %v2454_v12 = vmul.f32 %v4308_v52, %v2326_v50  ;;  %v2680_v28 = vmul.f32 %v4328_v0, %v2552_v7  ;;  %v6502_v54 = vand.u32 63, %v44_v39 }
 0x1f1   :  { %v2260_v18 = vadd.f32 %v2228_v33, %v2034_v47  ;;  %v1131_v11 = vadd.f32 %v6083_v56, %v1096_v49  ;;  %v7356_v6 = vrot.slane %v5192_v62, 3  ;;  %v2796_v31 = vsel %vm2535_vm7, %v6359_v55, %v2789_v38 }
 0x1f2   :  { %v3031_v53 = vrot.slane %v6496_v15, 4  ;;  %v2795_v29 = vsel %vm2535_vm7, %v2789_v38, %v5154_v9  ;;  %v1195_v50 = vsel %vm1179_vm1, %v1162_v21, %v1163_v34  ;;  %v1421_v33 = vsel %vm1405_vm2, %v1388_v23, %v1389_v14 }
 0x1f3   :  { %v7524_v7 = vrot.slane %v6319_v44, 4  ;;  %v2885_v39 = vadd.f32 %v2796_v31, %v2757_v40  ;;  %v2486_v49 = vadd.f32 %v2454_v12, %v2260_v18  ;;  %v7525_v9 = vmax.f32 %v5123_v13, 0.0 }
 0x1f4   :  { %vm524_vm12 = vcmp.ge.s32.totalorder %v6502_v54, 3  ;;  %vm556_vm13 = vcmp.ge.s32.totalorder %v6502_v54, 4  ;;  %vm588_vm11 = vcmp.ge.s32.totalorder %v6502_v54, 5  ;;  %vm620_vm14 = vcmp.ge.s32.totalorder %v6502_v54, 6 }
 0x1f5   :  { %v3066_v55 = vsel %vm1857_vm4, %v7524_v7, %v3031_v53  ;;  %v6529_v47 = vadd.f32 %v2795_v29, %v7525_v9  ;;  %v2917_v23 = vrot.slane %v2885_v39, 6  ;;  %v2712_v38 = vadd.f32 %v2680_v28, %v2486_v49 }
 0x1f6   :  { %v3127_v21 = vadd.f32 %v3066_v55, %v6496_v15  ;;  %vm652_vm15 = vcmp.ge.s32.totalorder %v6502_v54, 7  ;;  %v1518_v13 = vsel %vm620_vm14, %v1421_v33, 0.0  ;;  %v7526_v18 = vrot.slane %v5126_v59, 3 }
 0x1f7   :  { %v2918_v44 = vrot.slane %v6529_v47, 6  ;;  %v7527_v31 = vrot.slane %v6382_v58, 6  ;;  %v2744_v29 = vmax.f32 %v2712_v38, 0.0  ;;  %vm492_vm0 = vcmp.ge.s32.totalorder %v6502_v54, 2 }
 0x1f8   :  { %v3159_v40 = vmul.f32 0.125, %v3127_v21  ;;  %v1647_v12 = vsel %vm1631_vm3, %v7526_v18, %v7356_v6  ;;  %v1292_v55 = vsel %vm652_vm15, %v1195_v50, 0.0  ;;  %vm460_vm8 = vcmp.ge.s32.totalorder %v6502_v54, 1 }
 0x1f9   :  { %v2924_v28 = vsel %vm2309_vm6, %v7527_v31, %v2917_v23  ;;  %v2923_v7 = vsel %vm2309_vm6, %v2917_v23, %v2918_v44  ;;  %v1325_v9 = vmul.f32 %v4250_v24, %v1292_v55  ;;  %v1551_v58 = vmul.f32 %v4268_v32, %v1518_v13 }
 0x1fa   :  { %3255 = vmatmul.f32.gmra.mxu2 %v3159_v40  ;;  %v3013_v33 = vadd.f32 %v2924_v28, %v2885_v39  ;;  %v6552_v49 = vadd.f32 %v2923_v7, %v6529_v47  ;;  %v6557_v21 = vrot.slane %v2744_v29, 7  ;;  %v1744_v38 = vsel %vm588_vm11, %v1647_v12, 0.0 }
 0x1fb   :  { %v1841_v23 = vrot.slane %v5192_v62, 4  ;;  %v7355_v50 = vrot.slane %v5255_v60, 4  ;;  %v1357_v47 = vadd.f32 %v1325_v9, %v1131_v11  ;;  %v1777_v18 = vmul.f32 %v4288_v41, %v1744_v38 }
 0x1fc   :  { %v3045_v40 = vrot.slane %v3013_v33, 4  ;;  %v3046_v39 = vrot.slane %v6552_v49, 4  ;;  %v2809_v13 = vsel %vm2535_vm7, %v6438_v3, %v6557_v21  ;;  %v7359_v28 = vrot.slane %v5192_v62, 5 }
 0x1fd   :  { %v1872_v12 = vsel %vm1857_vm4, %v1841_v23, %v7355_v50  ;;  %v1873_v31 = vsel %vm1857_vm4, %v1840_v1, %v1841_v23  ;;  %v7528_v11 = vrot.slane %v6419_v37, 4  ;;  %v6582_v55 = vadd.f32 %v2809_v13, %v2744_v29 }
 0x1fe   :  { %v3051_v3 = vsel %vm1857_vm4, %v3045_v40, %v3046_v39  ;;  %v1583_v9 = vadd.f32 %v1551_v58, %v1357_v47  ;;  %v1970_v6 = vsel %vm556_vm13, %v1873_v31, 0.0  ;;  %v6590_v1 = vmul.f32 %v4294_v45, %v1872_v12 }
 0x1ff   :  { %v3052_v7 = vsel %vm1857_vm4, %v7528_v11, %v3045_v40  ;;  %v3142_v50 = vadd.f32 %v3051_v3, %v6552_v49  ;;  %v7357_v37 = vrot.slane %v6582_v55, 6  ;;  %v2003_v11 = vmul.f32 %v4294_v45, %v1970_v6  ;;  %v3214_v6 = vpop.f32.mrf.mxu2 }
 0x200   :  { %v3141_v38 = vadd.f32 %v3052_v7, %v3013_v33  ;;  %v1809_v23 = vadd.f32 %v1777_v18, %v1583_v9  ;;  %v7529_v29 = vrot.slane %v5126_v59, 5  ;;  %v2293_v47 = vrot.slane %v5192_v62, 6  ;;  %v6606_v18 = vld [vmem:[%s7211_s6] ss:$0 sm:$0xff]  ;;  %s3941_s6 = smov [#allocation2]  }
 0x201   :  { %v3174_v49 = vmul.f32 0.125, %v3142_v50  ;;  %v7530_v13 = vrot.slane %v6457_v36, 6  ;;  %v2519_v7 = vrot.slane %v5192_v62, 7  ;;  %v7531_v9 = vrot.slane %v5126_v59, 6  ;;  %s3698_s12 = sshll.u32 %s3941_s6, 4  ;;  %s3699_s12 = int_to_ptr.vmem [resolvable:$true] %s3698_s12 }
 0x202   :  { %v2099_v33 = vsel %vm2083_vm5, %v7529_v29, %v7359_v28  ;;  %v3173_v58 = vmul.f32 0.125, %v3141_v38  ;;  %v2035_v31 = vadd.f32 %v2003_v11, %v1809_v23  ;;  %v6624_v29 = vadd.f32 %v6606_v18, %v3214_v6 }
 0x203   :  { %v2196_v40 = vsel %vm524_vm12, %v2099_v33, 0.0  ;;  %v2937_v12 = vsel %vm2309_vm6, %v7530_v13, %v7357_v37  ;;  %v2325_v38 = vsel %vm2309_vm6, %v7531_v9, %v2293_v47  ;;  %v7532_v36 = vrot.slane %v5181_v46, 6 }
 0x204   :  { %v2229_v50 = vmul.f32 %v4302_v48, %v2196_v40  ;;  %3297 = vmatmul.f32.gmra.mxu3 %v3173_v58  ;;  %v6617_v3 = vadd.f32 %v2937_v12, %v6582_v55  ;;  %v2422_v33 = vsel %vm492_vm0, %v2325_v38, 0.0  ;;  %v7533_v58 = vrot.slane %v5126_v59, 7  ;;  %3310 = vmax.xlane.f32.xlu0 %v6624_v29 }
 0x205   :  { %v2922_v23 = vsel %vm2309_vm6, %v2918_v44, %v7532_v36  ;;  %v2455_v6 = vmul.f32 %v4308_v52, %v2422_v33  ;;  %v1097_v44 = vmul.f32 %v4246_v22, %v5255_v60  ;;  %v1164_v38 = vrot.slane %v5255_v60, 1 }
 0x206   :  { %v2261_v11 = vadd.f32 %v2229_v50, %v2035_v31  ;;  %v2551_v40 = vsel %vm2535_vm7, %v7533_v58, %v2519_v7  ;;  %v3015_v13 = vadd.f32 %v2922_v23, %v5181_v46  ;;  %v7358_v12 = vrot.slane %v6617_v3, 4 }
 0x207   :  { %v2648_v9 = vsel %vm460_vm8, %v2551_v40, 0.0  ;;  %v1390_v36 = vrot.slane %v5255_v60, 2  ;;  %v1132_v33 = vadd.f32 %v6083_v56, %v1097_v44  ;;  %v1616_v58 = vrot.slane %v5255_v60, 3 }
 0x208   :  { %v2681_v31 = vmul.f32 %v4328_v0, %v2648_v9  ;;  %v3047_v50 = vrot.slane %v3015_v13, 4  ;;  %v3065_v46 = vsel %vm1857_vm4, %v3031_v53, %v7358_v12  ;;  %v2487_v23 = vadd.f32 %v2455_v6, %v2261_v11 }
 0x209   :  { %v3128_v40 = vadd.f32 %v3065_v46, %v6617_v3  ;;  %v1194_v37 = vsel %vm1179_vm1, %v1163_v34, %v1164_v38  ;;  %v1420_v15 = vsel %vm1405_vm2, %v1389_v14, %v1390_v36  ;;  %v7534_v12 = vrot.slane %v5192_v62, 3 }
 0x20a   :  { %v3050_v9 = vsel %vm1857_vm4, %v3046_v39, %v3047_v50  ;;  %v2713_v53 = vadd.f32 %v2681_v31, %v2487_v23  ;;  %v1326_v6 = vmul.f32 %v4250_v24, %v1194_v37  ;;  %v1552_v44 = vmul.f32 %v4268_v32, %v1420_v15 }
 0x20b   :  { %v3143_v11 = vadd.f32 %v3050_v9, %v3015_v13  ;;  %v3160_v46 = vmul.f32 0.125, %v3128_v40  ;;  %v1646_v39 = vsel %vm1631_vm3, %v7534_v12, %v1616_v58  ;;  %v2068_v28 = vrot.slane %v5255_v60, 5  ;;  %v3217_v40 = vpop.f32.mrf.mxu2 }
 0x20c   :  { %v2294_v34 = vrot.slane %v5255_v60, 6  ;;  %3300 = vmatmul.f32.gmra.mxu3 %v3174_v49  ;;  %v2745_v27 = vmax.f32 %v2713_v53, 0.0  ;;  %v1358_v14 = vadd.f32 %v1326_v6, %v1132_v33  ;;  %v1778_v13 = vmul.f32 %v4288_v41, %v1646_v39  ;;  %v7537_v39 = vld [vmem:[#allocation27_spill] sm:$0xff] }
 0x20d   :  { %v3175_v59 = vmul.f32 0.125, %v3143_v11  ;;  %3258 = vmatmul.f32.gmra.mxu2 %v3160_v46  ;;  %v7535_v37 = vrot.slane %v5192_v62, 5  ;;  %v2520_v12 = vrot.slane %v5255_v60, 7  ;;  %v7536_v9 = vrot.slane %v5222_v26, 4 }
 0x20e   :  { %v2324_v23 = vsel %vm2309_vm6, %v2293_v47, %v2294_v34  ;;  %v6686_v33 = vrot.slane %v2745_v27, 7  ;;  %v1584_v15 = vadd.f32 %v1552_v44, %v1358_v14  ;;  %v6693_v47 = vadd.f32 %v6606_v18, %v3217_v40 }
 0x20f   :  { %v2098_v31 = vsel %vm2083_vm5, %v7535_v37, %v2068_v28  ;;  %v3049_v49 = vsel %vm1857_vm4, %v3047_v50, %v7536_v9  ;;  %v2456_v11 = vmul.f32 %v4308_v52, %v2324_v23  ;;  %v2550_v6 = vsel %vm2535_vm7, %v2519_v7, %v2520_v12 }
 0x210   :  { %v2230_v53 = vmul.f32 %v4302_v48, %v2098_v31  ;;  %v3144_v46 = vadd.f32 %v3049_v49, %v5222_v26  ;;  %v1098_v37 = vmul.f32 %v4246_v22, %v7537_v39  ;;  %v2808_v50 = vsel %vm2535_vm7, %v6557_v21, %v6686_v33  ;;  %3312 = vmax.xlane.f32.xlu0 %v6693_v47 }
 0x211   :  { %v1810_v44 = vadd.f32 %v1778_v13, %v1584_v15  ;;  %v2682_v14 = vmul.f32 %v4328_v0, %v2550_v6  ;;  %v1165_v31 = vrot.slane %v7537_v39, 1  ;;  %v2841_v7 = vsel %vm460_vm8, %v2808_v50, 0.0 }
 0x212   :  { %v3176_v23 = vmul.f32 0.125, %v3144_v46  ;;  %v1133_v26 = vadd.f32 %v6083_v56, %v1098_v37  ;;  %v1391_v40 = vrot.slane %v7537_v39, 2  ;;  %v6709_v9 = vadd.f32 %v2841_v7, %v2745_v27 }
 0x213   :  { %v2036_v49 = vadd.f32 %v6590_v1, %v1810_v44  ;;  %v1193_v21 = vsel %vm1179_vm1, %v1164_v38, %v1165_v31  ;;  %v1617_v13 = vrot.slane %v7537_v39, 3  ;;  %v1843_v46 = vrot.slane %v7537_v39, 4 }
 0x214   :  { %v1327_v15 = vmul.f32 %v4250_v24, %v1193_v21  ;;  %v1419_v6 = vsel %vm1405_vm2, %v1390_v36, %v1391_v40  ;;  %v7363_v37 = vrot.slane %v7537_v39, 5  ;;  %3303 = vmatmul.f32.gmra.mxu3 %v3175_v59  ;;  %v7538_v21 = vrot.slane %v5255_v60, 4 }
 0x215   :  { %v2262_v27 = vadd.f32 %v2230_v53, %v2036_v49  ;;  %v1553_v1 = vmul.f32 %v4268_v32, %v1419_v6  ;;  %v1645_v38 = vsel %vm1631_vm3, %v1616_v58, %v1617_v13  ;;  %v7539_v59 = vrot.slane %v6709_v9, 6  ;;  %v3220_v6 = vpop.f32.mrf.mxu2 }
 0x216   :  { %v1359_v44 = vadd.f32 %v1327_v15, %v1133_v26  ;;  %v1779_v7 = vmul.f32 %v4288_v41, %v1645_v38  ;;  %v1871_v36 = vsel %vm1857_vm4, %v7538_v21, %v1843_v46  ;;  %v2097_v50 = vsel %vm2083_vm5, %v2068_v28, %v7363_v37 }
 0x217   :  { %v7540_v53 = vrot.slane %v6582_v55, 6  ;;  %v2488_v26 = vadd.f32 %v2456_v11, %v2262_v27  ;;  %v2005_v49 = vmul.f32 %v4294_v45, %v1871_v36  ;;  %v2231_v15 = vmul.f32 %v4302_v48, %v2097_v50 }
 0x218   :  { %v1585_v21 = vadd.f32 %v1553_v1, %v1359_v44  ;;  %v2295_v60 = vrot.slane %v7537_v39, 6  ;;  %v2521_v28 = vrot.slane %v7537_v39, 7  ;;  %v1099_v11 = vmul.f32 %v4246_v22, %v5368_v57 }
 0x219   :  { %v2936_v58 = vsel %vm2309_vm6, %v7540_v53, %v7539_v59  ;;  %v2714_v55 = vadd.f32 %v2682_v14, %v2488_v26  ;;  %v6749_v59 = vadd.f32 %v6606_v18, %v3220_v6  ;;  %v1166_v44 = vrot.slane %v5368_v57, 1 }
 0x21a   :  { %v2969_v38 = vsel %vm492_vm0, %v2936_v58, 0.0  ;;  %v1811_v50 = vadd.f32 %v1779_v7, %v1585_v21  ;;  %v2323_v27 = vsel %vm2309_vm6, %v2294_v34, %v2295_v60  ;;  %v2549_v1 = vsel %vm2535_vm7, %v2520_v12, %v2521_v28 }
 0x21b   :  { %v6746_v37 = vadd.f32 %v2969_v38, %v6709_v9  ;;  %v2746_v53 = vmax.f32 %v2714_v55, 0.0  ;;  %v2457_v14 = vmul.f32 %v4308_v52, %v2323_v27  ;;  %v2683_v58 = vmul.f32 %v4328_v0, %v2549_v1  ;;  %3314 = vmax.xlane.f32.xlu1 %v6749_v59 }
 0x21c   :  { %v2037_v26 = vadd.f32 %v2005_v49, %v1811_v50  ;;  %v1134_v7 = vadd.f32 %v6083_v56, %v1099_v11  ;;  %v1192_v34 = vsel %vm1179_vm1, %v1165_v31, %v1166_v44  ;;  %v1392_v6 = vrot.slane %v5368_v57, 2  ;;  %3306 = vmatmul.f32.gmra.mxu3 %v3176_v23 }
 0x21d   :  { %v3033_v36 = vrot.slane %v6746_v37, 4  ;;  %v7541_v12 = vrot.slane %v6617_v3, 4  ;;  %v2778_v21 = vrot.slane %v2746_v53, 7  ;;  %v1328_v55 = vmul.f32 %v4250_v24, %v1192_v34 }
 0x21e   :  { %v1618_v27 = vrot.slane %v5368_v57, 3  ;;  %v2263_v11 = vadd.f32 %v2231_v15, %v2037_v26  ;;  %v1418_v31 = vsel %vm1405_vm2, %v1391_v40, %v1392_v6  ;;  %v1844_v50 = vrot.slane %v5368_v57, 4  ;;  %v3223_v40 = vpop.f32.mrf.mxu2 }
 0x21f   :  { %v3064_v38 = vsel %vm1857_vm4, %v7541_v12, %v3033_v36  ;;  %v2807_v1 = vsel %vm2535_vm7, %v6686_v33, %v2778_v21  ;;  %v1360_v23 = vadd.f32 %v1328_v55, %v1134_v7  ;;  %v1554_v34 = vmul.f32 %v4268_v32, %v1418_v31 }
 0x220   :  { %v3097_v49 = vsel %vm556_vm13, %v3064_v38, 0.0  ;;  %v2874_v12 = vadd.f32 %v2807_v1, %v2746_v53  ;;  %v2489_v62 = vadd.f32 %v2457_v14, %v2263_v11  ;;  %v1644_v54 = vsel %vm1631_vm3, %v1617_v13, %v1618_v27 }
 0x221   :  { %v3129_v3 = vadd.f32 %v3097_v49, %v6746_v37  ;;  %v1870_v15 = vsel %vm1857_vm4, %v1843_v46, %v1844_v50  ;;  %v1586_v38 = vadd.f32 %v1554_v34, %v1360_v23  ;;  %v1780_v37 = vmul.f32 %v4288_v41, %v1644_v54 }
 0x222   :  { %v2006_v49 = vmul.f32 %v4294_v45, %v1870_v15  ;;  %v2906_v5 = vrot.slane %v2874_v12, 6  ;;  %v2715_v33 = vadd.f32 %v2683_v58, %v2489_v62  ;;  %v2070_v7 = vrot.slane %v5368_v57, 5 }
 0x223   :  { %v3161_v26 = vmul.f32 0.125, %v3129_v3  ;;  %v2296_v53 = vrot.slane %v5368_v57, 6  ;;  %v1812_v14 = vadd.f32 %v1780_v37, %v1586_v38  ;;  %v2522_v13 = vrot.slane %v5368_v57, 7 }
 0x224   :  { %v6792_v55 = vadd.f32 %v6606_v18, %v3223_v40  ;;  %v1100_v46 = vmul.f32 %v4246_v22, %v5503_v20  ;;  %v7542_v11 = vrot.slane %v6709_v9, 6  ;;  %v2747_v62 = vmax.f32 %v2715_v33, 0.0 }
 0x225   :  { %3261 = vmatmul.f32.gmra.mxu2 %v3161_v26  ;;  %v7543_v58 = vrot.slane %v7537_v39, 5  ;;  %v2322_v1 = vsel %vm2309_vm6, %v2295_v60, %v2296_v53  ;;  %v2038_v34 = vadd.f32 %v2006_v49, %v1812_v14  ;;  %v2548_v9 = vsel %vm2535_vm7, %v2521_v28, %v2522_v13 }
 0x226   :  { %v2935_v31 = vsel %vm2309_vm6, %v7542_v11, %v2906_v5  ;;  %3316 = vmax.xlane.f32.xlu1 %v6792_v55  ;;  %v2779_v22 = vrot.slane %v2747_v62, 7  ;;  %v1135_v15 = vadd.f32 %v6083_v56, %v1100_v46  ;;  %v7544_v40 = vrot.slane %v5503_v20, 1 }
 0x227   :  { %v2096_v3 = vsel %vm2083_vm5, %v7543_v58, %v2070_v7  ;;  %v3002_v23 = vadd.f32 %v2935_v31, %v2874_v12  ;;  %v2458_v60 = vmul.f32 %v4308_v52, %v2322_v1  ;;  %v2684_v33 = vmul.f32 %v4328_v0, %v2548_v9 }
 0x228   :  { %v2232_v54 = vmul.f32 %v4302_v48, %v2096_v3  ;;  %v1191_v26 = vsel %vm1179_vm1, %v1166_v44, %v7544_v40  ;;  %v2806_v49 = vsel %vm2535_vm7, %v2778_v21, %v2779_v22  ;;  %v7545_v28 = vrot.slane %v5503_v20, 2 }
 0x229   :  { %v3034_v38 = vrot.slane %v3002_v23, 4  ;;  %v1329_v12 = vmul.f32 %v4250_v24, %v1191_v26  ;;  %v7546_v14 = vrot.slane %v5503_v20, 3  ;;  %v2875_v11 = vadd.f32 %v2806_v49, %v2747_v62 }
 0x22a   :  { %v2264_v37 = vadd.f32 %v2232_v54, %v2038_v34  ;;  %v1417_v56 = vsel %vm1405_vm2, %v1392_v6, %v7545_v28  ;;  %v7547_v34 = vrot.slane %v5503_v20, 4  ;;  %v3226_v54 = vpop.f32.mrf.mxu2  ;;  %v7550_v28 = vrot.slane %v5503_v20, 7 }
 0x22b   :  { %v1643_v44 = vsel %vm1631_vm3, %v1618_v27, %v7546_v14  ;;  %v3063_v46 = vsel %vm1857_vm4, %v3033_v36, %v3034_v38  ;;  %v1361_v31 = vadd.f32 %v1329_v12, %v1135_v15  ;;  %v1555_v21 = vmul.f32 %v4268_v32, %v1417_v56 }
 0x22c   :  { %v2490_v24 = vadd.f32 %v2458_v60, %v2264_v37  ;;  %v3130_v58 = vadd.f32 %v3063_v46, %v3002_v23  ;;  %v2907_v3 = vrot.slane %v2875_v11, 6  ;;  %v1869_v6 = vsel %vm1857_vm4, %v1844_v50, %v7547_v34 }
 0x22d   :  { %v1587_v40 = vadd.f32 %v1555_v21, %v1361_v31  ;;  %v1781_v27 = vmul.f32 %v4288_v41, %v1643_v44  ;;  %v7548_v23 = vrot.slane %v5503_v20, 5  ;;  %v6843_v15 = vadd.f32 %v6606_v18, %v3226_v54 }
 0x22e   :  { %v2716_v1 = vadd.f32 %v2684_v33, %v2490_v24  ;;  %v3162_v9 = vmul.f32 0.125, %v3130_v58  ;;  %v2934_v36 = vsel %vm2309_vm6, %v2906_v5, %v2907_v3  ;;  %v2007_v37 = vmul.f32 %v4294_v45, %v1869_v6 }
 0x22f   :  { %v2095_v32 = vsel %vm2083_vm5, %v2070_v7, %v7548_v23  ;;  %v3003_v26 = vadd.f32 %v2934_v36, %v2875_v11  ;;  %v1813_v50 = vadd.f32 %v1781_v27, %v1587_v40  ;;  %v7549_v41 = vrot.slane %v5503_v20, 6  ;;  %3318 = vmax.xlane.f32.xlu2 %v6843_v15 }
 0x230   :  { %v2748_v62 = vmax.f32 %v2716_v1, 0.0  ;;  %3264 = vmatmul.f32.gmra.mxu2 %v3162_v9  ;;  %v2233_v7 = vmul.f32 %v4302_v48, %v2095_v32  ;;  %v2547_v45 = vsel %vm2535_vm7, %v2522_v13, %v7550_v28  ;;  %v7551_v36 = vmax.f32 %v5857_v63, 0.0 }
 0x231   :  { %v2321_v5 = vsel %vm2309_vm6, %v2296_v53, %v7549_v41  ;;  %v3035_v12 = vrot.slane %v3003_v26, 4  ;;  %v2039_v49 = vadd.f32 %v2007_v37, %v1813_v50  ;;  %v2685_v48 = vmul.f32 %v4328_v0, %v2547_v45 }
 0x232   :  { %v2780_v60 = vrot.slane %v2748_v62, 7  ;;  %v2459_v53 = vmul.f32 %v4308_v52, %v2321_v5  ;;  %v3229_v11 = vpop.f32.mrf.mxu2 }
 0x233   :  { %v3062_v56 = vsel %vm1857_vm4, %v3034_v38, %v3035_v12  ;;  %v2265_v44 = vadd.f32 %v2233_v7, %v2039_v49 }
 0x234   :  { %v2805_v33 = vsel %vm2535_vm7, %v2779_v22, %v2780_v60  ;;  %v3131_v46 = vadd.f32 %v3062_v56, %v3003_v26  ;;  %v6863_v22 = vadd.f32 %v6606_v18, %v3229_v11 }
 0x235   :  { %v2876_v14 = vadd.f32 %v2805_v33, %v2748_v62  ;;  %v2491_v31 = vadd.f32 %v2459_v53, %v2265_v44  ;;  %v7552_v33 = vrot.slane %v5911_v16, 6 }
 0x236   :  { %v3163_v58 = vmul.f32 0.125, %v3131_v46 }
 0x237   :  { %v2908_v24 = vrot.slane %v2876_v14, 6  ;;  %v2717_v21 = vadd.f32 %v2685_v48, %v2491_v31  ;;  %3320 = vmax.xlane.f32.xlu2 %v6863_v22 }
 0x238   :  { %3267 = vmatmul.f32.gmra.mxu2 %v3163_v58  ;;  %v3286_v58 = vpop.f32.mrf.mxu3 }
 0x239   :  { %v2933_v13 = vsel %vm2309_vm6, %v2907_v3, %v2908_v24  ;;  %v2749_v1 = vmax.f32 %v2717_v21, 0.0 }
 0x23a   :  { %v3004_v38 = vadd.f32 %v2933_v13, %v2876_v14  ;;  %v3232_v54 = vpop.f32.mrf.mxu2 }
 0x23b   :  { %v2781_v34 = vrot.slane %v2749_v1, 7  ;;  %v6876_v40 = vadd.f32 %v6606_v18, %v3232_v54 }
 0x23c   :  { %v3036_v52 = vrot.slane %v3004_v38, 4 }
 0x23d   :  { %v2804_v9 = vsel %vm2535_vm7, %v2780_v60, %v2781_v34  ;;  %v2803_v3 = vsel %vm2535_vm7, %v2781_v34, %v5880_v42  ;;  %3322 = vmax.xlane.f32.xlu0 %v6876_v40 }
 0x23e   :  { %v3061_v6 = vsel %vm1857_vm4, %v3035_v12, %v3036_v52  ;;  %v2877_v27 = vadd.f32 %v2804_v9, %v2749_v1  ;;  %v2878_v62 = vadd.f32 %v2803_v3, %v7551_v36 }
 0x23f   :  { %v3132_v0 = vadd.f32 %v3061_v6, %v3004_v38  ;;  %v7553_v38 = vrot.slane %v5942_v61, 4 }
 0x240   :  { %v2909_v32 = vrot.slane %v2877_v27, 6  ;;  %v2910_v26 = vrot.slane %v2878_v62, 6 }
 0x241   :  { %v3164_v23 = vmul.f32 0.125, %v3132_v0 }
 0x242   :  { %v2932_v50 = vsel %vm2309_vm6, %v2908_v24, %v2909_v32  ;;  %v2931_v37 = vsel %vm2309_vm6, %v2909_v32, %v2910_v26  ;;  %v3235_v41 = vpop.f32.mrf.mxu2  ;;  %v2930_v28 = vsel %vm2309_vm6, %v2910_v26, %v7552_v33  ;;  %v3289_v0 = vpop.f32.mrf.mxu3 }
 0x243   :  { %3270 = vmatmul.f32.gmra.mxu2 %v3164_v23  ;;  %v3005_v42 = vadd.f32 %v2932_v50, %v2877_v27  ;;  %v3006_v60 = vadd.f32 %v2931_v37, %v2878_v62  ;;  %v6886_v12 = vadd.f32 %v6606_v18, %v3235_v41  ;;  %v3007_v14 = vadd.f32 %v2930_v28, %v5911_v16 }
 0x244   :  { %v6922_v3 = vadd.f32 %v6606_v18, %v3289_v0 }
 0x245   :  { %v3037_v5 = vrot.slane %v3005_v42, 4  ;;  %v3038_v49 = vrot.slane %v3006_v60, 4  ;;  %3324 = vmax.xlane.f32.xlu1 %v6886_v12  ;;  %v3039_v11 = vrot.slane %v3007_v14, 4 }
 0x247   :  { %v3060_v63 = vsel %vm1857_vm4, %v3036_v52, %v3037_v5  ;;  %v3059_v56 = vsel %vm1857_vm4, %v3037_v5, %v3038_v49  ;;  %v3058_v31 = vsel %vm1857_vm4, %v3038_v49, %v3039_v11  ;;  %v3057_v1 = vsel %vm1857_vm4, %v3039_v11, %v7553_v38 }
 0x248   :  { %v3133_v7 = vadd.f32 %v3060_v63, %v3005_v42  ;;  %v3134_v46 = vadd.f32 %v3059_v56, %v3006_v60  ;;  %v3135_v16 = vadd.f32 %v3058_v31, %v3007_v14  ;;  %v6913_v52 = vadd.f32 %v6606_v18, %v3286_v58 }
 0x249   :  { %v3136_v54 = vadd.f32 %v3057_v1, %v5942_v61 }
 0x24a   :  { %v3165_v45 = vmul.f32 0.125, %v3133_v7  ;;  %v3238_v44 = vpop.f32.mrf.mxu2  ;;  %v3166_v24 = vmul.f32 0.125, %v3134_v46  ;;  %v3167_v21 = vmul.f32 0.125, %v3135_v16 }
 0x24b   :  { %v6899_v53 = vadd.f32 %v6606_v18, %v3238_v44  ;;  %v3168_v9 = vmul.f32 0.125, %v3136_v54 }
 0x24c   :  { %3273 = vmatmul.f32.gmra.mxu2 %v3165_v45 }
 0x24d   :  { %3326 = vmax.xlane.f32.xlu2 %v6899_v53 }
 0x252   :  { %v3241_v48 = vpop.f32.mrf.mxu2 }
 0x253   :  { %v6905_v13 = vadd.f32 %v6606_v18, %v3241_v48  ;;  %v3292_v36 = vpop.f32.mrf.mxu3 }
 0x254   :  { %3276 = vmatmul.f32.gmra.mxu2 %v3166_v24  ;;  %v6930_v61 = vadd.f32 %v6606_v18, %v3292_v36 }
 0x255   :  { %3328 = vmax.xlane.f32.xlu0 %v6905_v13 }
 0x25a   :  { %v3244_v34 = vpop.f32.mrf.mxu2 }
 0x25b   :  { %v6916_v6 = vadd.f32 %v6606_v18, %v3244_v34 }
 0x25c   :  { %3279 = vmatmul.f32.gmra.mxu2 %v3167_v21 }
 0x25d   :  { %3330 = vmax.xlane.f32.xlu1 %v6916_v6  ;;  %3358 = vmax.xlane.f32.xlu0 %v6913_v52 }
 0x262   :  { %v3247_v19 = vpop.f32.mrf.mxu2 }
 0x263   :  { %v6925_v27 = vadd.f32 %v6606_v18, %v3247_v19 }
 0x264   :  { %3282 = vmatmul.f32.gmra.mxu2 %v3168_v9 }
 0x265   :  { %3332 = vmax.xlane.f32.xlu2 %v6925_v27  ;;  %3360 = vmax.xlane.f32.xlu1 %v6922_v3 }
 0x26a   :  { %v3250_v62 = vpop.f32.mrf.mxu2 }
 0x26b   :  { %v6933_v23 = vadd.f32 %v6606_v18, %v3250_v62 }
 0x26d   :  { %3334 = vmax.xlane.f32.xlu0 %v6933_v23  ;;  %3362 = vmax.xlane.f32.xlu2 %v6930_v61 }
 0x270   :  { %v3295_v50 = vpop.f32.mrf.mxu3 }
 0x271   :  { %v6942_v37 = vadd.f32 %v6606_v18, %v3295_v50 }
 0x272   :  { %v3253_v32 = vpop.f32.mrf.mxu2 }
 0x273   :  { %v6938_v26 = vadd.f32 %v6606_v18, %v3253_v32 }
 0x275   :  { %3336 = vmax.xlane.f32.xlu1 %v6938_v26  ;;  %3364 = vmax.xlane.f32.xlu0 %v6942_v37 }
 0x277   :  { %v3311_v5 = vpop.xlane.xlu0 %3310 }
 0x278   :  { %v3374_v49 = vsub.f32 %v6624_v29, %v3311_v5 }
 0x27a   :  { %v3406_v7 = vmul.f32 1.442695, %v3374_v49 }
 0x27c   :  { %3784 = vpow2.f32 %v3406_v7 }
 0x27d   :  { %v3256_v42 = vpop.f32.mrf.mxu2 }
 0x27e   :  { %v6946_v60 = vadd.f32 %v6606_v18, %v3256_v42 }
 0x280   :  { %3338 = vmax.xlane.f32.xlu2 %v6946_v60 }
 0x282   :  { %v6966_v24 = vpop.eup %3784 }
 0x283   :  { %v3313_v14 = vpop.xlane.xlu0 %3312 }
 0x284   :  { %v3375_v44 = vsub.f32 %v6693_v47, %v3313_v14 }
 0x286   :  { %v3408_v11 = vmul.f32 1.442695, %v3375_v44 }
 0x287   :  { %v3298_v41 = vpop.f32.mrf.mxu3 }
 0x288   :  { %v6950_v63 = vadd.f32 %v6606_v18, %v3298_v41  ;;  %3786 = vpow2.f32 %v3408_v11 }
 0x28a   :  { %3366 = vmax.xlane.f32.xlu1 %v6950_v63 }
 0x28e   :  { %v3315_v31 = vpop.xlane.xlu1 %3314  ;;  %v6970_v48 = vpop.eup %3786 }
 0x28f   :  { %v3301_v33 = vpop.f32.mrf.mxu3  ;;  %v3376_v21 = vsub.f32 %v6749_v59, %v3315_v31 }
 0x290   :  { %v3259_v28 = vpop.f32.mrf.mxu2  ;;  %v6955_v45 = vadd.f32 %v6606_v18, %v3301_v33 }
 0x291   :  { %v6958_v56 = vadd.f32 %v6606_v18, %v3259_v28  ;;  %v3410_v54 = vmul.f32 1.442695, %v3376_v21 }
 0x292   :  { %3368 = vmax.xlane.f32.xlu2 %v6955_v45 }
 0x293   :  { %3340 = vmax.xlane.f32.xlu0 %v6958_v56  ;;  %3788 = vpow2.f32 %v3410_v54 }
 0x297   :  { %v3304_v46 = vpop.f32.mrf.mxu3 }
 0x298   :  { %v6964_v29 = vadd.f32 %v6606_v18, %v3304_v46 }
 0x299   :  { %v3317_v16 = vpop.xlane.xlu1 %3316  ;;  %v6988_v62 = vpop.eup %3788 }
 0x29a   :  { %3470 = vadd.xlane.f32.xlu2 %v6966_v24  ;;  %v3377_v1 = vsub.f32 %v6792_v55, %v3317_v16 }
 0x29b   :  { %3370 = vmax.xlane.f32.xlu0 %v6964_v29 }
 0x29c   :  { %v3412_v0 = vmul.f32 1.442695, %v3377_v1 }
 0x29e   :  { %3790 = vpow2.f32 %v3412_v0 }
 0x29f   :  { %v3307_v38 = vpop.f32.mrf.mxu3 }
 0x2a0   :  { %v6980_v34 = vadd.f32 %v6606_v18, %v3307_v38 }
 0x2a2   :  { %v3319_v9 = vpop.xlane.xlu2 %3318 }
 0x2a3   :  { %3472 = vadd.xlane.f32.xlu0 %v6970_v48  ;;  %v3378_v59 = vsub.f32 %v6843_v15, %v3319_v9 }
 0x2a4   :  { %v6990_v32 = vpop.eup %3790 }
 0x2a5   :  { %v3414_v55 = vmul.f32 1.442695, %v3378_v59 }
 0x2a7   :  { %3792 = vpow2.f32 %v3414_v55 }
 0x2a8   :  { %v3262_v58 = vpop.f32.mrf.mxu2 }
 0x2a9   :  { %v6974_v47 = vadd.f32 %v6606_v18, %v3262_v58 }
 0x2aa   :  { %v3321_v42 = vpop.xlane.xlu2 %3320 }
 0x2ab   :  { %3342 = vmax.xlane.f32.xlu1 %v6974_v47  ;;  %v3379_v5 = vsub.f32 %v6863_v22, %v3321_v42 }
 0x2ad   :  { %v3416_v15 = vmul.f32 1.442695, %v3379_v5  ;;  %v6999_v49 = vpop.eup %3792 }
 0x2af   :  { %3794 = vpow2.f32 %v3416_v15 }
 0x2b0   :  { %v3323_v28 = vpop.xlane.xlu0 %3322 }
 0x2b1   :  { %v3380_v14 = vsub.f32 %v6876_v40, %v3323_v28 }
 0x2b3   :  { %v3265_v19 = vpop.f32.mrf.mxu2  ;;  %3372 = vmax.xlane.f32.xlu1 %v6980_v34  ;;  %v3418_v46 = vmul.f32 1.442695, %v3380_v14 }
 0x2b4   :  { %v6984_v36 = vadd.f32 %v6606_v18, %v3265_v19 }
 0x2b5   :  { %v7007_v44 = vpop.eup %3794  ;;  %3796 = vpow2.f32 %v3418_v46 }
 0x2b6   :  { %3344 = vmax.xlane.f32.xlu2 %v6984_v36 }
 0x2b8   :  { %v3325_v11 = vpop.xlane.xlu1 %3324 }
 0x2b9   :  { %v3381_v58 = vsub.f32 %v6886_v12, %v3325_v11 }
 0x2bb   :  { %3474 = vadd.xlane.f32.xlu1 %v6988_v62  ;;  %v3268_v50 = vpop.f32.mrf.mxu2  ;;  %v3420_v16 = vmul.f32 1.442695, %v3381_v58  ;;  %v7015_v38 = vpop.eup %3796 }
 0x2bc   :  { %v6994_v41 = vadd.f32 %v6606_v18, %v3268_v50 }
 0x2bd   :  { %3798 = vpow2.f32 %v3420_v16 }
 0x2be   :  { %3476 = vadd.xlane.f32.xlu2 %v6990_v32  ;;  %3346 = vmax.xlane.f32.xlu0 %v6994_v41 }
 0x2c0   :  { %v3327_v21 = vpop.xlane.xlu2 %3326 }
 0x2c1   :  { %v3382_v0 = vsub.f32 %v6899_v53, %v3327_v21 }
 0x2c3   :  { %v3422_v9 = vmul.f32 1.442695, %v3382_v0  ;;  %v7024_v50 = vpop.eup %3798 }
 0x2c5   :  { %3800 = vpow2.f32 %v3422_v9 }
 0x2c6   :  { %v3271_v7 = vpop.f32.mrf.mxu2  ;;  %3478 = vadd.xlane.f32.xlu0 %v6999_v49 }
 0x2c7   :  { %v7002_v33 = vadd.f32 %v6606_v18, %v3271_v7 }
 0x2c8   :  { %v3329_v19 = vpop.xlane.xlu0 %3328 }
 0x2c9   :  { %3348 = vmax.xlane.f32.xlu1 %v7002_v33  ;;  %v3383_v7 = vsub.f32 %v6905_v13, %v3329_v19 }
 0x2cb   :  { %v3424_v28 = vmul.f32 1.442695, %v3383_v7  ;;  %v7034_v58 = vpop.eup %3800 }
 0x2cf   :  { %v3274_v22 = vpop.f32.mrf.mxu2 }
 0x2d0   :  { %v7011_v31 = vadd.f32 %v6606_v18, %v3274_v22  ;;  %v3331_v1 = vpop.xlane.xlu1 %3330  ;;  %v3359_v14 = vpop.xlane.xlu0 %3358 }
 0x2d1   :  { %3480 = vadd.xlane.f32.xlu1 %v7007_v44  ;;  %v3384_v12 = vsub.f32 %v6916_v6, %v3331_v1 }
 0x2d2   :  { %3350 = vmax.xlane.f32.xlu2 %v7011_v31 }
 0x2d3   :  { %v3426_v59 = vmul.f32 1.442695, %v3384_v12 }
 0x2d5   :  { %3802 = vpow2.f32 %v3426_v59 }
 0x2d6   :  { %3804 = vpow2.f32 %v3424_v28 }
 0x2d7   :  { %v3277_v40 = vpop.f32.mrf.mxu2 }
 0x2d8   :  { %v7018_v54 = vadd.f32 %v6606_v18, %v3277_v40  ;;  %v3333_v55 = vpop.xlane.xlu2 %3332  ;;  %v3361_v5 = vpop.xlane.xlu1 %3360 }
 0x2d9   :  { %v3385_v53 = vsub.f32 %v6925_v27, %v3333_v55  ;;  %v3399_v6 = vsub.f32 %v6922_v3, %v3361_v5  ;;  %v3398_v27 = vsub.f32 %v6913_v52, %v3359_v14 }
 0x2da   :  { %3352 = vmax.xlane.f32.xlu0 %v7018_v54  ;;  %3482 = vadd.xlane.f32.xlu2 %v7015_v38 }
 0x2db   :  { %v3428_v46 = vmul.f32 1.442695, %v3385_v53  ;;  %v3456_v11 = vmul.f32 1.442695, %v3399_v6  ;;  %v7036_v21 = vpop.eup %3802  ;;  %v3454_v0 = vmul.f32 1.442695, %v3398_v27 }
 0x2dd   :  { %3806 = vpow2.f32 %v3428_v46 }
 0x2de   :  { %3808 = vpow2.f32 %v3456_v11 }
 0x2df   :  { %v3280_v42 = vpop.f32.mrf.mxu2  ;;  %3810 = vpow2.f32 %v3454_v0 }
 0x2e0   :  { %v7027_v15 = vadd.f32 %v6606_v18, %v3280_v42  ;;  %v3363_v22 = vpop.xlane.xlu2 %3362  ;;  %v3335_v9 = vpop.xlane.xlu0 %3334 }
 0x2e1   :  { %v3400_v40 = vsub.f32 %v6930_v61, %v3363_v22  ;;  %v3386_v61 = vsub.f32 %v6933_v23, %v3335_v9 }
 0x2e2   :  { %3354 = vmax.xlane.f32.xlu1 %v7027_v15  ;;  %3484 = vadd.xlane.f32.xlu0 %v7024_v50 }
 0x2e3   :  { %v3458_v12 = vmul.f32 1.442695, %v3400_v40 }
 0x2e5   :  { %3812 = vpow2.f32 %v3458_v12 }
 0x2e7   :  { %v3283_v16 = vpop.f32.mrf.mxu2 }
 0x2e8   :  { %v7039_v13 = vadd.f32 %v6606_v18, %v3283_v16  ;;  %v3337_v3 = vpop.xlane.xlu1 %3336  ;;  %v7047_v18 = vpop.eup %3804 }
 0x2e9   :  { %v3387_v1 = vsub.f32 %v6938_v26, %v3337_v3  ;;  %v7049_v52 = vpop.eup %3806  ;;  %v3430_v26 = vmul.f32 1.442695, %v3386_v61  ;;  %v3365_v42 = vpop.xlane.xlu0 %3364  ;;  %v7554_v61 = vld [vmem:[#allocation5_spill] sm:$0xff] }
 0x2ea   :  { %3356 = vmax.xlane.f32.xlu2 %v7039_v13  ;;  %3486 = vadd.xlane.f32.xlu1 %v7034_v58  ;;  %v7051_v59 = vpop.eup %3808  ;;  %v3401_v23 = vsub.f32 %v6942_v37, %v3365_v42 }
 0x2eb   :  { %3490 = vadd.xlane.f32.xlu0 %v7036_v21  ;;  %v3432_v19 = vmul.f32 1.442695, %v3387_v1  ;;  %v7057_v55 = vpop.eup %3810 }
 0x2ec   :  { %v7059_v7 = vpop.eup %3812  ;;  %v3460_v14 = vmul.f32 1.442695, %v3401_v23 }
 0x2ed   :  { %3814 = vpow2.f32 %v3432_v19 }
 0x2ee   :  { %3816 = vpow2.f32 %v3430_v26  ;;  %v3598_v26 = vmax.f32 %v7554_v61, 0.0 }
 0x2f2   :  { %3488 = vadd.xlane.f32.xlu2 %v7047_v18  ;;  %3492 = vadd.xlane.f32.xlu1 %v7049_v52 }
 0x2f3   :  { %3520 = vadd.xlane.f32.xlu0 %v7051_v59  ;;  %v3339_v5 = vpop.xlane.xlu2 %3338  ;;  %v7062_v6 = vpop.eup %3814 }
 0x2f4   :  { %v3388_v53 = vsub.f32 %v6946_v60, %v3339_v5  ;;  %v7068_v46 = vpop.eup %3816 }
 0x2f6   :  { %v3434_v28 = vmul.f32 1.442695, %v3388_v53 }
 0x2f8   :  { %3818 = vpow2.f32 %v3434_v28 }
 0x2f9   :  { %3820 = vpow2.f32 %v3460_v14 }
 0x2fa   :  { %3518 = vadd.xlane.f32.xlu2 %v7057_v55  ;;  %3522 = vadd.xlane.f32.xlu1 %v7059_v7 }
 0x2fb   :  { %3496 = vadd.xlane.f32.xlu0 %v7062_v6 }
 0x2fd   :  { %v3367_v11 = vpop.xlane.xlu1 %3366 }
 0x2fe   :  { %v3402_v22 = vsub.f32 %v6950_v63, %v3367_v11  ;;  %v7071_v60 = vpop.eup %3818  ;;  %v7555_v11 = vld [vmem:[#allocation6_spill] sm:$0xff] }
 0x2ff   :  { %v7075_v16 = vpop.eup %3820 }
 0x300   :  { %v3462_v37 = vmul.f32 1.442695, %v3402_v22  ;;  %v3599_v22 = vmax.f32 %v7555_v11, 0.0  ;;  %v7557_v11 = vld [vmem:[#allocation8_spill] sm:$0xff] }
 0x302   :  { %3494 = vadd.xlane.f32.xlu2 %v7068_v46  ;;  %3498 = vadd.xlane.f32.xlu1 %v7071_v60  ;;  %3822 = vpow2.f32 %v3462_v37 }
 0x305   :  { %v7077_v27 = vpop.xlane.xlu2 %3368 }
 0x306   :  { %v3341_v40 = vpop.xlane.xlu0 %3340 }
 0x307   :  { %v3389_v3 = vsub.f32 %v6958_v56, %v3341_v40 }
 0x308   :  { %v7080_v1 = vpop.eup %3822 }
 0x309   :  { %v3436_v63 = vmul.f32 1.442695, %v3389_v3  ;;  %3526 = vadd.xlane.f32.xlu0 %v7080_v1 }
 0x30a   :  { %3524 = vadd.xlane.f32.xlu2 %v7075_v16 }
 0x30b   :  { %3824 = vpow2.f32 %v3436_v63 }
 0x30d   :  { %v3471_v0 = vpop.xlane.xlu2 %3470 }
 0x30e   :  { %v7084_v12 = vpop.xlane.xlu0 %3370  ;;  %3826 = vrcp.f32 %v3471_v0 }
 0x311   :  { %v7086_v9 = vpop.eup %3824 }
 0x312   :  { %3500 = vadd.xlane.f32.xlu2 %v7086_v9 }
 0x314   :  { %v3827_v19 = vpop.eup %3826 }
 0x315   :  { %v3566_v56 = vmul.f32 %v3827_v19, %v6966_v24 }
 0x316   :  { %v3473_v42 = vpop.xlane.xlu0 %3472 }
 0x317   :  { %v3630_v5 = vmul.f32 %v3598_v26, %v3566_v56  ;;  %3828 = vrcp.f32 %v3473_v42 }
 0x319   :  { %3662 = vst [vmem:[#allocation2] sm:$0xff] %v3630_v5 }
 0x31d   :  { %v3829_v28 = vpop.eup %3828 }
 0x31e   :  { %v3343_v53 = vpop.xlane.xlu1 %3342  ;;  %v3567_v37 = vmul.f32 %v3829_v28, %v6970_v48 }
 0x31f   :  { %v3390_v23 = vsub.f32 %v6974_v47, %v3343_v53  ;;  %v7556_v53 = vld [vmem:[#allocation7_spill] sm:$0xff] }
 0x320   :  { %v3631_v40 = vmul.f32 %v3599_v22, %v3567_v37  ;;  %v3601_v22 = vmax.f32 %v7557_v11, 0.0 }
 0x321   :  { %v3438_v14 = vmul.f32 1.442695, %v3390_v23  ;;  %v3600_v23 = vmax.f32 %v7556_v53, 0.0 }
 0x322   :  { %3663 = vst [vmem:[#allocation2 + $0x8] sm:$0xff] %v3631_v40 }
 0x323   :  { %3830 = vpow2.f32 %v3438_v14 }
 0x326   :  { %v7094_v3 = vpop.xlane.xlu1 %3372 }
 0x329   :  { %v7096_v63 = vpop.eup %3830  ;;  %v3345_v24 = vpop.xlane.xlu2 %3344 }
 0x32a   :  { %3502 = vadd.xlane.f32.xlu0 %v7096_v63  ;;  %v3391_v0 = vsub.f32 %v6984_v36, %v3345_v24 }
 0x32c   :  { %v3440_v19 = vmul.f32 1.442695, %v3391_v0 }
 0x32e   :  { %3832 = vpow2.f32 %v3440_v19  ;;  %v3475_v47 = vpop.xlane.xlu1 %3474 }
 0x32f   :  { %3834 = vrcp.f32 %v3475_v47 }
 0x331   :  { %v3477_v61 = vpop.xlane.xlu2 %3476  ;;  %v3347_v26 = vpop.xlane.xlu0 %3346 }
 0x332   :  { %3836 = vrcp.f32 %v3477_v61  ;;  %v3392_v48 = vsub.f32 %v6994_v41, %v3347_v26  ;;  %v7558_v61 = vld [vmem:[#allocation9_spill] sm:$0xff] }
 0x333   :  { %v3602_v26 = vmax.f32 %v7558_v61, 0.0 }
 0x334   :  { %v7101_v56 = vpop.eup %3832  ;;  %v3442_v5 = vmul.f32 1.442695, %v3392_v48 }
 0x335   :  { %v3835_v42 = vpop.eup %3834  ;;  %3504 = vadd.xlane.f32.xlu1 %v7101_v56 }
 0x336   :  { %v3568_v28 = vmul.f32 %v3835_v42, %v6988_v62  ;;  %3838 = vpow2.f32 %v3442_v5 }
 0x338   :  { %v3837_v36 = vpop.eup %3836  ;;  %v3632_v14 = vmul.f32 %v3600_v23, %v3568_v28 }
 0x339   :  { %v3569_v37 = vmul.f32 %v3837_v36, %v6990_v32  ;;  %v3479_v40 = vpop.xlane.xlu0 %3478  ;;  %v7559_v36 = vld [vmem:[#allocation10_spill] sm:$0xff] }
 0x33a   :  { %3664 = vst [vmem:[#allocation2 + $0x10] sm:$0xff] %v3632_v14  ;;  %3840 = vrcp.f32 %v3479_v40  ;;  %v3603_v14 = vmax.f32 %v7559_v36, 0.0 }
 0x33b   :  { %v3633_v41 = vmul.f32 %v3601_v22, %v3569_v37 }
 0x33c   :  { %v3349_v24 = vpop.xlane.xlu1 %3348  ;;  %v7109_v19 = vpop.eup %3838 }
 0x33d   :  { %v3393_v0 = vsub.f32 %v7002_v33, %v3349_v24  ;;  %3665 = vst [vmem:[#allocation2 + $0x18] sm:$0xff] %v3633_v41  ;;  %3506 = vadd.xlane.f32.xlu2 %v7109_v19 }
 0x33f   :  { %v3444_v47 = vmul.f32 1.442695, %v3393_v0 }
 0x340   :  { %v3841_v62 = vpop.eup %3840 }
 0x341   :  { %3842 = vpow2.f32 %v3444_v47  ;;  %v3570_v48 = vmul.f32 %v3841_v62, %v6999_v49  ;;  %v7560_v62 = vld [vmem:[#allocation11_spill] sm:$0xff] }
 0x343   :  { %v3634_v42 = vmul.f32 %v3602_v26, %v3570_v48 }
 0x344   :  { %v3481_v32 = vpop.xlane.xlu1 %3480 }
 0x345   :  { %3844 = vrcp.f32 %v3481_v32  ;;  %3666 = vst [vmem:[#allocation2 + $0x20] sm:$0xff] %v3634_v42  ;;  %v3351_v53 = vpop.xlane.xlu2 %3350 }
 0x346   :  { %v3394_v33 = vsub.f32 %v7011_v31, %v3351_v53  ;;  %v3404_v31 = vsub.f32 %v6964_v29, %v7084_v12  ;;  %v3405_v29 = vsub.f32 %v6980_v34, %v7094_v3 }
 0x347   :  { %v7114_v5 = vpop.eup %3842 }
 0x348   :  { %3508 = vadd.xlane.f32.xlu0 %v7114_v5  ;;  %v3446_v23 = vmul.f32 1.442695, %v3394_v33  ;;  %v3466_v47 = vmul.f32 1.442695, %v3404_v31  ;;  %v3468_v33 = vmul.f32 1.442695, %v3405_v29 }
 0x34a   :  { %3846 = vpow2.f32 %v3446_v23 }
 0x34b   :  { %v3845_v28 = vpop.eup %3844 }
 0x34c   :  { %v3571_v11 = vmul.f32 %v3845_v28, %v7007_v44  ;;  %v3604_v44 = vmax.f32 %v7560_v62, 0.0 }
 0x34d   :  { %v3353_v49 = vpop.xlane.xlu0 %3352  ;;  %v3483_v37 = vpop.xlane.xlu2 %3482 }
 0x34e   :  { %v3635_v22 = vmul.f32 %v3603_v14, %v3571_v11  ;;  %v3395_v40 = vsub.f32 %v7018_v54, %v3353_v49  ;;  %3848 = vrcp.f32 %v3483_v37 }
 0x350   :  { %3667 = vst [vmem:[#allocation2 + $0x28] sm:$0xff] %v3635_v22  ;;  %v7121_v41 = vpop.eup %3846  ;;  %v3448_v24 = vmul.f32 1.442695, %v3395_v40  ;;  %v7562_v40 = vld [vmem:[#allocation13_spill] sm:$0xff] }
 0x351   :  { %3510 = vadd.xlane.f32.xlu1 %v7121_v41 }
 0x352   :  { %3850 = vpow2.f32 %v3448_v24  ;;  %v3606_v24 = vmax.f32 %v7562_v40, 0.0  ;;  %v3611_v40 = vmax.f32 %v7473_v4, 0.0 }
 0x354   :  { %v3849_v0 = vpop.eup %3848 }
 0x355   :  { %v3572_v61 = vmul.f32 %v3849_v0, %v7015_v38  ;;  %v3355_v26 = vpop.xlane.xlu1 %3354  ;;  %v3485_v48 = vpop.xlane.xlu0 %3484  ;;  %v7561_v38 = vld [vmem:[#allocation12_spill] sm:$0xff] }
 0x356   :  { %v3396_v54 = vsub.f32 %v7027_v15, %v3355_v26  ;;  %3852 = vrcp.f32 %v3485_v48  ;;  %v3605_v23 = vmax.f32 %v7561_v38, 0.0 }
 0x357   :  { %v3636_v32 = vmul.f32 %v3604_v44, %v3572_v61  ;;  %3854 = vpow2.f32 %v3466_v47  ;;  %v3608_v44 = vmax.f32 %v7436_v30, 0.0 }
 0x358   :  { %v7129_v42 = vpop.eup %3850  ;;  %v3450_v53 = vmul.f32 1.442695, %v3396_v54 }
 0x359   :  { %3668 = vst [vmem:[#allocation2 + $0x30] sm:$0xff] %v3636_v32  ;;  %3512 = vadd.xlane.f32.xlu2 %v7129_v42 }
 0x35a   :  { %3856 = vpow2.f32 %v3450_v53 }
 0x35c   :  { %v3853_v12 = vpop.eup %3852 }
 0x35d   :  { %v3573_v28 = vmul.f32 %v3853_v12, %v7024_v50  ;;  %v3357_v15 = vpop.xlane.xlu2 %3356  ;;  %v3487_v36 = vpop.xlane.xlu1 %3486  ;;  %v3403_v50 = vsub.f32 %v6955_v45, %v7077_v27 }
 0x35e   :  { %v3397_v14 = vsub.f32 %v7039_v13, %v3357_v15  ;;  %3858 = vrcp.f32 %v3487_v36  ;;  %v3491_v11 = vpop.xlane.xlu0 %3490  ;;  %v7137_v22 = vpop.eup %3854  ;;  %v3623_v15 = vmax.f32 %v5641_v17, 0.0 }
 0x35f   :  { %v3637_v49 = vmul.f32 %v3605_v23, %v3573_v28  ;;  %3860 = vrcp.f32 %v3491_v11  ;;  %v3464_v62 = vmul.f32 1.442695, %v3403_v50  ;;  %v3624_v50 = vmax.f32 %v5645_v25, 0.0 }
 0x360   :  { %v7139_v34 = vpop.eup %3856  ;;  %v3452_v3 = vmul.f32 1.442695, %v3397_v14  ;;  %3862 = vpow2.f32 %v3468_v33  ;;  %v3609_v33 = vmax.f32 %v7442_v8, 0.0 }
 0x361   :  { %3669 = vst [vmem:[#allocation2 + $0x38] sm:$0xff] %v3637_v49  ;;  %3514 = vadd.xlane.f32.xlu0 %v7139_v34  ;;  %3530 = vadd.xlane.f32.xlu2 %v7137_v22 }
 0x362   :  { %3864 = vpow2.f32 %v3452_v3 }
 0x364   :  { %v3859_v13 = vpop.eup %3858 }
 0x365   :  { %v3861_v37 = vpop.eup %3860  ;;  %v3574_v31 = vmul.f32 %v3859_v13, %v7034_v58  ;;  %v3489_v0 = vpop.xlane.xlu2 %3488 }
 0x366   :  { %v3493_v47 = vpop.xlane.xlu1 %3492  ;;  %3866 = vrcp.f32 %v3489_v0  ;;  %v3576_v61 = vmul.f32 %v3861_v37, %v7036_v21  ;;  %v3521_v26 = vpop.xlane.xlu0 %3520  ;;  %v3607_v21 = vmax.f32 %v4677_v2, 0.0 }
 0x367   :  { %v7149_v48 = vpop.eup %3862  ;;  %v3638_v54 = vmul.f32 %v3606_v24, %v3574_v31  ;;  %3868 = vrcp.f32 %v3493_v47  ;;  %v3610_v47 = vmax.f32 %v7453_v35, 0.0 }
 0x368   :  { %v7151_v45 = vpop.eup %3864  ;;  %v3640_v27 = vmul.f32 %v3608_v44, %v3576_v61  ;;  %3870 = vrcp.f32 %v3521_v26 }
 0x369   :  { %3670 = vst [vmem:[#allocation2 + $0x40] sm:$0xff] %v3638_v54  ;;  %3532 = vadd.xlane.f32.xlu0 %v7149_v48  ;;  %3516 = vadd.xlane.f32.xlu1 %v7151_v45  ;;  %3872 = vpow2.f32 %v3464_v62 }
 0x36a   :  { %3672 = vst [vmem:[#allocation2 + $0x50] sm:$0xff] %v3640_v27  ;;  %v3625_v27 = vmax.f32 %v7483_v10, 0.0 }
 0x36c   :  { %v3867_v58 = vpop.eup %3866 }
 0x36d   :  { %v3869_v30 = vpop.eup %3868  ;;  %v3575_v32 = vmul.f32 %v3867_v58, %v7047_v18  ;;  %v3519_v53 = vpop.xlane.xlu2 %3518  ;;  %v7563_v58 = vld [vmem:[#allocation16_spill] sm:$0xff] }
 0x36e   :  { %v3523_v29 = vpop.xlane.xlu1 %3522  ;;  %v3871_v12 = vpop.eup %3870  ;;  %3874 = vrcp.f32 %v3519_v53  ;;  %v3577_v38 = vmul.f32 %v3869_v30, %v7049_v52  ;;  %v3622_v52 = vmax.f32 %v5618_v51, 0.0  ;;  %v7564_v53 = vld [vmem:[#allocation24_spill] sm:$0xff] }
 0x36f   :  { %v3497_v23 = vpop.xlane.xlu0 %3496  ;;  %v3639_v28 = vmul.f32 %v3607_v21, %v3575_v32  ;;  %v3591_v36 = vmul.f32 %v3871_v12, %v7051_v59  ;;  %3876 = vrcp.f32 %v3523_v29  ;;  %v7161_v14 = vpop.eup %3872  ;;  %v3613_v29 = vmax.f32 %v7564_v53, 0.0 }
 0x370   :  { %v3641_v2 = vmul.f32 %v3609_v33, %v3577_v38  ;;  %3878 = vrcp.f32 %v3497_v23  ;;  %v7565_v38 = vld [vmem:[#allocation25_spill] sm:$0xff] }
 0x371   :  { %3671 = vst [vmem:[#allocation2 + $0x48] sm:$0xff] %v3639_v28  ;;  %3528 = vadd.xlane.f32.xlu1 %v7161_v14  ;;  %v3655_v18 = vmul.f32 %v3623_v15, %v3591_v36  ;;  %v3614_v23 = vmax.f32 %v7565_v38, 0.0 }
 0x372   :  { %3673 = vst [vmem:[#allocation2 + $0x58] sm:$0xff] %v3641_v2  ;;  %v7566_v2 = vld [vmem:[#allocation26_spill] sm:$0xff] }
 0x373   :  { %3687 = vst [vmem:[#allocation2 + $0xc8] sm:$0xff] %v3655_v18  ;;  %v3615_v18 = vmax.f32 %v7566_v2, 0.0 }
 0x374   :  { %v3875_v8 = vpop.eup %3874 }
 0x375   :  { %v3877_v11 = vpop.eup %3876  ;;  %v3590_v49 = vmul.f32 %v3875_v8, %v7057_v55  ;;  %v3495_v17 = vpop.xlane.xlu2 %3494 }
 0x376   :  { %v3499_v3 = vpop.xlane.xlu1 %3498  ;;  %v3879_v59 = vpop.eup %3878  ;;  %3880 = vrcp.f32 %v3495_v17  ;;  %v3592_v13 = vmul.f32 %v3877_v11, %v7059_v7  ;;  %v3612_v7 = vmax.f32 %v5077_v43, 0.0 }
 0x377   :  { %v3654_v37 = vmul.f32 %v3622_v52, %v3590_v49  ;;  %v3579_v24 = vmul.f32 %v3879_v59, %v7062_v6  ;;  %3882 = vrcp.f32 %v3499_v3  ;;  %v3616_v49 = vmax.f32 %v7537_v39, 0.0 }
 0x378   :  { %v3656_v31 = vmul.f32 %v3624_v50, %v3592_v13  ;;  %v3617_v50 = vmax.f32 %v5368_v57, 0.0 }
 0x379   :  { %3686 = vst [vmem:[#allocation2 + $0xc0] sm:$0xff] %v3654_v37  ;;  %v3643_v0 = vmul.f32 %v3611_v40, %v3579_v24  ;;  %v3618_v24 = vmax.f32 %v5503_v20, 0.0  ;;  %v7568_v20 = vld [vmem:[#allocation15_spill] sm:$0xff] }
 0x37a   :  { %3688 = vst [vmem:[#allocation2 + $0xd0] sm:$0xff] %v3656_v31 }
 0x37b   :  { %3675 = vst [vmem:[#allocation2 + $0x68] sm:$0xff] %v3643_v0 }
 0x37c   :  { %v3881_v51 = vpop.eup %3880  ;;  %v3527_v44 = vpop.xlane.xlu0 %3526 }
 0x37d   :  { %v3883_v55 = vpop.eup %3882  ;;  %v3578_v62 = vmul.f32 %v3881_v51, %v7068_v46  ;;  %v3525_v25 = vpop.xlane.xlu2 %3524  ;;  %v3626_v46 = vmax.f32 %v7563_v58, 0.0  ;;  %v7567_v51 = vld [vmem:[#allocation17_spill] sm:$0xff] }
 0x37e   :  { %3884 = vrcp.f32 %v3525_v25  ;;  %v3580_v4 = vmul.f32 %v3883_v55, %v7071_v60  ;;  %v3619_v55 = vmax.f32 %v7567_v51, 0.0 }
 0x37f   :  { %v3642_v6 = vmul.f32 %v3610_v47, %v3578_v62  ;;  %3886 = vrcp.f32 %v3527_v44 }
 0x380   :  { %v3644_v61 = vmul.f32 %v3612_v7, %v3580_v4  ;;  %v3620_v4 = vmax.f32 %v7568_v20, 0.0 }
 0x381   :  { %3674 = vst [vmem:[#allocation2 + $0x60] sm:$0xff] %v3642_v6 }
 0x382   :  { %3676 = vst [vmem:[#allocation2 + $0x70] sm:$0xff] %v3644_v61  ;;  %v7569_v61 = vld [vmem:[#allocation20_spill] sm:$0xff] }
 0x384   :  { %v3885_v26 = vpop.eup %3884 }
 0x385   :  { %v3887_v54 = vpop.eup %3886  ;;  %v3593_v35 = vmul.f32 %v3885_v26, %v7075_v16  ;;  %v3501_v43 = vpop.xlane.xlu2 %3500  ;;  %v3628_v26 = vmax.f32 %v7569_v61, 0.0 }
 0x386   :  { %v3594_v30 = vmul.f32 %v3887_v54, %v7080_v1  ;;  %3888 = vrcp.f32 %v3501_v43 }
 0x387   :  { %v3657_v21 = vmul.f32 %v3625_v27, %v3593_v35 }
 0x388   :  { %v3658_v32 = vmul.f32 %v3626_v46, %v3594_v30  ;;  %v7570_v46 = vld [vmem:[#allocation22_spill] sm:$0xff] }
 0x389   :  { %3689 = vst [vmem:[#allocation2 + $0xd8] sm:$0xff] %v3657_v21  ;;  %v3629_v30 = vmax.f32 %v7570_v46, 0.0 }
 0x38a   :  { %3690 = vst [vmem:[#allocation2 + $0xe0] sm:$0xff] %v3658_v32 }
 0x38c   :  { %v3889_v60 = vpop.eup %3888 }
 0x38d   :  { %v3581_v12 = vmul.f32 %v3889_v60, %v7086_v9 }
 0x38f   :  { %v3645_v33 = vmul.f32 %v3613_v29, %v3581_v12  ;;  %v7572_v12 = vld [vmem:[#allocation18_spill] sm:$0xff] }
 0x391   :  { %3677 = vst [vmem:[#allocation2 + $0x78] sm:$0xff] %v3645_v33  ;;  %v3627_v33 = vmax.f32 %v7572_v12, 0.0 }
 0x39d   :  { %v3503_v10 = vpop.xlane.xlu0 %3502 }
 0x39e   :  { %3890 = vrcp.f32 %v3503_v10 }
 0x3a4   :  { %v3891_v16 = vpop.eup %3890 }
 0x3a5   :  { %v3582_v1 = vmul.f32 %v3891_v16, %v7096_v63 }
 0x3a7   :  { %v3646_v28 = vmul.f32 %v3614_v23, %v3582_v1 }
 0x3a8   :  { %v3505_v15 = vpop.xlane.xlu1 %3504 }
 0x3a9   :  { %3678 = vst [vmem:[#allocation2 + $0x80] sm:$0xff] %v3646_v28  ;;  %3892 = vrcp.f32 %v3505_v15 }
 0x3af   :  { %v3893_v36 = vpop.eup %3892 }
 0x3b0   :  { %v3583_v8 = vmul.f32 %v3893_v36, %v7101_v56  ;;  %v3507_v11 = vpop.xlane.xlu2 %3506 }
 0x3b1   :  { %3894 = vrcp.f32 %v3507_v11 }
 0x3b2   :  { %v3647_v9 = vmul.f32 %v3615_v18, %v3583_v8 }
 0x3b4   :  { %3679 = vst [vmem:[#allocation2 + $0x88] sm:$0xff] %v3647_v9 }
 0x3b7   :  { %v3895_v52 = vpop.eup %3894 }
 0x3b8   :  { %v3584_v17 = vmul.f32 %v3895_v52, %v7109_v19 }
 0x3ba   :  { %v3648_v63 = vmul.f32 %v3616_v49, %v3584_v17 }
 0x3bb   :  { %v3509_v3 = vpop.xlane.xlu0 %3508 }
 0x3bc   :  { %3896 = vrcp.f32 %v3509_v3  ;;  %3680 = vst [vmem:[#allocation2 + $0x90] sm:$0xff] %v3648_v63 }
 0x3c2   :  { %v3897_v59 = vpop.eup %3896 }
 0x3c3   :  { %v3585_v13 = vmul.f32 %v3897_v59, %v7114_v5 }
 0x3c4   :  { %v3511_v56 = vpop.xlane.xlu1 %3510 }
 0x3c5   :  { %v3649_v37 = vmul.f32 %v3617_v50, %v3585_v13  ;;  %3898 = vrcp.f32 %v3511_v56 }
 0x3c7   :  { %3681 = vst [vmem:[#allocation2 + $0x98] sm:$0xff] %v3649_v37 }
 0x3cb   :  { %v3899_v40 = vpop.eup %3898 }
 0x3cc   :  { %v3586_v39 = vmul.f32 %v3899_v40, %v7121_v41  ;;  %v3513_v31 = vpop.xlane.xlu2 %3512 }
 0x3cd   :  { %3900 = vrcp.f32 %v3513_v31 }
 0x3ce   :  { %v3650_v19 = vmul.f32 %v3618_v24, %v3586_v39 }
 0x3d0   :  { %3682 = vst [vmem:[#allocation2 + $0xa0] sm:$0xff] %v3650_v19 }
 0x3d3   :  { %v3901_v0 = vpop.eup %3900 }
 0x3d4   :  { %v3587_v57 = vmul.f32 %v3901_v0, %v7129_v42  ;;  %v3515_v47 = vpop.xlane.xlu0 %3514  ;;  %v3531_v5 = vpop.xlane.xlu2 %3530 }
 0x3d5   :  { %3902 = vrcp.f32 %v3515_v47 }
 0x3d6   :  { %v3651_v62 = vmul.f32 %v3619_v55, %v3587_v57  ;;  %3904 = vrcp.f32 %v3531_v5 }
 0x3d8   :  { %3683 = vst [vmem:[#allocation2 + $0xa8] sm:$0xff] %v3651_v62 }
 0x3db   :  { %v3903_v25 = vpop.eup %3902 }
 0x3dc   :  { %v3905_v7 = vpop.eup %3904  ;;  %v3588_v41 = vmul.f32 %v3903_v25, %v7139_v34  ;;  %v3533_v44 = vpop.xlane.xlu0 %3532  ;;  %v7571_v34 = vld [vmem:[#allocation19_spill] sm:$0xff] }
 0x3dd   :  { %v3517_v6 = vpop.xlane.xlu1 %3516  ;;  %v3596_v54 = vmul.f32 %v3905_v7, %v7137_v22  ;;  %3906 = vrcp.f32 %v3533_v44  ;;  %v3621_v32 = vmax.f32 %v7571_v34, 0.0 }
 0x3de   :  { %v3652_v42 = vmul.f32 %v3620_v4, %v3588_v41  ;;  %3908 = vrcp.f32 %v3517_v6 }
 0x3df   :  { %v3660_v27 = vmul.f32 %v3628_v26, %v3596_v54 }
 0x3e0   :  { %3684 = vst [vmem:[#allocation2 + $0xb0] sm:$0xff] %v3652_v42 }
 0x3e1   :  { %3692 = vst [vmem:[#allocation2 + $0xf0] sm:$0xff] %v3660_v27 }
 0x3e3   :  { %v3907_v35 = vpop.eup %3906 }
 0x3e4   :  { %v3909_v58 = vpop.eup %3908  ;;  %v3597_v21 = vmul.f32 %v3907_v35, %v7149_v48 }
 0x3e5   :  { %v3529_v43 = vpop.xlane.xlu1 %3528  ;;  %v3589_v60 = vmul.f32 %v3909_v58, %v7151_v45 }
 0x3e6   :  { %3910 = vrcp.f32 %v3529_v43  ;;  %v3661_v53 = vmul.f32 %v3629_v30, %v3597_v21 }
 0x3e7   :  { %v3653_v22 = vmul.f32 %v3621_v32, %v3589_v60 }
 0x3e8   :  { %3693 = vst [vmem:[#allocation2 + $0xf8] sm:$0xff] %v3661_v53 }
 0x3e9   :  { %3685 = vst [vmem:[#allocation2 + $0xb8] sm:$0xff] %v3653_v22 }
 0x3ec   :  { %v3911_v29 = vpop.eup %3910 }
 0x3ed   :  { %v3595_v48 = vmul.f32 %v3911_v29, %v7161_v14 }
 0x3ef   :  { %v3659_v10 = vmul.f32 %v3627_v33, %v3595_v48 }
 0x3f1   :  { %3691 = vst [vmem:[#allocation2 + $0xe8] sm:$0xff] %v3659_v10 }
 0x3f2   :  { %3706 = dma.vmem_to_hbm [thread:$0]  %s3699_s12, 4096, %s3701_s15, [#allocation3], %s3942_s16, %s3942_s16, %s3943_s17  }
 0x3f3   :  { %3939 = dma.done.wait [#allocation3], 4096  }
 0x3f4   :  { %3940 = vsyncadd [#allocation3], 4294963200 }
 0x3f5   :  { %3711 = vsyncpa [#allocation3], 1 }

</bundles_post_ra>
